<compile_context>
chip_gen: v7x
topology: tpu7x:2x2x1
jax: 0.10.0
libtpu: 0.0.40
codegen_flags: <defaults>
</compile_context>

<pallas_src>
import functools

import numpy as np
import jax
import jax.numpy as jnp
from jax import lax
from jax.experimental import pallas as pl
from jax.experimental.pallas import tpu as pltpu


# --------------------------------------------------------------------------
# Pallas kernel
# --------------------------------------------------------------------------

def _hist_loss_kernel(x1_ref, x2_ref, loss_ref, h1_ref, h2_ref, *, num_bins):
    # x1_ref/x2_ref: (1, TR, 128) pixel tiles of one channel (padded with -1.0)
    # loss_ref:      (1, 8, 128)  per-channel loss, broadcast into the slab
    # h1_ref/h2_ref: (1, num_bins) f32 VMEM histogram accumulators
    t = pl.program_id(1)

    @pl.when(t == 0)
    def _init():
        h1_ref[...] = jnp.zeros_like(h1_ref)
        h2_ref[...] = jnp.zeros_like(h2_ref)

    def partial_hist(x):
        # x: (TR, 128) f32.  Out-of-range values (incl. -1.0 padding) ignored.
        valid = jnp.logical_and(x >= 0.0, x <= 1.0)
        idx = jnp.floor(x * num_bins).astype(jnp.int32)
        idx = jnp.clip(idx, 0, num_bins - 1)          # x == max -> last bin
        idx = jnp.where(valid, idx, -1)               # never matches a bin
        bins = lax.broadcasted_iota(jnp.int32, (1, 1, num_bins), 2)
        onehot = (idx[:, :, None] == bins).astype(jnp.float32)  # (TR,128,NB)
        s = jnp.sum(onehot, axis=0)                              # (128, NB)
        return jnp.sum(s, axis=0, keepdims=True)                 # (1, NB)

    h1_ref[...] += partial_hist(x1_ref[0])
    h2_ref[...] += partial_hist(x2_ref[0])

    @pl.when(t == pl.num_programs(1) - 1)
    def _finalize():
        h1 = h1_ref[...]                              # (1, NB)
        h2 = h2_ref[...]
        # Normalized histogram difference (matches hist /= hist.sum()).
        d = h1 / jnp.sum(h1) - h2 / jnp.sum(h2)       # (1, NB)
        # cdf1[i] - cdf2[i] = sum_{j <= i} d[j]: exact masked triangular sum
        # (i along sublanes, j along lanes), all VPU/XLU in f32.
        i_sub = lax.broadcasted_iota(jnp.int32, (num_bins, num_bins), 0)
        j_lane = lax.broadcasted_iota(jnp.int32, (num_bins, num_bins), 1)
        contrib = jnp.where(j_lane <= i_sub,
                            jnp.broadcast_to(d, (num_bins, num_bins)), 0.0)
        cdf_diff = jnp.sum(contrib, axis=1, keepdims=True)        # (NB, 1)
        loss = jnp.sum(jnp.abs(cdf_diff), axis=0, keepdims=True)  # (1, 1)
        loss_ref[0] = jnp.broadcast_to(loss, (8, 128))


# --------------------------------------------------------------------------
# Wrapper
# --------------------------------------------------------------------------

def _channel_major_lanes(img, tile_rows):
    """(B, C, H, W) -> (C, rows_pad, 128), padded with -1.0 (ignored by histc)."""
    B, C, H, W = img.shape
    n = B * H * W
    x = jnp.transpose(img, (1, 0, 2, 3)).reshape(C, n)
    rows = -(-n // 128)
    rows_pad = -(-rows // tile_rows) * tile_rows
    pad = rows_pad * 128 - n
    if pad:
        x = jnp.pad(x, ((0, 0), (0, pad)), constant_values=-1.0)
    return x.reshape(C, rows_pad, 128)


def histogram_matching_loss(img1, img2, num_bins=256, lambda_weight=1.0,
                            tile_rows=8):
    """Matches HistogramMatchingLoss.forward (lambda_weight is unused there)."""
    assert img1.shape == img2.shape, "Input tensors must have the same shape"
    B, C, H, W = img1.shape

    x1 = _channel_major_lanes(img1.astype(jnp.float32), tile_rows)
    x2 = _channel_major_lanes(img2.astype(jnp.float32), tile_rows)
    rows_pad = x1.shape[1]
    num_tiles = rows_pad // tile_rows

    kernel = functools.partial(_hist_loss_kernel, num_bins=num_bins)

    per_channel = pl.pallas_call(
        kernel,
        out_shape=jax.ShapeDtypeStruct((C, 8, 128), jnp.float32),
        grid_spec=pltpu.PrefetchScalarGridSpec(
            num_scalar_prefetch=0,
            grid=(C, num_tiles),
            in_specs=[
                pl.BlockSpec((1, tile_rows, 128), lambda c, t: (c, t, 0)),
                pl.BlockSpec((1, tile_rows, 128), lambda c, t: (c, t, 0)),
            ],
            out_specs=pl.BlockSpec((1, 8, 128), lambda c, t: (c, 0, 0)),
            scratch_shapes=[
                pltpu.VMEM((1, num_bins), jnp.float32),
                pltpu.VMEM((1, num_bins), jnp.float32),
            ],
        ),
        compiler_params=pltpu.CompilerParams(
            dimension_semantics=("parallel", "arbitrary"),
        ),
    )(x1, x2)

    # Glue: sum channel losses and apply the module's hard-coded /3.0.
    return jnp.sum(per_channel[:, 0, 0]) / 3.0


# --------------------------------------------------------------------------
# Pure-JAX reference (same histc semantics) for the correctness check
# --------------------------------------------------------------------------

def _reference_loss(img1, img2, num_bins=256):
    B, C, H, W = img1.shape
    x1 = jnp.transpose(img1, (1, 0, 2, 3)).reshape(C, -1)
    x2 = jnp.transpose(img2, (1, 0, 2, 3)).reshape(C, -1)

    def histc(x):
        valid = (x >= 0.0) & (x <= 1.0)
        idx = jnp.clip(jnp.floor(x * num_bins).astype(jnp.int32), 0, num_bins - 1)
        onehot = (idx[..., None] == jnp.arange(num_bins)[None, None, :]) & valid[..., None]
        return jnp.sum(onehot.astype(jnp.float32), axis=1)      # (C, NB)

    h1 = histc(x1)
    h2 = histc(x2)
    h1 = h1 / jnp.sum(h1, axis=1, keepdims=True)
    h2 = h2 / jnp.sum(h2, axis=1, keepdims=True)
    cdf1 = jnp.cumsum(h1, axis=1)
    cdf2 = jnp.cumsum(h2, axis=1)
    return jnp.sum(jnp.abs(cdf1 - cdf2)) / 3.0


# --------------------------------------------------------------------------

if __name__ == "__main__":
    key = jax.random.PRNGKey(0)
    k1, k2 = jax.random.split(key)

    img1 = jax.random.uniform(k1, (2, 3, 16, 16), jnp.float32)
    img2 = jax.random.uniform(k2, (2, 3, 16, 16), jnp.float32)

    loss_fn = jax.jit(functools.partial(histogram_matching_loss, num_bins=256))
    loss = jax.block_until_ready(loss_fn(img1, img2))

    ref = jax.block_until_ready(jax.jit(_reference_loss)(img1, img2))
    np.testing.assert_allclose(np.asarray(loss), np.asarray(ref),
                               rtol=1e-3, atol=1e-5)

    print("KERNEL_OK")
</pallas_src>

<mosaic_0001>
module attributes {stable_mosaic.version = 11 : i64} {
  func.func @_hist_loss_kernel(%arg0: i32, %arg1: i32, %arg2: memref<1x8x128xf32, #tpu.memory_space<vmem>>, %arg3: memref<1x8x128xf32, #tpu.memory_space<vmem>>, %arg4: memref<1x8x128xf32, #tpu.memory_space<vmem>>, %arg5: memref<1x256xf32, #tpu.memory_space<vmem>>, %arg6: memref<1x256xf32, #tpu.memory_space<vmem>>) attributes {dimension_semantics = [#tpu.dimension_semantics<parallel>, #tpu.dimension_semantics<arbitrary>], iteration_bounds = array<i64: 3, 1>, scalar_prefetch = 0 : i64, scratch_operands = 2 : i64, tpu.core_type = #tpu.core_type<tc>, window_params = [{transform_indices = @transform_0, window_bounds = array<i64: 1, 8, 128>}, {transform_indices = @transform_1, window_bounds = array<i64: 1, 8, 128>}, {transform_indices = @transform_2, window_bounds = array<i64: 1, 8, 128>}]} {
    %c0_i32 = arith.constant 0 : i32
    %0 = arith.cmpi eq, %arg1, %c0_i32 : i32
    %1 = arith.extui %0 : i1 to i32
    %c0_i32_0 = arith.constant 0 : i32
    %2 = arith.cmpi ne, %1, %c0_i32_0 : i32
    scf.if %2 {
      %cst_29 = arith.constant 0.000000e+00 : f32
      %66 = vector.broadcast %cst_29 : f32 to vector<1x256xf32>
      %c0_30 = arith.constant 0 : index
      %c0_31 = arith.constant 0 : index
      %67 = vector.load %arg5[%c0_30, %c0_31] : memref<1x256xf32, #tpu.memory_space<vmem>>, vector<1x256xf32>
      tpu.vector_store %arg5[%c0_30, %c0_31], %66 {strides = array<i32>} : memref<1x256xf32, #tpu.memory_space<vmem>>, vector<1x256xf32>,
      %cst_32 = arith.constant 0.000000e+00 : f32
      %68 = vector.broadcast %cst_32 : f32 to vector<1x256xf32>
      %c0_33 = arith.constant 0 : index
      %c0_34 = arith.constant 0 : index
      %69 = vector.load %arg6[%c0_33, %c0_34] : memref<1x256xf32, #tpu.memory_space<vmem>>, vector<1x256xf32>
      tpu.vector_store %arg6[%c0_33, %c0_34], %68 {strides = array<i32>} : memref<1x256xf32, #tpu.memory_space<vmem>>, vector<1x256xf32>,
    } else {
    }
    %c0 = arith.constant 0 : index
    %c0_1 = arith.constant 0 : index
    %3 = vector.load %arg5[%c0, %c0_1] : memref<1x256xf32, #tpu.memory_space<vmem>>, vector<1x256xf32>
    %c0_2 = arith.constant 0 : index
    %c0_3 = arith.constant 0 : index
    %c0_4 = arith.constant 0 : index
    %4 = vector.load %arg2[%c0_2, %c0_3, %c0_4] : memref<1x8x128xf32, #tpu.memory_space<vmem>>, vector<1x8x128xf32>
    %5 = vector.shape_cast %4 : vector<1x8x128xf32> to vector<8x128xf32>
    %cst = arith.constant 0.000000e+00 : f32
    %6 = vector.broadcast %cst : f32 to vector<8x128xf32>
    %7 = arith.cmpf oge, %5, %6 : vector<8x128xf32>
    %cst_5 = arith.constant 1.000000e+00 : f32
    %8 = vector.broadcast %cst_5 : f32 to vector<8x128xf32>
    %9 = arith.cmpf ole, %5, %8 : vector<8x128xf32>
    %10 = arith.andi %7, %9 : vector<8x128xi1>
    %cst_6 = arith.constant 2.560000e+02 : f32
    %11 = vector.broadcast %cst_6 : f32 to vector<8x128xf32>
    %12 = arith.mulf %5, %11 : vector<8x128xf32>
    %13 = math.floor %12 : vector<8x128xf32>
    %14 = arith.fptosi %13 : vector<8x128xf32> to vector<8x128xi32>
    %c0_i32_7 = arith.constant 0 : i32
    %c255_i32 = arith.constant 255 : i32
    %15 = vector.broadcast %c0_i32_7 : i32 to vector<8x128xi32>
    %16 = arith.maxsi %15, %14 : vector<8x128xi32>
    %17 = vector.broadcast %c255_i32 : i32 to vector<8x128xi32>
    %18 = arith.minsi %17, %16 : vector<8x128xi32>
    %c-1_i32 = arith.constant -1 : i32
    %19 = vector.broadcast %c-1_i32 : i32 to vector<8x128xi32>
    %20 = arith.select %10, %18, %19 : vector<8x128xi1>, vector<8x128xi32>
    %21 = tpu.iota {dimensions = array<i32: 2>} : vector<1x1x256xi32>
    %22 = vector.shape_cast %20 : vector<8x128xi32> to vector<8x128x1xi32>
    %23 = vector.broadcast %22 : vector<8x128x1xi32> to vector<8x128x256xi32>
    %24 = vector.broadcast %21 : vector<1x1x256xi32> to vector<8x128x256xi32>
    %25 = arith.cmpi eq, %23, %24 : vector<8x128x256xi32>
    %26 = arith.extui %25 : vector<8x128x256xi1> to vector<8x128x256xi32>
    %27 = arith.sitofp %26 : vector<8x128x256xi32> to vector<8x128x256xf32>
    %cst_8 = arith.constant dense<0.000000e+00> : vector<128x256xf32>
    %28 = vector.multi_reduction <add>, %27, %cst_8 [0] : vector<8x128x256xf32> to vector<128x256xf32>
    %cst_9 = arith.constant dense<0.000000e+00> : vector<256xf32>
    %29 = vector.multi_reduction <add>, %28, %cst_9 [0] : vector<128x256xf32> to vector<256xf32>
    %30 = vector.shape_cast %29 : vector<256xf32> to vector<1x256xf32>
    %31 = arith.addf %3, %30 : vector<1x256xf32>
    %c0_10 = arith.constant 0 : index
    %c0_11 = arith.constant 0 : index
    %32 = vector.load %arg5[%c0_10, %c0_11] : memref<1x256xf32, #tpu.memory_space<vmem>>, vector<1x256xf32>
    tpu.vector_store %arg5[%c0_10, %c0_11], %31 {strides = array<i32>} : memref<1x256xf32, #tpu.memory_space<vmem>>, vector<1x256xf32>,
    %c0_12 = arith.constant 0 : index
    %c0_13 = arith.constant 0 : index
    %33 = vector.load %arg6[%c0_12, %c0_13] : memref<1x256xf32, #tpu.memory_space<vmem>>, vector<1x256xf32>
    %c0_14 = arith.constant 0 : index
    %c0_15 = arith.constant 0 : index
    %c0_16 = arith.constant 0 : index
    %34 = vector.load %arg3[%c0_14, %c0_15, %c0_16] : memref<1x8x128xf32, #tpu.memory_space<vmem>>, vector<1x8x128xf32>
    %35 = vector.shape_cast %34 : vector<1x8x128xf32> to vector<8x128xf32>
    %cst_17 = arith.constant 0.000000e+00 : f32
    %36 = vector.broadcast %cst_17 : f32 to vector<8x128xf32>
    %37 = arith.cmpf oge, %35, %36 : vector<8x128xf32>
    %cst_18 = arith.constant 1.000000e+00 : f32
    %38 = vector.broadcast %cst_18 : f32 to vector<8x128xf32>
    %39 = arith.cmpf ole, %35, %38 : vector<8x128xf32>
    %40 = arith.andi %37, %39 : vector<8x128xi1>
    %cst_19 = arith.constant 2.560000e+02 : f32
    %41 = vector.broadcast %cst_19 : f32 to vector<8x128xf32>
    %42 = arith.mulf %35, %41 : vector<8x128xf32>
    %43 = math.floor %42 : vector<8x128xf32>
    %44 = arith.fptosi %43 : vector<8x128xf32> to vector<8x128xi32>
    %c0_i32_20 = arith.constant 0 : i32
    %c255_i32_21 = arith.constant 255 : i32
    %45 = vector.broadcast %c0_i32_20 : i32 to vector<8x128xi32>
    %46 = arith.maxsi %45, %44 : vector<8x128xi32>
    %47 = vector.broadcast %c255_i32_21 : i32 to vector<8x128xi32>
    %48 = arith.minsi %47, %46 : vector<8x128xi32>
    %c-1_i32_22 = arith.constant -1 : i32
    %49 = vector.broadcast %c-1_i32_22 : i32 to vector<8x128xi32>
    %50 = arith.select %40, %48, %49 : vector<8x128xi1>, vector<8x128xi32>
    %51 = tpu.iota {dimensions = array<i32: 2>} : vector<1x1x256xi32>
    %52 = vector.shape_cast %50 : vector<8x128xi32> to vector<8x128x1xi32>
    %53 = vector.broadcast %52 : vector<8x128x1xi32> to vector<8x128x256xi32>
    %54 = vector.broadcast %51 : vector<1x1x256xi32> to vector<8x128x256xi32>
    %55 = arith.cmpi eq, %53, %54 : vector<8x128x256xi32>
    %56 = arith.extui %55 : vector<8x128x256xi1> to vector<8x128x256xi32>
    %57 = arith.sitofp %56 : vector<8x128x256xi32> to vector<8x128x256xf32>
    %cst_23 = arith.constant dense<0.000000e+00> : vector<128x256xf32>
    %58 = vector.multi_reduction <add>, %57, %cst_23 [0] : vector<8x128x256xf32> to vector<128x256xf32>
    %cst_24 = arith.constant dense<0.000000e+00> : vector<256xf32>
    %59 = vector.multi_reduction <add>, %58, %cst_24 [0] : vector<128x256xf32> to vector<256xf32>
    %60 = vector.shape_cast %59 : vector<256xf32> to vector<1x256xf32>
    %61 = arith.addf %33, %60 : vector<1x256xf32>
    %c0_25 = arith.constant 0 : index
    %c0_26 = arith.constant 0 : index
    %62 = vector.load %arg6[%c0_25, %c0_26] : memref<1x256xf32, #tpu.memory_space<vmem>>, vector<1x256xf32>
    tpu.vector_store %arg6[%c0_25, %c0_26], %61 {strides = array<i32>} : memref<1x256xf32, #tpu.memory_space<vmem>>, vector<1x256xf32>,
    %c0_i32_27 = arith.constant 0 : i32
    %63 = arith.cmpi eq, %arg1, %c0_i32_27 : i32
    %64 = arith.extui %63 : i1 to i32
    %c0_i32_28 = arith.constant 0 : i32
    %65 = arith.cmpi ne, %64, %c0_i32_28 : i32
    scf.if %65 {
      %c0_29 = arith.constant 0 : index
      %c0_30 = arith.constant 0 : index
      %66 = vector.load %arg5[%c0_29, %c0_30] : memref<1x256xf32, #tpu.memory_space<vmem>>, vector<1x256xf32>
      %c0_31 = arith.constant 0 : index
      %c0_32 = arith.constant 0 : index
      %67 = vector.load %arg6[%c0_31, %c0_32] : memref<1x256xf32, #tpu.memory_space<vmem>>, vector<1x256xf32>
      %68 = vector.shape_cast %66 : vector<1x256xf32> to vector<1x1x256xf32>
      %cst_33 = arith.constant dense<0.000000e+00> : vector<1xf32>
      %69 = vector.multi_reduction <add>, %68, %cst_33 [1, 2] : vector<1x1x256xf32> to vector<1xf32>
      %70 = vector.shape_cast %69 : vector<1xf32> to vector<1x1x1xf32>
      %71 = vector.extract %70[0, 0, 0] : f32 from vector<1x1x1xf32>
      %72 = vector.broadcast %71 : f32 to vector<1x256xf32>
      %73 = arith.divf %66, %72 : vector<1x256xf32>
      %74 = vector.shape_cast %67 : vector<1x256xf32> to vector<1x1x256xf32>
      %cst_34 = arith.constant dense<0.000000e+00> : vector<1xf32>
      %75 = vector.multi_reduction <add>, %74, %cst_34 [1, 2] : vector<1x1x256xf32> to vector<1xf32>
      %76 = vector.shape_cast %75 : vector<1xf32> to vector<1x1x1xf32>
      %77 = vector.extract %76[0, 0, 0] : f32 from vector<1x1x1xf32>
      %78 = vector.broadcast %77 : f32 to vector<1x256xf32>
      %79 = arith.divf %67, %78 : vector<1x256xf32>
      %80 = arith.subf %73, %79 : vector<1x256xf32>
      %81 = tpu.iota {dimensions = array<i32: 0>} : vector<256x256xi32>
      %82 = tpu.iota {dimensions = array<i32: 1>} : vector<256x256xi32>
      %83 = arith.cmpi sle, %82, %81 : vector<256x256xi32>
      %84 = vector.shape_cast %80 : vector<1x256xf32> to vector<1x256xf32>
      %85 = vector.broadcast %84 : vector<1x256xf32> to vector<256x256xf32>
      %cst_35 = arith.constant 0.000000e+00 : f32
      %86 = vector.broadcast %cst_35 : f32 to vector<256x256xf32>
      %87 = arith.select %83, %85, %86 : vector<256x256xi1>, vector<256x256xf32>
      %cst_36 = arith.constant dense<0.000000e+00> : vector<256xf32>
      %88 = vector.multi_reduction <add>, %87, %cst_36 [1] : vector<256x256xf32> to vector<256xf32>
      %89 = vector.shape_cast %88 : vector<256xf32> to vector<256x1xf32>
      %90 = math.absf %89 : vector<256x1xf32>
      %cst_37 = arith.constant dense<0.000000e+00> : vector<1xf32>
      %91 = vector.multi_reduction <add>, %90, %cst_37 [0] : vector<256x1xf32> to vector<1xf32>
      %92 = vector.shape_cast %91 : vector<1xf32> to vector<1x1xf32>
      %93 = vector.shape_cast %92 : vector<1x1xf32> to vector<1x1xf32>
      %94 = vector.broadcast %93 : vector<1x1xf32> to vector<8x128xf32>
      %c0_38 = arith.constant 0 : index
      %c0_39 = arith.constant 0 : index
      %c0_40 = arith.constant 0 : index
      %95 = vector.load %arg4[%c0_38, %c0_39, %c0_40] : memref<1x8x128xf32, #tpu.memory_space<vmem>>, vector<1x8x128xf32>
      %96 = vector.shape_cast %95 : vector<1x8x128xf32> to vector<8x128xf32>
      %97 = vector.shape_cast %94 : vector<8x128xf32> to vector<1x8x128xf32>
      tpu.vector_store %arg4[%c0_38, %c0_39, %c0_40], %97 {strides = array<i32>} : memref<1x8x128xf32, #tpu.memory_space<vmem>>, vector<1x8x128xf32>,
    } else {
    }
    return
  }
  func.func @transform_0(%arg0: i32, %arg1: i32) -> (i32, i32, i32) {
    %c0_i32 = arith.constant 0 : i32
    %c0_i32_0 = arith.constant 0 : i32
    return %arg0, %arg1, %c0_i32 : i32, i32, i32
  }
  func.func @transform_1(%arg0: i32, %arg1: i32) -> (i32, i32, i32) {
    %c0_i32 = arith.constant 0 : i32
    %c0_i32_0 = arith.constant 0 : i32
    return %arg0, %arg1, %c0_i32 : i32, i32, i32
  }
  func.func @transform_2(%arg0: i32, %arg1: i32) -> (i32, i32, i32) {
    %c0_i32 = arith.constant 0 : i32
    %c0_i32_0 = arith.constant 0 : i32
    %c0_i32_1 = arith.constant 0 : i32
    return %arg0, %c0_i32, %c0_i32_0 : i32, i32, i32
  }
}

</mosaic_0001>

<bundles_post_ra>
// kernel: histogram_matching_loss.1
= control target key start
LH: loop header
LB: loop body
LE: loop exit
PB: predicated region body
PF: predicated region fallthrough
CT: control target
= control target key end

     0   :  { %s4490_s9 = smov 0   ;;  %s4492_s10 = smov 0   ;;  %s8167_s0 = inlined_call_operand.vmem [shape: f32[3,8,128], index: 0, kind: input, shape index: {}]   ;;  %s8168_s1 = inlined_call_operand.vmem [shape: f32[3,8,128], index: 1, kind: input, shape index: {}]   ;;  %s8169_s2 = inlined_call_operand.vmem [shape: f32[3,8,128], index: 2, kind: output, shape index: {}]  }
   0x1   :  { %s4494_s11 = smov 0  }
   0x2 LB: > { %s24_s12 = sadd.s32 1, %s4467_s10  ;;  %p3893_p0 = scmp.ge.s32.totalorder %s4471_s11, 1  ;;  %s4471_s11 = sphi %s4494_s11, %s12_s11   ;;  %s4467_s10 = sphi %s4492_s10, %s8515_s10   ;;  %s4463_s9 = sphi %s4490_s9, %s8514_s9  }
   0x3   : > { %p26_p1 = scmp.ge.s32.totalorder %s24_s12, 3  ;;  %p142_p2 = scmp.lt.s32.totalorder %s4471_s11, 4 }
   0x5   : > { %s8517_s12 = smov (%p26_p1, %s24_s12), 0  ;;  %p143_p3 = pnand %p3893_p0, %p142_p2 }
   0x7   : > { %146 = sbr.rel (%p143_p3) target bundleno = 1145 (0x479), region = 28 }
   0xe   : > { %p172_p4 = scmp.lt.s32.totalorder %s4463_s9, 2  ;;  %v8170_v2 = vlaneseq }
  0x10   : > { %s8519_s9 = smov (!%p172_p4, %s4463_s9), 2  ;;  %v4515_v5 = vshrl.u32 %v8170_v2, 7 }
  0x11   : > { %s4508_s13 = sshll.u32 %s8519_s9, 3 }
  0x12   : > { %s178_s16 = scalar_lea.vmem %s8167_s0, %s4508_s13  ;;  %8269 = vst [vmem:[#allocation4_spill] sm:$0xff] %v4515_v5  ;;  %v4518_v8 = vsub.s32 0, %v4515_v5  ;;  %v4525_v12 = vsub.s32 1, %v4515_v5  ;;  %v352_v14 = vsub.s32 2, %v4515_v5  ;;  %v419_v16 = vsub.s32 3, %v4515_v5  ;;  %s185_s19 = scalar_lea.vmem %s8168_s1, %s4508_s13 }
  0x13   : > { %v201_v0 = vld [vmem:[%s178_s16] sm:$0xff]  ;;  %v486_v23 = vsub.s32 4, %v4515_v5  ;;  %s189_s24 = scalar_lea.vmem %s8169_s2, %s4508_s13 }
  0x14   : > { %v205_v1 = vmul.f32 256.0, %v201_v0  ;;  %vm202_vm0 = vcmp.ge.f32.partialorder %v201_v0, 0.0  ;;  %vm203_vm1 = vcmp.le.f32.partialorder %v201_v0, 1.0  ;;  %8270 = vst [vmem:[#allocation5_spill] sm:$0xff] %v4518_v8  ;;  %8271 = vst [vmem:[#allocation6_spill] sm:$0xff] %v4525_v12  ;;  %v1811_v22 = vld [vmem:[%s185_s19] sm:$0xff] }
  0x15   : > { %vm204_vm3 = vmand %vm202_vm0, %vm203_vm1  ;;  %v1815_v24 = vmul.f32 256.0, %v1811_v22  ;;  %vm1812_vm6 = vcmp.ge.f32.partialorder %v1811_v22, 0.0  ;;  %vm1813_vm7 = vcmp.le.f32.partialorder %v1811_v22, 1.0 }
  0x16   : > { %v206_v3 = vfloor.f32 %v205_v1  ;;  %vm1814_vm9 = vmand %vm1812_vm6, %vm1813_vm7 }
  0x17   : > { %v1816_v28 = vfloor.f32 %v1815_v24 }
  0x18   : > { %v4411_v4 = vtrunc.f32 %v206_v3 }
  0x19   : > { %v4413_v31 = vtrunc.f32 %v1816_v28 }
  0x1a   : > { %v4412_v6 = vcvt.f32.s32 %v4411_v4 }
  0x1b   : > { %v4414_v34 = vcvt.f32.s32 %v4413_v31 }
  0x1c   : > { %vm208_vm2 = vcmp.gt.s32.totalorder %v4412_v6, 0 }
  0x1d   : > { %v209_v7 = vsel %vm208_vm2, %v4412_v6, 0  ;;  %vm1818_vm5 = vcmp.gt.s32.totalorder %v4414_v34, 0 }
  0x1e   : > { %vm210_vm4 = vcmp.lt.s32.totalorder %v209_v7, 255  ;;  %v1819_v39 = vsel %vm1818_vm5, %v4414_v34, 0  ;;  %v620_v34 = vsub.s32 6, %v4515_v5 }
  0x1f   : > { %v211_v9 = vsel %vm210_vm4, %v209_v7, 255  ;;  %vm1820_vm8 = vcmp.lt.s32.totalorder %v1819_v39, 255  ;;  %v553_v7 = vsub.s32 5, %v4515_v5 }
  0x20   : > { %v4520_v10 = vsel %vm204_vm3, %v211_v9, 4294967295  ;;  %v1821_v44 = vsel %vm1820_vm8, %v1819_v39, 255 }
  0x21   : > { %v219_v11 = vrot.slane %v4520_v10, %v4518_v8  ;;  %v286_v13 = vrot.slane %v4520_v10, %v4525_v12  ;;  %v353_v15 = vrot.slane %v4520_v10, %v352_v14  ;;  %v420_v17 = vrot.slane %v4520_v10, %v419_v16 }
  0x22   : > { %v4557_v27 = vrot.slane %v4520_v10, %v486_v23  ;;  %v4595_v45 = vsel %vm1814_vm9, %v1821_v44, 4294967295  ;;  %v4719_v2 = vrot.slane %v4520_v10, %v620_v34 }
  0x23   : > { %229 = vbcast.lane.b32.xlu1 %v219_v11, 272  ;;  %221 = vbcast.lane.b32.xlu0 %v219_v11, 256  ;;  %v4605_v48 = vrot.slane %v4595_v45, %v4518_v8  ;;  %v4615_v51 = vrot.slane %v4595_v45, %v4525_v12  ;;  %v4632_v56 = vrot.slane %v4595_v45, %v352_v14 }
  0x24   : > { %8272 = vst [vmem:[#allocation7_spill] sm:$0xff] %v4557_v27  ;;  %v4649_v61 = vrot.slane %v4595_v45, %v419_v16  ;;  %v4672_v6 = vrot.slane %v4595_v45, %v486_v23  ;;  %v4709_v31 = vrot.slane %v4595_v45, %v553_v7  ;;  %8289 = vst [vmem:[#allocation24_spill] sm:$0xff] %v4719_v2 }
  0x27   : > { %233 = vbcast.lane.b32.xlu1 %v219_v11, 280  ;;  %225 = vbcast.lane.b32.xlu0 %v219_v11, 264 }
  0x2b   : > { %241 = vbcast.lane.b32.xlu1 %v219_v11, 296  ;;  %237 = vbcast.lane.b32.xlu0 %v219_v11, 288 }
  0x2f   : > { %249 = vbcast.lane.b32.xlu1 %v219_v11, 312  ;;  %245 = vbcast.lane.b32.xlu0 %v219_v11, 304 }
  0x33   : > { %257 = vbcast.lane.b32.xlu1 %v219_v11, 328  ;;  %253 = vbcast.lane.b32.xlu0 %v219_v11, 320 }
  0x37   : > { %265 = vbcast.lane.b32.xlu1 %v219_v11, 344  ;;  %261 = vbcast.lane.b32.xlu0 %v219_v11, 336 }
  0x3b   : > { %273 = vbcast.lane.b32.xlu1 %v219_v11, 360  ;;  %269 = vbcast.lane.b32.xlu0 %v219_v11, 352 }
  0x3f   : > { %281 = vbcast.lane.b32.xlu1 %v219_v11, 376  ;;  %277 = vbcast.lane.b32.xlu0 %v219_v11, 368 }
  0x43   : > { %292 = vbcast.lane.b32.xlu1 %v286_v13, 264  ;;  %288 = vbcast.lane.b32.xlu0 %v286_v13, 256 }
  0x47   : > { %300 = vbcast.lane.b32.xlu1 %v286_v13, 280  ;;  %296 = vbcast.lane.b32.xlu0 %v286_v13, 272 }
  0x4b   : > { %308 = vbcast.lane.b32.xlu1 %v286_v13, 296  ;;  %304 = vbcast.lane.b32.xlu0 %v286_v13, 288 }
  0x4f   : > { %316 = vbcast.lane.b32.xlu1 %v286_v13, 312  ;;  %312 = vbcast.lane.b32.xlu0 %v286_v13, 304 }
  0x53   : > { %324 = vbcast.lane.b32.xlu1 %v286_v13, 328  ;;  %320 = vbcast.lane.b32.xlu0 %v286_v13, 320 }
  0x57   : > { %332 = vbcast.lane.b32.xlu1 %v286_v13, 344  ;;  %328 = vbcast.lane.b32.xlu0 %v286_v13, 336 }
  0x5b   : > { %340 = vbcast.lane.b32.xlu1 %v286_v13, 360  ;;  %336 = vbcast.lane.b32.xlu0 %v286_v13, 352 }
  0x5f   : > { %348 = vbcast.lane.b32.xlu1 %v286_v13, 376  ;;  %344 = vbcast.lane.b32.xlu0 %v286_v13, 368  ;;  %v4682_v13 = vrot.slane %v4520_v10, %v553_v7 }
  0x63   : > { %359 = vbcast.lane.b32.xlu1 %v353_v15, 264  ;;  %355 = vbcast.lane.b32.xlu0 %v353_v15, 256 }
  0x67   : > { %367 = vbcast.lane.b32.xlu1 %v353_v15, 280  ;;  %363 = vbcast.lane.b32.xlu0 %v353_v15, 272 }
  0x6b   : > { %375 = vbcast.lane.b32.xlu1 %v353_v15, 296  ;;  %371 = vbcast.lane.b32.xlu0 %v353_v15, 288 }
  0x6f   : > { %383 = vbcast.lane.b32.xlu1 %v353_v15, 312  ;;  %379 = vbcast.lane.b32.xlu0 %v353_v15, 304 }
  0x73   : > { %391 = vbcast.lane.b32.xlu1 %v353_v15, 328  ;;  %387 = vbcast.lane.b32.xlu0 %v353_v15, 320 }
  0x77   : > { %399 = vbcast.lane.b32.xlu1 %v353_v15, 344  ;;  %395 = vbcast.lane.b32.xlu0 %v353_v15, 336 }
  0x7b   : > { %407 = vbcast.lane.b32.xlu1 %v353_v15, 360  ;;  %403 = vbcast.lane.b32.xlu0 %v353_v15, 352 }
  0x7f   : > { %415 = vbcast.lane.b32.xlu1 %v353_v15, 376  ;;  %411 = vbcast.lane.b32.xlu0 %v353_v15, 368 }
  0x83   : > { %426 = vbcast.lane.b32.xlu1 %v420_v17, 264  ;;  %422 = vbcast.lane.b32.xlu0 %v420_v17, 256 }
  0x87   : > { %434 = vbcast.lane.b32.xlu1 %v420_v17, 280  ;;  %430 = vbcast.lane.b32.xlu0 %v420_v17, 272 }
  0x8b   : > { %442 = vbcast.lane.b32.xlu1 %v420_v17, 296  ;;  %438 = vbcast.lane.b32.xlu0 %v420_v17, 288 }
  0x8f   : > { %450 = vbcast.lane.b32.xlu1 %v420_v17, 312  ;;  %446 = vbcast.lane.b32.xlu0 %v420_v17, 304 }
  0x93   : > { %458 = vbcast.lane.b32.xlu1 %v420_v17, 328  ;;  %454 = vbcast.lane.b32.xlu0 %v420_v17, 320 }
  0x95   : > { %v4537_v18 = vpop.permute.xlu1 %229  ;;  %v4539_v19 = vpop.permute.xlu0 %221 }
  0x97   : > { %466 = vbcast.lane.b32.xlu1 %v420_v17, 344  ;;  %462 = vbcast.lane.b32.xlu0 %v420_v17, 336 }
  0x99   : > { %v4545_v20 = vpop.permute.xlu1 %233  ;;  %v4547_v21 = vpop.permute.xlu0 %225 }
  0x9b   : > { %474 = vbcast.lane.b32.xlu1 %v420_v17, 360  ;;  %470 = vbcast.lane.b32.xlu0 %v420_v17, 352 }
  0x9d   : > { %v4550_v25 = vpop.permute.xlu1 %241  ;;  %v4552_v26 = vpop.permute.xlu0 %237 }
  0x9f   : > { %482 = vbcast.lane.b32.xlu1 %v420_v17, 376  ;;  %478 = vbcast.lane.b32.xlu0 %v420_v17, 368 }
  0xa1   : > { %v4559_v29 = vpop.permute.xlu1 %249  ;;  %v4561_v30 = vpop.permute.xlu0 %245 }
  0xa3   : > { %493 = vbcast.lane.b32.xlu1 %v4557_v27, 264  ;;  %489 = vbcast.lane.b32.xlu0 %v4557_v27, 256 }
  0xa5   : > { %v4565_v32 = vpop.permute.xlu1 %257  ;;  %v4567_v33 = vpop.permute.xlu0 %253 }
  0xa7   : > { %501 = vbcast.lane.b32.xlu1 %v4557_v27, 280  ;;  %497 = vbcast.lane.b32.xlu0 %v4557_v27, 272 }
  0xa9   : > { %v4571_v35 = vpop.permute.xlu1 %265  ;;  %v4573_v36 = vpop.permute.xlu0 %261 }
  0xab   : > { %509 = vbcast.lane.b32.xlu1 %v4557_v27, 296  ;;  %505 = vbcast.lane.b32.xlu0 %v4557_v27, 288 }
  0xad   : > { %v4577_v37 = vpop.permute.xlu1 %273  ;;  %v4579_v38 = vpop.permute.xlu0 %269 }
  0xaf   : > { %517 = vbcast.lane.b32.xlu1 %v4557_v27, 312  ;;  %513 = vbcast.lane.b32.xlu0 %v4557_v27, 304 }
  0xb1   : > { %v4583_v40 = vpop.permute.xlu1 %281  ;;  %v4585_v41 = vpop.permute.xlu0 %277 }
  0xb3   : > { %525 = vbcast.lane.b32.xlu1 %v4557_v27, 328  ;;  %521 = vbcast.lane.b32.xlu0 %v4557_v27, 320 }
  0xb5   : > { %v4589_v42 = vpop.permute.xlu1 %292  ;;  %v4591_v43 = vpop.permute.xlu0 %288 }
  0xb7   : > { %533 = vbcast.lane.b32.xlu1 %v4557_v27, 344  ;;  %529 = vbcast.lane.b32.xlu0 %v4557_v27, 336 }
  0xb9   : > { %v4597_v46 = vpop.permute.xlu1 %300  ;;  %v4599_v47 = vpop.permute.xlu0 %296 }
  0xbb   : > { %541 = vbcast.lane.b32.xlu1 %v4557_v27, 360  ;;  %537 = vbcast.lane.b32.xlu0 %v4557_v27, 352 }
  0xbd   : > { %v4607_v49 = vpop.permute.xlu1 %308  ;;  %v4609_v50 = vpop.permute.xlu0 %304 }
  0xbf   : > { %1832 = vbcast.lane.b32.xlu1 %v4605_v48, 264  ;;  %1828 = vbcast.lane.b32.xlu0 %v4605_v48, 256 }
  0xc1   : > { %v4617_v52 = vpop.permute.xlu1 %316  ;;  %v4619_v53 = vpop.permute.xlu0 %312 }
  0xc3   : > { %1899 = vbcast.lane.b32.xlu1 %v4615_v51, 264  ;;  %1895 = vbcast.lane.b32.xlu0 %v4615_v51, 256 }
  0xc5   : > { %v4623_v54 = vpop.permute.xlu1 %324  ;;  %v4625_v55 = vpop.permute.xlu0 %320 }
  0xc7   : > { %1903 = vbcast.lane.b32.xlu1 %v4615_v51, 272  ;;  %1836 = vbcast.lane.b32.xlu0 %v4605_v48, 272 }
  0xc9   : > { %v4634_v57 = vpop.permute.xlu1 %332  ;;  %v4636_v58 = vpop.permute.xlu0 %328 }
  0xcb   : > { %1966 = vbcast.lane.b32.xlu1 %v4632_v56, 264  ;;  %1962 = vbcast.lane.b32.xlu0 %v4632_v56, 256 }
  0xcd   : > { %v4640_v59 = vpop.permute.xlu1 %340  ;;  %v4642_v60 = vpop.permute.xlu0 %336 }
  0xcf   : > { %1907 = vbcast.lane.b32.xlu1 %v4615_v51, 280  ;;  %1840 = vbcast.lane.b32.xlu0 %v4605_v48, 280 }
  0xd1   : > { %v4651_v62 = vpop.permute.xlu1 %348  ;;  %v4653_v63 = vpop.permute.xlu0 %344 }
  0xd3   : > { %2029 = vbcast.lane.b32.xlu1 %v4649_v61, 256  ;;  %1970 = vbcast.lane.b32.xlu0 %v4632_v56, 272 }
  0xd5   : > { %v4657_v0 = vpop.permute.xlu1 %359  ;;  %v4659_v1 = vpop.permute.xlu0 %355 }
  0xd6   : > { %8273 = vst [vmem:[#allocation8_spill] sm:$0xff] %v4657_v0  ;;  %8274 = vst [vmem:[#allocation9_spill] sm:$0xff] %v4659_v1 }
  0xd7   : > { %1844 = vbcast.lane.b32.xlu1 %v4605_v48, 288  ;;  %2033 = vbcast.lane.b32.xlu0 %v4649_v61, 264 }
  0xd9   : > { %v4663_v3 = vpop.permute.xlu1 %367  ;;  %v4665_v4 = vpop.permute.xlu0 %363 }
  0xda   : > { %8275 = vst [vmem:[#allocation10_spill] sm:$0xff] %v4663_v3  ;;  %8276 = vst [vmem:[#allocation11_spill] sm:$0xff] %v4665_v4 }
  0xdb   : > { %1974 = vbcast.lane.b32.xlu1 %v4632_v56, 280  ;;  %1911 = vbcast.lane.b32.xlu0 %v4615_v51, 288 }
  0xdd   : > { %v4675_v9 = vpop.permute.xlu1 %375  ;;  %v4677_v11 = vpop.permute.xlu0 %371 }
  0xde   : > { %8277 = vst [vmem:[#allocation12_spill] sm:$0xff] %v4675_v9  ;;  %8278 = vst [vmem:[#allocation13_spill] sm:$0xff] %v4677_v11 }
  0xdf   : > { %2096 = vbcast.lane.b32.xlu1 %v4672_v6, 256  ;;  %2037 = vbcast.lane.b32.xlu0 %v4649_v61, 272 }
  0xe1   : > { %v4684_v14 = vpop.permute.xlu1 %383  ;;  %v4686_v15 = vpop.permute.xlu0 %379 }
  0xe2   : > { %8279 = vst [vmem:[#allocation14_spill] sm:$0xff] %v4684_v14  ;;  %8280 = vst [vmem:[#allocation15_spill] sm:$0xff] %v4686_v15 }
  0xe3   : > { %556 = vbcast.lane.b32.xlu1 %v4682_v13, 256  ;;  %2100 = vbcast.lane.b32.xlu0 %v4672_v6, 264 }
  0xe5   : > { %v4690_v16 = vpop.permute.xlu1 %391  ;;  %v4692_v17 = vpop.permute.xlu0 %387 }
  0xe6   : > { %8281 = vst [vmem:[#allocation16_spill] sm:$0xff] %v4690_v16  ;;  %8282 = vst [vmem:[#allocation17_spill] sm:$0xff] %v4692_v17 }
  0xe7   : > { %1848 = vbcast.lane.b32.xlu1 %v4605_v48, 296  ;;  %560 = vbcast.lane.b32.xlu0 %v4682_v13, 264 }
  0xe9   : > { %v4696_v22 = vpop.permute.xlu1 %399  ;;  %v4698_v23 = vpop.permute.xlu0 %395 }
  0xea   : > { %8283 = vst [vmem:[#allocation18_spill] sm:$0xff] %v4696_v22  ;;  %8284 = vst [vmem:[#allocation19_spill] sm:$0xff] %v4698_v23 }
  0xeb   : > { %1978 = vbcast.lane.b32.xlu1 %v4632_v56, 288  ;;  %1915 = vbcast.lane.b32.xlu0 %v4615_v51, 296 }
  0xed   : > { %v4702_v24 = vpop.permute.xlu1 %407  ;;  %v4704_v28 = vpop.permute.xlu0 %403 }
  0xee   : > { %8285 = vst [vmem:[#allocation20_spill] sm:$0xff] %v4702_v24  ;;  %8286 = vst [vmem:[#allocation21_spill] sm:$0xff] %v4704_v28  ;;  %v8304_v28 = vlaneseq }
  0xef   : > { %2104 = vbcast.lane.b32.xlu1 %v4672_v6, 272  ;;  %2041 = vbcast.lane.b32.xlu0 %v4649_v61, 280 }
  0xf0   : > { %v4769_v24 = vand.u32 127, %v8304_v28 }
  0xf1   : > { %v4712_v39 = vpop.permute.xlu1 %415  ;;  %v4714_v44 = vpop.permute.xlu0 %411 }
  0xf2   : > { %8287 = vst [vmem:[#allocation22_spill] sm:$0xff] %v4712_v39  ;;  %8288 = vst [vmem:[#allocation23_spill] sm:$0xff] %v4714_v44  ;;  %vm756_vm10 = vcmp.eq.s32.totalorder %v4537_v18, %v4769_v24  ;;  %vm752_vm12 = vcmp.eq.s32.totalorder %v4539_v19, %v4769_v24  ;;  %vm758_vm14 = vcmp.eq.s32.totalorder %v4545_v20, %v4769_v24 }
  0xf3   : > { %2167 = vbcast.lane.b32.xlu1 %v4709_v31, 264  ;;  %2163 = vbcast.lane.b32.xlu0 %v4709_v31, 256  ;;  %vm754_vm0 = vcmp.eq.s32.totalorder %v4547_v21, %v4769_v24  ;;  %vm762_vm2 = vcmp.eq.s32.totalorder %v4550_v25, %v4769_v24  ;;  %vm760_vm4 = vcmp.eq.s32.totalorder %v4552_v26, %v4769_v24 }
  0xf4   : > { %vm766_vm6 = vcmp.eq.s32.totalorder %v4559_v29, %v4769_v24  ;;  %vm764_vm8 = vcmp.eq.s32.totalorder %v4561_v30, %v4769_v24 }
  0xf5   : > { %v4721_v12 = vpop.permute.xlu1 %426  ;;  %v4723_v8 = vpop.permute.xlu0 %422 }
  0xf6   : > { %8290 = vst [vmem:[#allocation25_spill] sm:$0xff] %v4721_v12  ;;  %8291 = vst [vmem:[#allocation26_spill] sm:$0xff] %v4723_v8 }
  0xf7   : > { %623 = vbcast.lane.b32.xlu1 %v4719_v2, 256  ;;  %564 = vbcast.lane.b32.xlu0 %v4682_v13, 272 }
  0xf9   : > { %v4727_v7 = vpop.permute.xlu1 %434  ;;  %v4729_v27 = vpop.permute.xlu0 %430 }
  0xfa   : > { %8292 = vst [vmem:[#allocation27_spill] sm:$0xff] %v4727_v7  ;;  %8293 = vst [vmem:[#allocation28_spill] sm:$0xff] %v4729_v27  ;;  %v4746_v27 = vrot.slane %v4595_v45, %v620_v34 }
  0xfb   : > { %1852 = vbcast.lane.b32.xlu1 %v4605_v48, 304  ;;  %627 = vbcast.lane.b32.xlu0 %v4719_v2, 264 }
  0xfd   : > { %v4733_v44 = vpop.permute.xlu1 %442  ;;  %v4735_v39 = vpop.permute.xlu0 %438 }
  0xfe   : > { %8294 = vst [vmem:[#allocation29_spill] sm:$0xff] %v4733_v44  ;;  %8295 = vst [vmem:[#allocation30_spill] sm:$0xff] %v4735_v39  ;;  %v687_v39 = vsub.s32 7, %v4515_v5 }
  0xff   : > { %1982 = vbcast.lane.b32.xlu1 %v4632_v56, 296  ;;  %1919 = vbcast.lane.b32.xlu0 %v4615_v51, 304 }
 0x100   : > { %v4762_v34 = vrot.slane %v4520_v10, %v687_v39  ;;  %v4876_v16 = vrot.slane %v4595_v45, %v687_v39 }
 0x101   : > { %v4739_v8 = vpop.permute.xlu1 %450  ;;  %v4741_v12 = vpop.permute.xlu0 %446 }
 0x102   : > { %8296 = vst [vmem:[#allocation31_spill] sm:$0xff] %v4739_v8  ;;  %8297 = vst [vmem:[#allocation32_spill] sm:$0xff] %v4741_v12 }
 0x103   : > { %2108 = vbcast.lane.b32.xlu1 %v4672_v6, 280  ;;  %2045 = vbcast.lane.b32.xlu0 %v4649_v61, 288 }
 0x105   : > { %v4748_v7 = vpop.permute.xlu1 %458  ;;  %v4750_v44 = vpop.permute.xlu0 %454 }
 0x106   : > { %8298 = vst [vmem:[#allocation33_spill] sm:$0xff] %v4748_v7  ;;  %8299 = vst [vmem:[#allocation34_spill] sm:$0xff] %v4750_v44 }
 0x107   : > { %2230 = vbcast.lane.b32.xlu1 %v4746_v27, 256  ;;  %2171 = vbcast.lane.b32.xlu0 %v4709_v31, 272 }
 0x109   : > { %v4755_v8 = vpop.permute.xlu1 %466  ;;  %v4757_v12 = vpop.permute.xlu0 %462 }
 0x10a   : > { %8300 = vst [vmem:[#allocation35_spill] sm:$0xff] %v4755_v8  ;;  %8301 = vst [vmem:[#allocation36_spill] sm:$0xff] %v4757_v12  ;;  %v4778_v8 = vadd.s32 128, %v4769_v24 }
 0x10b   : > { %568 = vbcast.lane.b32.xlu1 %v4682_v13, 280  ;;  %2234 = vbcast.lane.b32.xlu0 %v4746_v27, 264 }
 0x10c   : > { %vm757_vm11 = vcmp.eq.s32.totalorder %v4537_v18, %v4778_v8  ;;  %vm753_vm13 = vcmp.eq.s32.totalorder %v4539_v19, %v4778_v8  ;;  %vm759_vm15 = vcmp.eq.s32.totalorder %v4545_v20, %v4778_v8  ;;  %vm755_vm1 = vcmp.eq.s32.totalorder %v4547_v21, %v4778_v8 }
 0x10d   : > { %v4764_v7 = vpop.permute.xlu1 %474  ;;  %v4766_v44 = vpop.permute.xlu0 %470  ;;  %vm763_vm3 = vcmp.eq.s32.totalorder %v4550_v25, %v4778_v8  ;;  %vm761_vm5 = vcmp.eq.s32.totalorder %v4552_v26, %v4778_v8  ;;  %vm767_vm7 = vcmp.eq.s32.totalorder %v4559_v29, %v4778_v8  ;;  %vm765_vm9 = vcmp.eq.s32.totalorder %v4561_v30, %v4778_v8 }
 0x10e   : > { %8302 = vst [vmem:[#allocation37_spill] sm:$0xff] %v4764_v7  ;;  %8303 = vst [vmem:[#allocation38_spill] sm:$0xff] %v4766_v44 }
 0x10f   : > { %690 = vbcast.lane.b32.xlu1 %v4762_v34, 256  ;;  %631 = vbcast.lane.b32.xlu0 %v4719_v2, 272 }
 0x111   : > { %v4773_v5 = vpop.permute.xlu1 %482  ;;  %v4775_v12 = vpop.permute.xlu0 %478 }
 0x112   : > { %8305 = vst [vmem:[#allocation39_spill] sm:$0xff] %v4773_v5  ;;  %8306 = vst [vmem:[#allocation40_spill] sm:$0xff] %v4775_v12  ;;  %v8224_v12 = vmov 0.0  }
 0x113   : > { %1856 = vbcast.lane.b32.xlu1 %v4605_v48, 312  ;;  %694 = vbcast.lane.b32.xlu0 %v4762_v34, 264  ;;  %v4799_v5 = vsel %vm756_vm10, 1.0, %v8224_v12  ;;  %v4808_v18 = vsel %vm757_vm11, 1.0, %v8224_v12  ;;  %v4824_v21 = vsel %vm752_vm12, 1.0, %v8224_v12  ;;  %v4830_v44 = vsel %vm753_vm13, 1.0, %v8224_v12 }
 0x114   : > { %v4836_v25 = vsel %vm758_vm14, 1.0, %v8224_v12  ;;  %v4847_v7 = vsel %vm755_vm1, 1.0, %v8224_v12  ;;  %v4854_v19 = vsel %vm762_vm2, 1.0, %v8224_v12  ;;  %v4857_v20 = vsel %vm763_vm3, 1.0, %v8224_v12 }
 0x115   : > { %v4784_v10 = vpop.permute.xlu1 %493  ;;  %v4786_v28 = vpop.permute.xlu0 %489  ;;  %v4860_v26 = vsel %vm760_vm4, 1.0, %v8224_v12  ;;  %v4865_v23 = vsel %vm761_vm5, 1.0, %v8224_v12  ;;  %v4879_v15 = vsel %vm766_vm6, 1.0, %v8224_v12  ;;  %vm770_vm10 = vcmp.eq.s32.totalorder %v4565_v32, %v4769_v24 }
 0x116   : > { %8307 = vst [vmem:[#allocation41_spill] sm:$0xff] %v4784_v10  ;;  %8308 = vst [vmem:[#allocation42_spill] sm:$0xff] %v4786_v28  ;;  %vm771_vm11 = vcmp.eq.s32.totalorder %v4565_v32, %v4778_v8  ;;  %vm768_vm12 = vcmp.eq.s32.totalorder %v4567_v33, %v4769_v24  ;;  %v4888_v29 = vsel %vm767_vm7, 1.0, %v8224_v12  ;;  %vm769_vm13 = vcmp.eq.s32.totalorder %v4567_v33, %v4778_v8 }
 0x117   : > { %1986 = vbcast.lane.b32.xlu1 %v4632_v56, 304  ;;  %1923 = vbcast.lane.b32.xlu0 %v4615_v51, 312  ;;  %vm774_vm14 = vcmp.eq.s32.totalorder %v4571_v35, %v4769_v24  ;;  %v4899_v30 = vsel %vm764_vm8, 1.0, %v8224_v12  ;;  %v4902_v32 = vsel %vm765_vm9, 1.0, %v8224_v12  ;;  %vm773_vm1 = vcmp.eq.s32.totalorder %v4573_v36, %v4778_v8 }
 0x118   : > { %v4909_v33 = vsel %vm770_vm10, 1.0, %v8224_v12  ;;  %v4915_v45 = vsel %vm768_vm12, 1.0, %v8224_v12  ;;  %vm778_vm2 = vcmp.eq.s32.totalorder %v4577_v37, %v4769_v24  ;;  %vm779_vm3 = vcmp.eq.s32.totalorder %v4577_v37, %v4778_v8 }
 0x119   : > { %v4816_v28 = vpop.permute.xlu1 %501  ;;  %v4818_v10 = vpop.permute.xlu0 %497  ;;  %v4938_v9 = vsel %vm773_vm1, 1.0, %v8224_v12  ;;  %vm776_vm4 = vcmp.eq.s32.totalorder %v4579_v38, %v4769_v24  ;;  %vm786_vm5 = vcmp.eq.s32.totalorder %v4589_v42, %v4769_v24  ;;  %vm777_vm6 = vcmp.eq.s32.totalorder %v4579_v38, %v4778_v8 }
 0x11a   : > { %8309 = vst [vmem:[#allocation43_spill] sm:$0xff] %v4816_v28  ;;  %8310 = vst [vmem:[#allocation44_spill] sm:$0xff] %v4818_v10  ;;  %v4841_v10 = vsel %vm759_vm15, 1.0, %v8224_v12  ;;  %v4844_v28 = vsel %vm754_vm0, 1.0, %v8224_v12  ;;  %vm775_vm15 = vcmp.eq.s32.totalorder %v4571_v35, %v4778_v8  ;;  %vm772_vm0 = vcmp.eq.s32.totalorder %v4573_v36, %v4769_v24 }
 0x11b   : > { %2112 = vbcast.lane.b32.xlu1 %v4672_v6, 288  ;;  %2049 = vbcast.lane.b32.xlu0 %v4649_v61, 296  ;;  %v4912_v35 = vsel %vm771_vm11, 1.0, %v8224_v12  ;;  %v4927_v36 = vsel %vm774_vm14, 1.0, %v8224_v12  ;;  %v4930_v14 = vsel %vm775_vm15, 1.0, %v8224_v12  ;;  %v4935_v11 = vsel %vm772_vm0, 1.0, %v8224_v12 }
 0x11c   : > { %vm787_vm7 = vcmp.eq.s32.totalorder %v4589_v42, %v4778_v8  ;;  %vm784_vm8 = vcmp.eq.s32.totalorder %v4591_v43, %v4769_v24  ;;  %v4956_v37 = vsel %vm779_vm3, 1.0, %v8224_v12  ;;  %vm785_vm9 = vcmp.eq.s32.totalorder %v4591_v43, %v4778_v8 }
 0x11d   : > { %v4871_v22 = vpop.permute.xlu1 %509  ;;  %v4873_v17 = vpop.permute.xlu0 %505  ;;  %8316 = vst [vmem:[#allocation50_spill] sm:$0xff] %v4956_v37  ;;  %vm790_vm10 = vcmp.eq.s32.totalorder %v4597_v46, %v4769_v24  ;;  %vm791_vm11 = vcmp.eq.s32.totalorder %v4597_v46, %v4778_v8  ;;  %vm782_vm12 = vcmp.eq.s32.totalorder %v4583_v40, %v4769_v24  ;;  %v3931_v42 = vsel %vm786_vm5, 1.0, %v8224_v12 }
 0x11e   : > { %8311 = vst [vmem:[#allocation45_spill] sm:$0xff] %v4871_v22  ;;  %8312 = vst [vmem:[#allocation46_spill] sm:$0xff] %v4873_v17  ;;  %v4924_v22 = vsel %vm769_vm13, 1.0, %v8224_v12  ;;  %vm783_vm13 = vcmp.eq.s32.totalorder %v4583_v40, %v4778_v8  ;;  %vm788_vm14 = vcmp.eq.s32.totalorder %v4599_v47, %v4769_v24  ;;  %v4979_v3 = vsel %vm776_vm4, 1.0, %v8224_v12 }
 0x11f   : > { %2238 = vbcast.lane.b32.xlu1 %v4746_v27, 272  ;;  %2175 = vbcast.lane.b32.xlu0 %v4709_v31, 280  ;;  %8319 = vst [vmem:[#allocation53_spill] sm:$0xff] %v4979_v3  ;;  %v3929_v1 = vsel %vm784_vm8, 1.0, %v8224_v12  ;;  %vm780_vm15 = vcmp.eq.s32.totalorder %v4585_v41, %v4769_v24  ;;  %v3930_v38 = vsel %vm785_vm9, 1.0, %v8224_v12  ;;  %v3935_v40 = vsel %vm790_vm10, 1.0, %v8224_v12 }
 0x120   : > { %vm789_vm0 = vcmp.eq.s32.totalorder %v4599_v47, %v4778_v8  ;;  %v5008_v0 = vsel %vm783_vm13, 1.0, %v8224_v12  ;;  %v5011_v43 = vadd.f32 %v3931_v42, %v4844_v28  ;;  %v3933_v3 = vsel %vm788_vm14, 1.0, %v8224_v12 }
 0x121   : > { %v4919_v39 = vpop.permute.xlu1 %517  ;;  %v4921_v17 = vpop.permute.xlu0 %513  ;;  %v5022_v47 = vadd.f32 %v3929_v1, %v4824_v21  ;;  %vm794_vm1 = vcmp.eq.s32.totalorder %v4607_v49, %v4769_v24  ;;  %v5029_v28 = vadd.f32 %v3930_v38, %v4830_v44  ;;  %v5032_v42 = vadd.f32 %v3935_v40, %v4836_v25 }
 0x122   : > { %8313 = vst [vmem:[#allocation47_spill] sm:$0xff] %v4919_v39  ;;  %8314 = vst [vmem:[#allocation48_spill] sm:$0xff] %v4921_v17  ;;  %v4947_v17 = vsel %vm778_vm2, 1.0, %v8224_v12  ;;  %vm795_vm2 = vcmp.eq.s32.totalorder %v4607_v49, %v4778_v8  ;;  %vm781_vm3 = vcmp.eq.s32.totalorder %v4585_v41, %v4778_v8  ;;  %v5043_v49 = vadd.f32 %v3933_v3, %v4799_v5 }
 0x123   : > { %2301 = vbcast.lane.b32.xlu1 %v4876_v16, 264  ;;  %2297 = vbcast.lane.b32.xlu0 %v4876_v16, 256  ;;  %8315 = vst [vmem:[#allocation49_spill] sm:$0xff] %v4947_v17  ;;  %vm792_vm4 = vcmp.eq.s32.totalorder %v4609_v50, %v4769_v24  ;;  %vm793_vm5 = vcmp.eq.s32.totalorder %v4609_v50, %v4778_v8 }
 0x124   : > { %vm796_vm8 = vcmp.eq.s32.totalorder %v4619_v53, %v4769_v24  ;;  %vm797_vm9 = vcmp.eq.s32.totalorder %v4619_v53, %v4778_v8  ;;  %vm802_vm10 = vcmp.eq.s32.totalorder %v4623_v54, %v4769_v24  ;;  %vm801_vm13 = vcmp.eq.s32.totalorder %v4625_v55, %v4778_v8 }
 0x125   : > { %v4964_v39 = vpop.permute.xlu1 %525  ;;  %v4966_v4 = vpop.permute.xlu0 %521  ;;  %vm806_vm14 = vcmp.eq.s32.totalorder %v4634_v57, %v4769_v24 }
 0x126   : > { %8317 = vst [vmem:[#allocation51_spill] sm:$0xff] %v4964_v39  ;;  %8318 = vst [vmem:[#allocation52_spill] sm:$0xff] %v4966_v4  ;;  %v4982_v39 = vsel %vm777_vm6, 1.0, %v8224_v12  ;;  %v3932_v4 = vsel %vm787_vm7, 1.0, %v8224_v12  ;;  %vm798_vm6 = vcmp.eq.s32.totalorder %v4617_v52, %v4769_v24  ;;  %vm799_vm7 = vcmp.eq.s32.totalorder %v4617_v52, %v4778_v8 }
 0x127   : > { %8320 = vst [vmem:[#allocation54_spill] sm:$0xff] %v4982_v39  ;;  %635 = vbcast.lane.b32.xlu1 %v4719_v2, 280  ;;  %572 = vbcast.lane.b32.xlu0 %v4682_v13, 288  ;;  %v3936_v2 = vsel %vm791_vm11, 1.0, %v8224_v12  ;;  %v5005_v39 = vsel %vm782_vm12, 1.0, %v8224_v12  ;;  %v5019_v46 = vadd.f32 %v3932_v4, %v4847_v7  ;;  %v8322_v4 = vmov 0.0  }
 0x128   : > { %v5035_v12 = vadd.f32 %v3936_v2, %v4841_v10  ;;  %v3934_v7 = vsel %vm789_vm0, 1.0, %v8322_v4  ;;  %v3939_v2 = vsel %vm794_vm1, 1.0, %v8322_v4  ;;  %v3940_v1 = vsel %vm795_vm2, 1.0, %v8322_v4 }
 0x129   : > { %v5014_v37 = vpop.permute.xlu1 %533  ;;  %v5016_v17 = vpop.permute.xlu0 %529  ;;  %v5062_v44 = vadd.f32 %v3934_v7, %v4808_v18  ;;  %vm803_vm11 = vcmp.eq.s32.totalorder %v4623_v54, %v4778_v8  ;;  %v3937_v50 = vsel %vm792_vm4, 1.0, %v8322_v4  ;;  %v3938_v10 = vsel %vm793_vm5, 1.0, %v8322_v4 }
 0x12a   : > { %8321 = vst [vmem:[#allocation55_spill] sm:$0xff] %v5014_v37  ;;  %v3943_v21 = vsel %vm798_vm6, 1.0, %v8322_v4  ;;  %vm800_vm12 = vcmp.eq.s32.totalorder %v4625_v55, %v4769_v24  ;;  %v5078_v18 = vadd.f32 %v3939_v2, %v4854_v19  ;;  %v5081_v25 = vadd.f32 %v3940_v1, %v4857_v20  ;;  %v8331_v37 = vld [vmem:[#allocation50_spill] sm:$0xff] }
 0x12b   : > { %1860 = vbcast.lane.b32.xlu1 %v4605_v48, 320  ;;  %698 = vbcast.lane.b32.xlu0 %v4762_v34, 272  ;;  %v3944_v54 = vsel %vm799_vm7, 1.0, %v8322_v4  ;;  %v3941_v38 = vsel %vm796_vm8, 1.0, %v8322_v4  ;;  %v3942_v40 = vsel %vm797_vm9, 1.0, %v8322_v4  ;;  %v3947_v7 = vsel %vm802_vm10, 1.0, %v8322_v4 }
 0x12c   : > { %v3948_v19 = vsel %vm803_vm11, 1.0, %v8322_v4  ;;  %v5101_v52 = vadd.f32 %v3937_v50, %v4860_v26  ;;  %v5104_v1 = vadd.f32 %v3938_v10, %v4865_v23  ;;  %v5107_v53 = vadd.f32 %v3943_v21, %v4879_v15 }
 0x12d   : > { %v5057_v5 = vpop.permute.xlu1 %541  ;;  %v5059_v3 = vpop.permute.xlu0 %537  ;;  %v5120_v26 = vadd.f32 %v3944_v54, %v4888_v29  ;;  %v5123_v23 = vadd.f32 %v3941_v38, %v4899_v30  ;;  %v5130_v15 = vadd.f32 %v3942_v40, %v4902_v32  ;;  %v5133_v50 = vadd.f32 %v3947_v7, %v4909_v33 }
 0x12e   : > { %8323 = vst [vmem:[#allocation56_spill] sm:$0xff] %v5057_v5  ;;  %8324 = vst [vmem:[#allocation57_spill] sm:$0xff] %v5059_v3  ;;  %v3945_v3 = vsel %vm800_vm12, 1.0, %v8322_v4  ;;  %v5117_v5 = vsel %vm780_vm15, 1.0, %v8322_v4  ;;  %v5136_v10 = vadd.f32 %v3948_v19, %v4912_v35  ;;  %v3946_v29 = vsel %vm801_vm13, 1.0, %v8322_v4 }
 0x12f   : > { %1990 = vbcast.lane.b32.xlu1 %v4632_v56, 312  ;;  %1927 = vbcast.lane.b32.xlu0 %v4615_v51, 320  ;;  %v5143_v30 = vadd.f32 %v3945_v3, %v4915_v45  ;;  %vm807_vm15 = vcmp.eq.s32.totalorder %v4634_v57, %v4778_v8  ;;  %vm804_vm0 = vcmp.eq.s32.totalorder %v4636_v58, %v4769_v24  ;;  %v3951_v35 = vsel %vm806_vm14, 1.0, %v8322_v4 }
 0x130   : > { %vm805_vm1 = vcmp.eq.s32.totalorder %v4636_v58, %v4778_v8  ;;  %vm810_vm2 = vcmp.eq.s32.totalorder %v4640_v59, %v4769_v24  ;;  %vm811_vm4 = vcmp.eq.s32.totalorder %v4640_v59, %v4778_v8  ;;  %vm808_vm5 = vcmp.eq.s32.totalorder %v4642_v60, %v4769_v24 }
 0x131   : > { %v5096_v20 = vpop.permute.xlu1 %1832  ;;  %v5098_v2 = vpop.permute.xlu0 %1828  ;;  %v3926_v55 = vsel %vm781_vm3, 1.0, %v8322_v4  ;;  %v5167_v57 = vadd.f32 %v3946_v29, %v4924_v22  ;;  %vm809_vm6 = vcmp.eq.s32.totalorder %v4642_v60, %v4778_v8  ;;  %vm814_vm7 = vcmp.eq.s32.totalorder %v4651_v62, %v4769_v24  ;;  %v8330_v29 = vld [vmem:[#allocation49_spill] sm:$0xff] }
 0x132   : > { %8325 = vst [vmem:[#allocation58_spill] sm:$0xff] %v5098_v2  ;;  %v3952_v58 = vsel %vm807_vm15, 1.0, %v8322_v4  ;;  %v3949_v59 = vsel %vm804_vm0, 1.0, %v8322_v4  ;;  %v3950_v41 = vsel %vm805_vm1, 1.0, %v8322_v4  ;;  %vm815_vm3 = vcmp.eq.s32.totalorder %v4651_v62, %v4778_v8 }
 0x133   : > { %2116 = vbcast.lane.b32.xlu1 %v4672_v6, 296  ;;  %2053 = vbcast.lane.b32.xlu0 %v4649_v61, 304  ;;  %v5181_v22 = vadd.f32 %v3951_v35, %v4927_v36  ;;  %v3955_v60 = vsel %vm810_vm2, 1.0, %v8322_v4  ;;  %v3956_v45 = vsel %vm811_vm4, 1.0, %v8322_v4  ;;  %v3953_v3 = vsel %vm808_vm5, 1.0, %v8322_v4 }
 0x134   : > { %v3954_v38 = vsel %vm809_vm6, 1.0, %v8322_v4  ;;  %v3959_v40 = vsel %vm814_vm7, 1.0, %v8322_v4  ;;  %vm812_vm8 = vcmp.eq.s32.totalorder %v4653_v63, %v4769_v24  ;;  %vm813_vm9 = vcmp.eq.s32.totalorder %v4653_v63, %v4778_v8 }
 0x135   : > { %v5151_v32 = vpop.permute.xlu1 %1899  ;;  %v5153_v33 = vpop.permute.xlu0 %1895  ;;  %v5197_v62 = vadd.f32 %v3952_v58, %v4930_v14  ;;  %v5200_v36 = vadd.f32 %v3949_v59, %v4935_v11  ;;  %v5203_v7 = vadd.f32 %v3950_v41, %v4938_v9  ;;  %v3960_v19 = vsel %vm815_vm3, 1.0, %v8322_v4  ;;  %v8332_v14 = vld [vmem:[#allocation53_spill] sm:$0xff]  ;;  %v8333_v11 = vld [vmem:[#allocation8_spill] sm:$0xff]  ;;  %v8334_v9 = vld [vmem:[#allocation54_spill] sm:$0xff] }
 0x136   : > { %8326 = vst [vmem:[#allocation59_spill] sm:$0xff] %v5151_v32  ;;  %8327 = vst [vmem:[#allocation60_spill] sm:$0xff] %v5153_v33  ;;  %v5209_v35 = vadd.f32 %v3955_v60, %v8330_v29  ;;  %v5212_v63 = vadd.f32 %v3956_v45, %v8331_v37  ;;  %v5215_v58 = vadd.f32 %v3953_v3, %v8332_v14  ;;  %v3958_v60 = vsel %vm813_vm9, 1.0, %v8322_v4  ;;  %v8337_v3 = vld [vmem:[#allocation9_spill] sm:$0xff] }
 0x137   : > { %2242 = vbcast.lane.b32.xlu1 %v4746_v27, 280  ;;  %2179 = vbcast.lane.b32.xlu0 %v4709_v31, 288  ;;  %vm818_vm10 = vcmp.eq.s32.totalorder %v8333_v11, %v4769_v24  ;;  %v5220_v59 = vadd.f32 %v3954_v38, %v8334_v9  ;;  %v5223_v41 = vadd.f32 %v3959_v40, %v5005_v39  ;;  %v8338_v38 = vld [vmem:[#allocation10_spill] sm:$0xff]  ;;  %v8340_v40 = vld [vmem:[#allocation24_spill] sm:$0xff] }
 0x138   : > { %v5232_v45 = vadd.f32 %v3960_v19, %v5008_v0  ;;  %vm819_vm11 = vcmp.eq.s32.totalorder %v8333_v11, %v4778_v8  ;;  %vm816_vm12 = vcmp.eq.s32.totalorder %v8337_v3, %v4769_v24  ;;  %vm817_vm13 = vcmp.eq.s32.totalorder %v8337_v3, %v4778_v8  ;;  %v8339_v0 = vld [vmem:[#allocation11_spill] sm:$0xff]  ;;  %v8341_v11 = vld [vmem:[#allocation12_spill] sm:$0xff] }
 0x139   : > { %v5186_v21 = vpop.permute.xlu1 %1903  ;;  %v5188_v54 = vpop.permute.xlu0 %1836  ;;  %v3963_v39 = vsel %vm818_vm10, 1.0, %v8322_v4  ;;  %vm822_vm14 = vcmp.eq.s32.totalorder %v8338_v38, %v4769_v24  ;;  %vm823_vm15 = vcmp.eq.s32.totalorder %v8338_v38, %v4778_v8  ;;  %vm820_vm0 = vcmp.eq.s32.totalorder %v8339_v0, %v4769_v24 }
 0x13a   : > { %8328 = vst [vmem:[#allocation61_spill] sm:$0xff] %v5186_v21  ;;  %8329 = vst [vmem:[#allocation62_spill] sm:$0xff] %v5188_v54  ;;  %v3957_v54 = vsel %vm812_vm8, 1.0, %v8322_v4  ;;  %v5252_v14 = vadd.f32 %v3958_v60, %v3926_v55  ;;  %vm821_vm1 = vcmp.eq.s32.totalorder %v8339_v0, %v4778_v8  ;;  %vm826_vm2 = vcmp.eq.s32.totalorder %v8341_v11, %v4769_v24 }
 0x13b   : > { %576 = vbcast.lane.b32.xlu1 %v4682_v13, 296  ;;  %2305 = vbcast.lane.b32.xlu0 %v4876_v16, 272  ;;  %v5250_v19 = vadd.f32 %v3957_v54, %v5117_v5  ;;  %v3964_v9 = vsel %vm819_vm11, 1.0, %v8322_v4  ;;  %v3961_v3 = vsel %vm816_vm12, 1.0, %v8322_v4  ;;  %vm827_vm4 = vcmp.eq.s32.totalorder %v8341_v11, %v4778_v8 }
 0x13c   : > { %v5268_v55 = vadd.f32 %v3963_v39, %v5011_v43  ;;  %v3967_v54 = vsel %vm822_vm14, 1.0, %v8322_v4  ;;  %v3968_v60 = vsel %vm823_vm15, 1.0, %v8322_v4  ;;  %v3971_v43 = vsel %vm826_vm2, 1.0, %v8322_v4  ;;  %v8344_v39 = vld [vmem:[#allocation13_spill] sm:$0xff] }
 0x13d   : > { %v5227_v29 = vpop.permute.xlu1 %1966  ;;  %v5229_v37 = vpop.permute.xlu0 %1962  ;;  %vm824_vm5 = vcmp.eq.s32.totalorder %v8344_v39, %v4769_v24  ;;  %vm825_vm6 = vcmp.eq.s32.totalorder %v8344_v39, %v4778_v8  ;;  %v5291_v38 = vadd.f32 %v3964_v9, %v5019_v46  ;;  %v5294_v0 = vadd.f32 %v3961_v3, %v5022_v47  ;;  %v8345_v47 = vld [vmem:[#allocation14_spill] sm:$0xff]  ;;  %v8350_v3 = vld [vmem:[#allocation17_spill] sm:$0xff] }
 0x13e   : > { %8335 = vst [vmem:[#allocation49_spill] sm:$0xff] %v5227_v29  ;;  %8336 = vst [vmem:[#allocation50_spill] sm:$0xff] %v5229_v37  ;;  %v3962_v37 = vsel %vm817_vm13, 1.0, %v8322_v4  ;;  %v3972_v33 = vsel %vm827_vm4, 1.0, %v8322_v4  ;;  %v5304_v2 = vadd.f32 %v3967_v54, %v5032_v42  ;;  %v5307_v32 = vadd.f32 %v3968_v60, %v5035_v12 }
 0x13f   : > { %702 = vbcast.lane.b32.xlu1 %v4762_v34, 280  ;;  %639 = vbcast.lane.b32.xlu0 %v8340_v40, 288  ;;  %v5297_v21 = vadd.f32 %v3962_v37, %v5029_v28  ;;  %vm830_vm7 = vcmp.eq.s32.totalorder %v8345_v47, %v4769_v24  ;;  %v5322_v11 = vadd.f32 %v3971_v43, %v5078_v18  ;;  %v3969_v12 = vsel %vm824_vm5, 1.0, %v8322_v4 }
 0x140   : > { %v3970_v42 = vsel %vm825_vm6, 1.0, %v8322_v4  ;;  %vm831_vm3 = vcmp.eq.s32.totalorder %v8345_v47, %v4778_v8  ;;  %v3975_v18 = vsel %vm830_vm7, 1.0, %v8322_v4  ;;  %vm832_vm12 = vcmp.eq.s32.totalorder %v8350_v3, %v4769_v24 }
 0x141   : > { %v5263_v29 = vpop.permute.xlu1 %1907  ;;  %v5265_v5 = vpop.permute.xlu0 %1840  ;;  %vm833_vm13 = vcmp.eq.s32.totalorder %v8350_v3, %v4778_v8  ;;  %v3976_v60 = vsel %vm831_vm3, 1.0, %v8322_v4 }
 0x142   : > { %8342 = vst [vmem:[#allocation53_spill] sm:$0xff] %v5263_v29  ;;  %8343 = vst [vmem:[#allocation8_spill] sm:$0xff] %v5265_v5  ;;  %v3965_v29 = vsel %vm820_vm0, 1.0, %v8322_v4  ;;  %v3966_v5 = vsel %vm821_vm1, 1.0, %v8322_v4 }
 0x143   : > { %1931 = vbcast.lane.b32.xlu1 %v4615_v51, 328  ;;  %1864 = vbcast.lane.b32.xlu0 %v4605_v48, 328  ;;  %v5310_v46 = vadd.f32 %v3965_v29, %v5043_v49  ;;  %v5319_v37 = vadd.f32 %v3966_v5, %v5062_v44  ;;  %v5333_v49 = vadd.f32 %v3972_v33, %v5081_v25  ;;  %v8348_v44 = vld [vmem:[#allocation15_spill] sm:$0xff]  ;;  %v8349_v29 = vld [vmem:[#allocation16_spill] sm:$0xff] }
 0x144   : > { %vm828_vm8 = vcmp.eq.s32.totalorder %v8348_v44, %v4769_v24  ;;  %vm829_vm9 = vcmp.eq.s32.totalorder %v8348_v44, %v4778_v8  ;;  %vm834_vm10 = vcmp.eq.s32.totalorder %v8349_v29, %v4769_v24  ;;  %vm835_vm11 = vcmp.eq.s32.totalorder %v8349_v29, %v4778_v8  ;;  %v8354_v29 = vld [vmem:[#allocation19_spill] sm:$0xff] }
 0x145   : > { %v5314_v9 = vpop.permute.xlu1 %2029  ;;  %v5316_v28 = vpop.permute.xlu0 %1970  ;;  %v5349_v25 = vadd.f32 %v3969_v12, %v5101_v52  ;;  %v5352_v33 = vadd.f32 %v3970_v42, %v5104_v1  ;;  %v3973_v43 = vsel %vm828_vm8, 1.0, %v8322_v4  ;;  %v8353_v52 = vld [vmem:[#allocation18_spill] sm:$0xff]  ;;  %v5369_v1 = vadd.f32 %v3975_v18, %v5107_v53 }
 0x146   : > { %8346 = vst [vmem:[#allocation54_spill] sm:$0xff] %v5314_v9  ;;  %8347 = vst [vmem:[#allocation9_spill] sm:$0xff] %v5316_v28  ;;  %vm838_vm14 = vcmp.eq.s32.totalorder %v8353_v52, %v4769_v24  ;;  %vm839_vm15 = vcmp.eq.s32.totalorder %v8353_v52, %v4778_v8  ;;  %v3974_v39 = vsel %vm829_vm9, 1.0, %v8322_v4  ;;  %v3979_v47 = vsel %vm834_vm10, 1.0, %v8322_v4 }
 0x147   : > { %2057 = vbcast.lane.b32.xlu1 %v4649_v61, 312  ;;  %1994 = vbcast.lane.b32.xlu0 %v4632_v56, 320  ;;  %v3980_v12 = vsel %vm835_vm11, 1.0, %v8322_v4  ;;  %v3977_v42 = vsel %vm832_vm12, 1.0, %v8322_v4  ;;  %v3978_v44 = vsel %vm833_vm13, 1.0, %v8322_v4  ;;  %vm836_vm0 = vcmp.eq.s32.totalorder %v8354_v29, %v4769_v24 }
 0x148   : > { %vm837_vm1 = vcmp.eq.s32.totalorder %v8354_v29, %v4778_v8  ;;  %v5383_v53 = vadd.f32 %v3976_v60, %v5120_v26  ;;  %v5386_v18 = vadd.f32 %v3973_v43, %v5123_v23  ;;  %v3983_v3 = vsel %vm838_vm14, 1.0, %v8322_v4  ;;  %v8355_v23 = vld [vmem:[#allocation20_spill] sm:$0xff] }
 0x149   : > { %v5358_v5 = vpop.permute.xlu1 %1844  ;;  %v5360_v54 = vpop.permute.xlu0 %2033  ;;  %v3984_v52 = vsel %vm839_vm15, 1.0, %v8322_v4  ;;  %v5395_v28 = vadd.f32 %v3974_v39, %v5130_v15  ;;  %v5398_v9 = vadd.f32 %v3979_v47, %v5133_v50  ;;  %v5401_v26 = vadd.f32 %v3980_v12, %v5136_v10  ;;  %v8357_v39 = vld [vmem:[#allocation22_spill] sm:$0xff] }
 0x14a   : > { %8351 = vst [vmem:[#allocation10_spill] sm:$0xff] %v5358_v5  ;;  %8352 = vst [vmem:[#allocation11_spill] sm:$0xff] %v5360_v54  ;;  %vm842_vm2 = vcmp.eq.s32.totalorder %v8355_v23, %v4769_v24  ;;  %v5406_v60 = vadd.f32 %v3977_v42, %v5143_v30  ;;  %v5409_v43 = vadd.f32 %v3978_v44, %v5167_v57  ;;  %v3981_v29 = vsel %vm836_vm0, 1.0, %v8322_v4  ;;  %v8356_v30 = vld [vmem:[#allocation21_spill] sm:$0xff]  ;;  %v8360_v42 = vld [vmem:[#allocation23_spill] sm:$0xff] }
 0x14b   : > { %2183 = vbcast.lane.b32.xlu1 %v4709_v31, 296  ;;  %2120 = vbcast.lane.b32.xlu0 %v4672_v6, 304  ;;  %v3982_v15 = vsel %vm837_vm1, 1.0, %v8322_v4  ;;  %v5416_v50 = vadd.f32 %v3983_v3, %v5181_v22  ;;  %v5419_v10 = vadd.f32 %v3984_v52, %v5197_v62  ;;  %vm843_vm4 = vcmp.eq.s32.totalorder %v8355_v23, %v4778_v8  ;;  %v8361_v52 = vld [vmem:[#allocation25_spill] sm:$0xff] }
 0x14c   : > { %vm840_vm5 = vcmp.eq.s32.totalorder %v8356_v30, %v4769_v24  ;;  %v3987_v57 = vsel %vm842_vm2, 1.0, %v8322_v4  ;;  %vm841_vm6 = vcmp.eq.s32.totalorder %v8356_v30, %v4778_v8  ;;  %vm846_vm7 = vcmp.eq.s32.totalorder %v8357_v39, %v4769_v24 }
 0x14d   : > { %v5390_v5 = vpop.permute.xlu1 %1974  ;;  %v5392_v54 = vpop.permute.xlu0 %1911  ;;  %vm847_vm3 = vcmp.eq.s32.totalorder %v8357_v39, %v4778_v8  ;;  %v5437_v47 = vadd.f32 %v3981_v29, %v5200_v36  ;;  %v5440_v12 = vadd.f32 %v3982_v15, %v5203_v7  ;;  %vm844_vm8 = vcmp.eq.s32.totalorder %v8360_v42, %v4769_v24 }
 0x14e   : > { %vm845_vm9 = vcmp.eq.s32.totalorder %v8360_v42, %v4778_v8  ;;  %v3988_v44 = vsel %vm843_vm4, 1.0, %v8322_v4  ;;  %v3985_v3 = vsel %vm840_vm5, 1.0, %v8322_v4  ;;  %vm850_vm10 = vcmp.eq.s32.totalorder %v8361_v52, %v4769_v24 }
 0x14f   : > { %2309 = vbcast.lane.b32.xlu1 %v4876_v16, 280  ;;  %2246 = vbcast.lane.b32.xlu0 %v4746_v27, 288  ;;  %vm851_vm11 = vcmp.eq.s32.totalorder %v8361_v52, %v4778_v8  ;;  %v5455_v36 = vadd.f32 %v3987_v57, %v5209_v35  ;;  %v3986_v7 = vsel %vm841_vm6, 1.0, %v8322_v4  ;;  %v3991_v23 = vsel %vm846_vm7, 1.0, %v8322_v4  ;;  %v8362_v57 = vld [vmem:[#allocation26_spill] sm:$0xff]  ;;  %v8369_v52 = vld [vmem:[#allocation27_spill] sm:$0xff] }
 0x150   : > { %v3992_v29 = vsel %vm847_vm3, 1.0, %v8322_v4  ;;  %v3989_v15 = vsel %vm844_vm8, 1.0, %v8322_v4  ;;  %v3990_v35 = vsel %vm845_vm9, 1.0, %v8322_v4  ;;  %vm848_vm12 = vcmp.eq.s32.totalorder %v8362_v57, %v4769_v24 }
 0x151   : > { %v5432_v22 = vpop.permute.xlu1 %2096  ;;  %v5434_v62 = vpop.permute.xlu0 %2037  ;;  %vm849_vm13 = vcmp.eq.s32.totalorder %v8362_v57, %v4778_v8  ;;  %v5483_v39 = vadd.f32 %v3985_v3, %v5215_v58  ;;  %v3996_v57 = vsel %vm851_vm11, 1.0, %v8322_v4  ;;  %v5505_v58 = vadd.f32 %v3989_v15, %v5250_v19 }
 0x152   : > { %8358 = vst [vmem:[#allocation24_spill] sm:$0xff] %v5432_v22  ;;  %8359 = vst [vmem:[#allocation12_spill] sm:$0xff] %v5434_v62  ;;  %v5480_v62 = vadd.f32 %v3988_v44, %v5212_v63  ;;  %v3995_v22 = vsel %vm850_vm10, 1.0, %v8322_v4  ;;  %v5500_v63 = vadd.f32 %v3992_v29, %v5232_v45  ;;  %v5508_v44 = vadd.f32 %v3990_v35, %v5252_v14 }
 0x153   : > { %643 = vbcast.lane.b32.xlu1 %v8340_v40, 296  ;;  %580 = vbcast.lane.b32.xlu0 %v4682_v13, 304  ;;  %8367 = vst [vmem:[#allocation17_spill] sm:$0xff] %v5505_v58  ;;  %v3993_v3 = vsel %vm848_vm12, 1.0, %v8322_v4  ;;  %v5516_v45 = vadd.f32 %v3996_v57, %v5291_v38  ;;  %vm854_vm14 = vcmp.eq.s32.totalorder %v8369_v52, %v4769_v24 }
 0x154   : > { %8366 = vst [vmem:[#allocation16_spill] sm:$0xff] %v5500_v63  ;;  %8368 = vst [vmem:[#allocation18_spill] sm:$0xff] %v5508_v44  ;;  %vm855_vm15 = vcmp.eq.s32.totalorder %v8369_v52, %v4778_v8  ;;  %v5535_v38 = vadd.f32 %v3993_v3, %v5294_v0  ;;  %v3999_v29 = vsel %vm854_vm14, 1.0, %v8322_v4  ;;  %v8373_v0 = vld [vmem:[#allocation31_spill] sm:$0xff] }
 0x155   : > { %v5475_v30 = vpop.permute.xlu1 %556  ;;  %v5477_v42 = vpop.permute.xlu0 %2100  ;;  %v4000_v15 = vsel %vm855_vm15, 1.0, %v8322_v4  ;;  %vm862_vm7 = vcmp.eq.s32.totalorder %v8373_v0, %v4769_v24  ;;  %vm863_vm3 = vcmp.eq.s32.totalorder %v8373_v0, %v4778_v8  ;;  %v5565_v44 = vadd.f32 %v3999_v29, %v5304_v2 }
 0x156   : > { %8363 = vst [vmem:[#allocation13_spill] sm:$0xff] %v5475_v30  ;;  %8364 = vst [vmem:[#allocation14_spill] sm:$0xff] %v5477_v42  ;;  %v5494_v30 = vadd.f32 %v3986_v7, %v5220_v59  ;;  %v5497_v42 = vadd.f32 %v3991_v23, %v5223_v41  ;;  %v3994_v59 = vsel %vm849_vm13, 1.0, %v8322_v4  ;;  %v5513_v41 = vadd.f32 %v3995_v22, %v5268_v55  ;;  %v8370_v7 = vld [vmem:[#allocation28_spill] sm:$0xff]  ;;  %v8371_v55 = vld [vmem:[#allocation29_spill] sm:$0xff] }
 0x157   : > { %1868 = vbcast.lane.b32.xlu1 %v4605_v48, 336  ;;  %706 = vbcast.lane.b32.xlu0 %v4762_v34, 288  ;;  %vm852_vm0 = vcmp.eq.s32.totalorder %v8370_v7, %v4769_v24  ;;  %vm853_vm1 = vcmp.eq.s32.totalorder %v8370_v7, %v4778_v8  ;;  %vm858_vm2 = vcmp.eq.s32.totalorder %v8371_v55, %v4769_v24  ;;  %v8372_v22 = vld [vmem:[#allocation30_spill] sm:$0xff]  ;;  %v4007_v63 = vsel %vm862_vm7, 1.0, %v8322_v4 }
 0x158   : > { %8365 = vst [vmem:[#allocation15_spill] sm:$0xff] %v5497_v42  ;;  %vm859_vm4 = vcmp.eq.s32.totalorder %v8371_v55, %v4778_v8  ;;  %vm856_vm5 = vcmp.eq.s32.totalorder %v8372_v22, %v4769_v24  ;;  %vm857_vm6 = vcmp.eq.s32.totalorder %v8372_v22, %v4778_v8  ;;  %v5544_v23 = vadd.f32 %v3994_v59, %v5297_v21  ;;  %v8375_v22 = vld [vmem:[#allocation32_spill] sm:$0xff] }
 0x159   : > { %v5522_v19 = vpop.permute.xlu1 %1848  ;;  %v5524_v14 = vpop.permute.xlu0 %560  ;;  %v3997_v35 = vsel %vm852_vm0, 1.0, %v8322_v4  ;;  %v3998_v57 = vsel %vm853_vm1, 1.0, %v8322_v4  ;;  %v4003_v3 = vsel %vm858_vm2, 1.0, %v8322_v4  ;;  %v4004_v52 = vsel %vm859_vm4, 1.0, %v8322_v4 }
 0x15a   : > { %v4001_v21 = vsel %vm856_vm5, 1.0, %v8322_v4  ;;  %v4002_v59 = vsel %vm857_vm6, 1.0, %v8322_v4  ;;  %vm860_vm8 = vcmp.eq.s32.totalorder %v8375_v22, %v4769_v24  ;;  %v5568_v58 = vadd.f32 %v4000_v15, %v5307_v32 }
 0x15b   : > { %1998 = vbcast.lane.b32.xlu1 %v4632_v56, 328  ;;  %1935 = vbcast.lane.b32.xlu0 %v4615_v51, 336  ;;  %vm861_vm9 = vcmp.eq.s32.totalorder %v8375_v22, %v4778_v8  ;;  %v5576_v0 = vadd.f32 %v3997_v35, %v5310_v46  ;;  %v5579_v42 = vadd.f32 %v3998_v57, %v5319_v37  ;;  %v4008_v22 = vsel %vm863_vm3, 1.0, %v8322_v4  ;;  %v8378_v57 = vld [vmem:[#allocation33_spill] sm:$0xff] }
 0x15c   : > { %v5582_v2 = vadd.f32 %v4003_v3, %v5322_v11  ;;  %v5585_v32 = vadd.f32 %v4004_v52, %v5333_v49  ;;  %v5588_v29 = vadd.f32 %v4001_v21, %v5349_v25  ;;  %v5591_v15 = vadd.f32 %v4002_v59, %v5352_v33  ;;  %v8379_v25 = vld [vmem:[#allocation34_spill] sm:$0xff]  ;;  %v8380_v33 = vld [vmem:[#allocation35_spill] sm:$0xff] }
 0x15d   : > { %v5554_v7 = vpop.permute.xlu1 %1978  ;;  %v5556_v55 = vpop.permute.xlu0 %1915  ;;  %v4005_v46 = vsel %vm860_vm8, 1.0, %v8322_v4  ;;  %v5600_v11 = vadd.f32 %v4007_v63, %v5369_v1  ;;  %v4006_v49 = vsel %vm861_vm9, 1.0, %v8322_v4  ;;  %vm866_vm10 = vcmp.eq.s32.totalorder %v8378_v57, %v4769_v24  ;;  %v8381_v63 = vld [vmem:[#allocation36_spill] sm:$0xff] }
 0x15e   : > { %8374 = vst [vmem:[#allocation19_spill] sm:$0xff] %v5556_v55  ;;  %vm867_vm11 = vcmp.eq.s32.totalorder %v8378_v57, %v4778_v8  ;;  %vm864_vm12 = vcmp.eq.s32.totalorder %v8379_v25, %v4769_v24  ;;  %vm865_vm13 = vcmp.eq.s32.totalorder %v8379_v25, %v4778_v8  ;;  %vm870_vm14 = vcmp.eq.s32.totalorder %v8380_v33, %v4769_v24 }
 0x15f   : > { %2124 = vbcast.lane.b32.xlu1 %v4672_v6, 312  ;;  %2061 = vbcast.lane.b32.xlu0 %v4649_v61, 320  ;;  %v5616_v1 = vadd.f32 %v4008_v22, %v5383_v53  ;;  %vm871_vm15 = vcmp.eq.s32.totalorder %v8380_v33, %v4778_v8  ;;  %vm868_vm0 = vcmp.eq.s32.totalorder %v8381_v63, %v4769_v24  ;;  %v4011_v21 = vsel %vm866_vm10, 1.0, %v8322_v4 }
 0x160   : > { %vm869_vm1 = vcmp.eq.s32.totalorder %v8381_v63, %v4778_v8  ;;  %v5625_v3 = vadd.f32 %v4005_v46, %v5386_v18  ;;  %v5628_v52 = vadd.f32 %v4006_v49, %v5395_v28  ;;  %v4012_v53 = vsel %vm867_vm11, 1.0, %v8322_v4  ;;  %v8384_v18 = vld [vmem:[#allocation37_spill] sm:$0xff] }
 0x161   : > { %v5595_v35 = vpop.permute.xlu1 %2104  ;;  %v5597_v37 = vpop.permute.xlu0 %2041  ;;  %v4009_v57 = vsel %vm864_vm12, 1.0, %v8322_v4  ;;  %v4010_v25 = vsel %vm865_vm13, 1.0, %v8322_v4  ;;  %v4015_v33 = vsel %vm870_vm14, 1.0, %v8322_v4  ;;  %vm874_vm2 = vcmp.eq.s32.totalorder %v8384_v18, %v4769_v24 }
 0x162   : > { %8376 = vst [vmem:[#allocation20_spill] sm:$0xff] %v5595_v35  ;;  %8377 = vst [vmem:[#allocation21_spill] sm:$0xff] %v5597_v37  ;;  %v4016_v28 = vsel %vm871_vm15, 1.0, %v8322_v4  ;;  %v4013_v46 = vsel %vm868_vm0, 1.0, %v8322_v4  ;;  %v4014_v49 = vsel %vm869_vm1, 1.0, %v8322_v4  ;;  %vm875_vm4 = vcmp.eq.s32.totalorder %v8384_v18, %v4778_v8  ;;  %v8393_v18 = vld [vmem:[#allocation44_spill] sm:$0xff] }
 0x163   : > { %2250 = vbcast.lane.b32.xlu1 %v4746_v27, 296  ;;  %2187 = vbcast.lane.b32.xlu0 %v4709_v31, 304  ;;  %v5649_v63 = vadd.f32 %v4011_v21, %v5398_v9  ;;  %v5659_v37 = vadd.f32 %v4009_v57, %v5406_v60  ;;  %v5662_v35 = vadd.f32 %v4010_v25, %v5409_v43  ;;  %v4019_v9 = vsel %vm874_vm2, 1.0, %v8322_v4  ;;  %v8388_v25 = vld [vmem:[#allocation41_spill] sm:$0xff] }
 0x164   : > { %v5665_v55 = vadd.f32 %v4015_v33, %v5416_v50  ;;  %v5679_v60 = vadd.f32 %v4014_v49, %v5440_v12  ;;  %v4020_v43 = vsel %vm875_vm4, 1.0, %v8322_v4  ;;  %vm882_vm7 = vcmp.eq.s32.totalorder %v8388_v25, %v4769_v24  ;;  %v8391_v12 = vld [vmem:[#allocation43_spill] sm:$0xff] }
 0x165   : > { %v5632_v59 = vpop.permute.xlu1 %2167  ;;  %v5634_v22 = vpop.permute.xlu0 %2163  ;;  %vm883_vm3 = vcmp.eq.s32.totalorder %v8388_v25, %v4778_v8  ;;  %vm886_vm10 = vcmp.eq.s32.totalorder %v8391_v12, %v4769_v24  ;;  %v5703_v33 = vadd.f32 %v4020_v43, %v5480_v62  ;;  %vm887_vm11 = vcmp.eq.s32.totalorder %v8391_v12, %v4778_v8 }
 0x166   : > { %8382 = vst [vmem:[#allocation22_spill] sm:$0xff] %v5632_v59  ;;  %8383 = vst [vmem:[#allocation23_spill] sm:$0xff] %v5634_v22  ;;  %v5652_v22 = vadd.f32 %v4012_v53, %v5401_v26  ;;  %v8385_v59 = vld [vmem:[#allocation38_spill] sm:$0xff]  ;;  %v5673_v53 = vadd.f32 %v4016_v28, %v5419_v10  ;;  %v5694_v10 = vadd.f32 %v4019_v9, %v5455_v36  ;;  %v4027_v62 = vsel %vm882_vm7, 1.0, %v8322_v4 }
 0x167   : > { %584 = vbcast.lane.b32.xlu1 %v4682_v13, 312  ;;  %2313 = vbcast.lane.b32.xlu0 %v4876_v16, 288  ;;  %vm872_vm5 = vcmp.eq.s32.totalorder %v8385_v59, %v4769_v24  ;;  %vm873_vm6 = vcmp.eq.s32.totalorder %v8385_v59, %v4778_v8  ;;  %8386 = vst [vmem:[#allocation25_spill] sm:$0xff] %v5665_v55  ;;  %8392 = vst [vmem:[#allocation28_spill] sm:$0xff] %v5703_v33  ;;  %v4028_v9 = vsel %vm883_vm3, 1.0, %v8322_v4  ;;  %v8397_v33 = vld [vmem:[#allocation46_spill] sm:$0xff] }
 0x168   : > { %8387 = vst [vmem:[#allocation26_spill] sm:$0xff] %v5673_v53  ;;  %v5676_v59 = vadd.f32 %v4013_v46, %v5437_v47  ;;  %v4017_v50 = vsel %vm872_vm5, 1.0, %v8322_v4  ;;  %v4018_v57 = vsel %vm873_vm6, 1.0, %v8322_v4  ;;  %8389 = vst [vmem:[#allocation27_spill] sm:$0xff] %v5694_v10  ;;  %v8390_v47 = vld [vmem:[#allocation42_spill] sm:$0xff]  ;;  %vm884_vm12 = vcmp.eq.s32.totalorder %v8393_v18, %v4769_v24 }
 0x169   : > { %v5668_v21 = vpop.permute.xlu1 %623  ;;  %v5670_v26 = vpop.permute.xlu0 %564  ;;  %vm880_vm8 = vcmp.eq.s32.totalorder %v8390_v47, %v4769_v24  ;;  %vm881_vm9 = vcmp.eq.s32.totalorder %v8390_v47, %v4778_v8  ;;  %vm885_vm13 = vcmp.eq.s32.totalorder %v8393_v18, %v4778_v8  ;;  %v5716_v46 = vadd.f32 %v4017_v50, %v5483_v39  ;;  %v8396_v50 = vld [vmem:[#allocation45_spill] sm:$0xff] }
 0x16a   : > { %v5719_v49 = vadd.f32 %v4018_v57, %v5494_v30  ;;  %v4025_v43 = vsel %vm880_vm8, 1.0, %v8322_v4  ;;  %v4026_v47 = vsel %vm881_vm9, 1.0, %v8322_v4  ;;  %v4031_v39 = vsel %vm886_vm10, 1.0, %v8322_v4 }
 0x16b   : > { %710 = vbcast.lane.b32.xlu1 %v4762_v34, 296  ;;  %647 = vbcast.lane.b32.xlu0 %v8340_v40, 304  ;;  %8394 = vst [vmem:[#allocation29_spill] sm:$0xff] %v5716_v46  ;;  %vm890_vm14 = vcmp.eq.s32.totalorder %v8396_v50, %v4769_v24  ;;  %v4032_v30 = vsel %vm887_vm11, 1.0, %v8322_v4  ;;  %v4029_v57 = vsel %vm884_vm12, 1.0, %v8322_v4  ;;  %v4030_v25 = vsel %vm885_vm13, 1.0, %v8322_v4 }
 0x16c   : > { %8395 = vst [vmem:[#allocation30_spill] sm:$0xff] %v5719_v49  ;;  %vm891_vm15 = vcmp.eq.s32.totalorder %v8396_v50, %v4778_v8  ;;  %v5742_v12 = vadd.f32 %v4027_v62, %v5513_v41  ;;  %v5745_v18 = vadd.f32 %v4028_v9, %v5516_v45  ;;  %vm888_vm0 = vcmp.eq.s32.totalorder %v8397_v33, %v4769_v24  ;;  %v8404_v50 = vld [vmem:[#allocation52_spill] sm:$0xff] }
 0x16d   : > { %v5711_v36 = vpop.permute.xlu1 %1852  ;;  %v5713_v28 = vpop.permute.xlu0 %627  ;;  %vm889_vm1 = vcmp.eq.s32.totalorder %v8397_v33, %v4778_v8  ;;  %v5756_v46 = vadd.f32 %v4025_v43, %v5535_v38  ;;  %v5759_v53 = vadd.f32 %v4026_v47, %v5544_v23  ;;  %v5762_v41 = vadd.f32 %v4031_v39, %v5565_v44  ;;  %v8400_v43 = vld [vmem:[#allocation47_spill] sm:$0xff] }
 0x16e   : > { %v4035_v45 = vsel %vm890_vm14, 1.0, %v8322_v4  ;;  %v5769_v33 = vadd.f32 %v4032_v30, %v5568_v58  ;;  %v5772_v62 = vadd.f32 %v4029_v57, %v5576_v0  ;;  %v5775_v38 = vadd.f32 %v4030_v25, %v5579_v42  ;;  %v8402_v42 = vld [vmem:[#allocation48_spill] sm:$0xff]  ;;  %v8403_v0 = vld [vmem:[#allocation51_spill] sm:$0xff] }
 0x16f   : > { %1939 = vbcast.lane.b32.xlu1 %v4615_v51, 344  ;;  %1872 = vbcast.lane.b32.xlu0 %v4605_v48, 344  ;;  %8398 = vst [vmem:[#allocation31_spill] sm:$0xff] %v5762_v41  ;;  %v4036_v23 = vsel %vm891_vm15, 1.0, %v8322_v4  ;;  %v4033_v44 = vsel %vm888_vm0, 1.0, %v8322_v4  ;;  %v4034_v9 = vsel %vm889_vm1, 1.0, %v8322_v4  ;;  %vm894_vm2 = vcmp.eq.s32.totalorder %v8400_v43, %v4769_v24 }
 0x170   : > { %8399 = vst [vmem:[#allocation32_spill] sm:$0xff] %v5769_v33  ;;  %vm895_vm4 = vcmp.eq.s32.totalorder %v8400_v43, %v4778_v8  ;;  %v5787_v58 = vadd.f32 %v4035_v45, %v5582_v2  ;;  %vm892_vm5 = vcmp.eq.s32.totalorder %v8402_v42, %v4769_v24  ;;  %vm893_vm6 = vcmp.eq.s32.totalorder %v8402_v42, %v4778_v8 }
 0x171   : > { %v5751_v10 = vpop.permute.xlu1 %1982  ;;  %v5753_v49 = vpop.permute.xlu0 %1919  ;;  %vm898_vm7 = vcmp.eq.s32.totalorder %v8403_v0, %v4769_v24  ;;  %vm899_vm3 = vcmp.eq.s32.totalorder %v8403_v0, %v4778_v8  ;;  %vm896_vm8 = vcmp.eq.s32.totalorder %v8404_v50, %v4769_v24  ;;  %vm897_vm9 = vcmp.eq.s32.totalorder %v8404_v50, %v4778_v8 }
 0x172   : > { %8401 = vst [vmem:[#allocation33_spill] sm:$0xff] %v5787_v58  ;;  %vm900_vm10 = vcmp.eq.s32.totalorder %v5016_v17, %v4769_v24  ;;  %v5808_v2 = vadd.f32 %v4036_v23, %v5585_v32  ;;  %v4039_v30 = vsel %vm894_vm2, 1.0, %v8322_v4  ;;  %v4040_v57 = vsel %vm895_vm4, 1.0, %v8322_v4 }
 0x173   : > { %2065 = vbcast.lane.b32.xlu1 %v4649_v61, 328  ;;  %2002 = vbcast.lane.b32.xlu0 %v4632_v56, 336  ;;  %vm901_vm11 = vcmp.eq.s32.totalorder %v5016_v17, %v4778_v8  ;;  %v5817_v25 = vadd.f32 %v4033_v44, %v5588_v29  ;;  %v4037_v32 = vsel %vm892_vm5, 1.0, %v8322_v4  ;;  %v4038_v45 = vsel %vm893_vm6, 1.0, %v8322_v4 }
 0x174   : > { %8405 = vst [vmem:[#allocation34_spill] sm:$0xff] %v5808_v2  ;;  %v4043_v23 = vsel %vm898_vm7, 1.0, %v8322_v4  ;;  %v4044_v43 = vsel %vm899_vm3, 1.0, %v8322_v4  ;;  %v4041_v29 = vsel %vm896_vm8, 1.0, %v8322_v4  ;;  %v4042_v44 = vsel %vm897_vm9, 1.0, %v8322_v4 }
 0x175   : > { %v5795_v47 = vpop.permute.xlu1 %2108  ;;  %v5797_v39 = vpop.permute.xlu0 %2045  ;;  %8406 = vst [vmem:[#allocation35_spill] sm:$0xff] %v5817_v25  ;;  %v4045_v50 = vsel %vm900_vm10, 1.0, %v8322_v4  ;;  %v5840_v42 = vadd.f32 %v4034_v9, %v5591_v15  ;;  %v5843_v58 = vadd.f32 %v4039_v30, %v5600_v11  ;;  %v5846_v0 = vadd.f32 %v4040_v57, %v5616_v1  ;;  %v8422_v9 = vld [vmem:[#allocation62_spill] sm:$0xff] }
 0x176   : > { %v4046_v25 = vsel %vm901_vm11, 1.0, %v8322_v4  ;;  %v5853_v33 = vadd.f32 %v4037_v32, %v5625_v3  ;;  %v5856_v41 = vadd.f32 %v4038_v45, %v5628_v52  ;;  %v5859_v15 = vadd.f32 %v4043_v23, %v5649_v63  ;;  %v8418_v63 = vld [vmem:[#allocation59_spill] sm:$0xff] }
 0x177   : > { %2191 = vbcast.lane.b32.xlu1 %v4709_v31, 312  ;;  %2128 = vbcast.lane.b32.xlu0 %v4672_v6, 320  ;;  %8407 = vst [vmem:[#allocation36_spill] sm:$0xff] %v5840_v42  ;;  %8408 = vst [vmem:[#allocation37_spill] sm:$0xff] %v5843_v58  ;;  %v5864_v11 = vadd.f32 %v4044_v43, %v5652_v22  ;;  %v5867_v1 = vadd.f32 %v4041_v29, %v5659_v37 }
 0x178   : > { %8409 = vst [vmem:[#allocation38_spill] sm:$0xff] %v5846_v0  ;;  %8410 = vst [vmem:[#allocation41_spill] sm:$0xff] %v5853_v33  ;;  %v5870_v17 = vadd.f32 %v4042_v44, %v5662_v35  ;;  %v5873_v3 = vadd.f32 %v4045_v50, %v5676_v59  ;;  %v5876_v52 = vadd.f32 %v4046_v25, %v5679_v60  ;;  %v8419_v35 = vld [vmem:[#allocation58_spill] sm:$0xff]  ;;  %v8420_v59 = vld [vmem:[#allocation60_spill] sm:$0xff] }
 0x179   : > { %v5835_v55 = vpop.permute.xlu1 %2230  ;;  %v5837_v2 = vpop.permute.xlu0 %2171  ;;  %8411 = vst [vmem:[#allocation42_spill] sm:$0xff] %v5856_v41  ;;  %8412 = vst [vmem:[#allocation43_spill] sm:$0xff] %v5859_v15  ;;  %vm2361_vm12 = vcmp.eq.s32.totalorder %v5096_v20, %v4769_v24  ;;  %vm2393_vm13 = vcmp.eq.s32.totalorder %v8418_v63, %v4769_v24  ;;  %vm2394_vm14 = vcmp.eq.s32.totalorder %v8418_v63, %v4778_v8  ;;  %v8421_v60 = vld [vmem:[#allocation61_spill] sm:$0xff] }
 0x17a   : > { %8413 = vst [vmem:[#allocation44_spill] sm:$0xff] %v5864_v11  ;;  %8414 = vst [vmem:[#allocation45_spill] sm:$0xff] %v5867_v1  ;;  %vm2362_vm15 = vcmp.eq.s32.totalorder %v5096_v20, %v4778_v8  ;;  %vm2359_vm0 = vcmp.eq.s32.totalorder %v8419_v35, %v4769_v24  ;;  %vm2360_vm1 = vcmp.eq.s32.totalorder %v8419_v35, %v4778_v8  ;;  %v4187_v30 = vsel %vm2393_vm13, 1.0, %v8322_v4  ;;  %v8425_v15 = vld [vmem:[#allocation49_spill] sm:$0xff] }
 0x17b   : > { %2317 = vbcast.lane.b32.xlu1 %v4876_v16, 296  ;;  %2254 = vbcast.lane.b32.xlu0 %v4746_v27, 304  ;;  %8415 = vst [vmem:[#allocation46_spill] sm:$0xff] %v5870_v17  ;;  %8416 = vst [vmem:[#allocation47_spill] sm:$0xff] %v5873_v3  ;;  %vm2391_vm2 = vcmp.eq.s32.totalorder %v8420_v59, %v4769_v24  ;;  %vm2392_vm4 = vcmp.eq.s32.totalorder %v8420_v59, %v4778_v8  ;;  %v4188_v57 = vsel %vm2394_vm14, 1.0, %v8322_v4 }
 0x17c   : > { %8417 = vst [vmem:[#allocation48_spill] sm:$0xff] %v5876_v52  ;;  %vm2395_vm5 = vcmp.eq.s32.totalorder %v8421_v60, %v4769_v24  ;;  %vm2363_vm6 = vcmp.eq.s32.totalorder %v8422_v9, %v4769_v24  ;;  %vm2396_vm7 = vcmp.eq.s32.totalorder %v8421_v60, %v4778_v8  ;;  %vm2364_vm3 = vcmp.eq.s32.totalorder %v8422_v9, %v4778_v8  ;;  %v8426_v60 = vld [vmem:[#allocation50_spill] sm:$0xff] }
 0x17d   : > { %v5884_v37 = vpop.permute.xlu1 %568  ;;  %v5886_v22 = vpop.permute.xlu0 %2234  ;;  %v4155_v25 = vsel %vm2361_vm12, 1.0, %v8322_v4  ;;  %v4156_v32 = vsel %vm2362_vm15, 1.0, %v8322_v4  ;;  %v4153_v45 = vsel %vm2359_vm0, 1.0, %v8322_v4  ;;  %v4185_v23 = vsel %vm2391_vm2, 1.0, %v8322_v4 }
 0x17e   : > { %v4154_v44 = vsel %vm2360_vm1, 1.0, %v8322_v4  ;;  %v4186_v20 = vsel %vm2392_vm4, 1.0, %v8322_v4  ;;  %v4189_v50 = vsel %vm2395_vm5, 1.0, %v8322_v4  ;;  %v4157_v63 = vsel %vm2363_vm6, 1.0, %v8322_v4 }
 0x17f   : > { %651 = vbcast.lane.b32.xlu1 %v8340_v40, 312  ;;  %588 = vbcast.lane.b32.xlu0 %v4682_v13, 320  ;;  %v3141_v52 = vadd.f32 %v4187_v30, %v4155_v25  ;;  %v3148_v3 = vadd.f32 %v4188_v57, %v4156_v32  ;;  %v4190_v35 = vsel %vm2396_vm7, 1.0, %v8322_v4  ;;  %v4158_v11 = vsel %vm2364_vm3, 1.0, %v8322_v4  ;;  %v8427_v57 = vld [vmem:[#allocation53_spill] sm:$0xff] }
 0x180   : > { %v3127_v59 = vadd.f32 %v4185_v23, %v4153_v45  ;;  %vm2425_vm8 = vcmp.eq.s32.totalorder %v8425_v15, %v4769_v24  ;;  %vm2426_vm9 = vcmp.eq.s32.totalorder %v8425_v15, %v4778_v8  ;;  %vm2423_vm10 = vcmp.eq.s32.totalorder %v8426_v60, %v4769_v24  ;;  %v8429_v15 = vld [vmem:[#allocation8_spill] sm:$0xff] }
 0x181   : > { %v5917_v43 = vpop.permute.xlu1 %690  ;;  %v5919_v29 = vpop.permute.xlu0 %631  ;;  %v3134_v9 = vadd.f32 %v4186_v20, %v4154_v44  ;;  %v3155_v30 = vadd.f32 %v4189_v50, %v4157_v63  ;;  %vm2424_vm11 = vcmp.eq.s32.totalorder %v8426_v60, %v4778_v8  ;;  %vm2397_vm12 = vcmp.eq.s32.totalorder %v8427_v57, %v4769_v24  ;;  %v8430_v50 = vld [vmem:[#allocation54_spill] sm:$0xff] }
 0x182   : > { %8423 = vst [vmem:[#allocation51_spill] sm:$0xff] %v5917_v43  ;;  %8424 = vst [vmem:[#allocation52_spill] sm:$0xff] %v5919_v29  ;;  %v3162_v45 = vadd.f32 %v4190_v35, %v4158_v11  ;;  %vm2398_vm13 = vcmp.eq.s32.totalorder %v8427_v57, %v4778_v8  ;;  %vm2365_vm14 = vcmp.eq.s32.totalorder %v8429_v15, %v4769_v24  ;;  %v4219_v23 = vsel %vm2425_vm8, 1.0, %v8322_v4  ;;  %v8431_v35 = vld [vmem:[#allocation9_spill] sm:$0xff]  ;;  %v8432_v43 = vld [vmem:[#allocation11_spill] sm:$0xff] }
 0x183   : > { %1876 = vbcast.lane.b32.xlu1 %v4605_v48, 352  ;;  %714 = vbcast.lane.b32.xlu0 %v4762_v34, 304  ;;  %vm2366_vm15 = vcmp.eq.s32.totalorder %v8429_v15, %v4778_v8  ;;  %v4220_v44 = vsel %vm2426_vm9, 1.0, %v8322_v4  ;;  %v4217_v20 = vsel %vm2423_vm10, 1.0, %v8322_v4  ;;  %vm2455_vm0 = vcmp.eq.s32.totalorder %v8430_v50, %v4769_v24 }
 0x184   : > { %v4218_v11 = vsel %vm2424_vm11, 1.0, %v8322_v4  ;;  %v4191_v63 = vsel %vm2397_vm12, 1.0, %v8322_v4  ;;  %vm2456_vm1 = vcmp.eq.s32.totalorder %v8430_v50, %v4778_v8  ;;  %vm2427_vm2 = vcmp.eq.s32.totalorder %v8431_v35, %v4769_v24 }
 0x185   : > { %v5951_v25 = vpop.permute.xlu1 %1856  ;;  %v5953_v32 = vpop.permute.xlu0 %694  ;;  %v4192_v60 = vsel %vm2398_vm13, 1.0, %v8322_v4  ;;  %v4159_v57 = vsel %vm2365_vm14, 1.0, %v8322_v4  ;;  %v4160_v15 = vsel %vm2366_vm15, 1.0, %v8322_v4  ;;  %vm2428_vm4 = vcmp.eq.s32.totalorder %v8431_v35, %v4778_v8 }
 0x186   : > { %8428 = vst [vmem:[#allocation59_spill] sm:$0xff] %v5951_v25  ;;  %v3142_v0 = vadd.f32 %v4219_v23, %v3141_v52  ;;  %v3149_v58 = vadd.f32 %v4220_v44, %v3148_v3  ;;  %v3128_v41 = vadd.f32 %v4217_v20, %v3127_v59  ;;  %v4249_v33 = vsel %vm2455_vm0, 1.0, %v8322_v4 }
 0x187   : > { %2006 = vbcast.lane.b32.xlu1 %v4632_v56, 344  ;;  %1943 = vbcast.lane.b32.xlu0 %v4615_v51, 352  ;;  %v3135_v42 = vadd.f32 %v4218_v11, %v3134_v9  ;;  %v4250_v25 = vsel %vm2456_vm1, 1.0, %v8322_v4  ;;  %v4221_v29 = vsel %vm2427_vm2, 1.0, %v8322_v4  ;;  %vm2457_vm5 = vcmp.eq.s32.totalorder %v8432_v43, %v4769_v24  ;;  %v8433_v9 = vld [vmem:[#allocation10_spill] sm:$0xff] }
 0x188   : > { %v3169_v52 = vadd.f32 %v4191_v63, %v4159_v57  ;;  %v3176_v3 = vadd.f32 %v4192_v60, %v4160_v15  ;;  %v4222_v59 = vsel %vm2428_vm4, 1.0, %v8322_v4  ;;  %vm2458_vm6 = vcmp.eq.s32.totalorder %v8432_v43, %v4778_v8 }
 0x189   : > { %v5979_v17 = vpop.permute.xlu1 %1986  ;;  %v5981_v1 = vpop.permute.xlu0 %1923  ;;  %v3129_v23 = vadd.f32 %v4249_v33, %v3128_v41  ;;  %vm2367_vm7 = vcmp.eq.s32.totalorder %v8433_v9, %v4769_v24  ;;  %vm2429_vm3 = vcmp.eq.s32.totalorder %v5390_v5, %v4769_v24  ;;  %vm2430_vm8 = vcmp.eq.s32.totalorder %v5390_v5, %v4778_v8 }
 0x18a   : > { %v3136_v50 = vadd.f32 %v4250_v25, %v3135_v42  ;;  %v3156_v11 = vadd.f32 %v4221_v29, %v3155_v30  ;;  %vm2368_vm9 = vcmp.eq.s32.totalorder %v8433_v9, %v4778_v8  ;;  %v4251_v41 = vsel %vm2457_vm5, 1.0, %v8322_v4  ;;  %v8434_v29 = vld [vmem:[#allocation24_spill] sm:$0xff] }
 0x18b   : > { %2132 = vbcast.lane.b32.xlu1 %v4672_v6, 328  ;;  %2069 = vbcast.lane.b32.xlu0 %v4649_v61, 336  ;;  %v3163_v33 = vadd.f32 %v4222_v59, %v3162_v45  ;;  %v4252_v63 = vsel %vm2458_vm6, 1.0, %v8322_v4  ;;  %vm2399_vm10 = vcmp.eq.s32.totalorder %v5392_v54, %v4769_v24  ;;  %vm2400_vm11 = vcmp.eq.s32.totalorder %v5392_v54, %v4778_v8  ;;  %v8435_v54 = vld [vmem:[#allocation12_spill] sm:$0xff] }
 0x18c   : > { %v4161_v5 = vsel %vm2367_vm7, 1.0, %v8322_v4  ;;  %v4223_v42 = vsel %vm2429_vm3, 1.0, %v8322_v4  ;;  %v4224_v43 = vsel %vm2430_vm8, 1.0, %v8322_v4  ;;  %vm2487_vm12 = vcmp.eq.s32.totalorder %v8434_v29, %v4769_v24 }
 0x18d   : > { %v6002_v44 = vpop.permute.xlu1 %2112  ;;  %v6004_v20 = vpop.permute.xlu0 %2049  ;;  %v4162_v30 = vsel %vm2368_vm9, 1.0, %v8322_v4  ;;  %v3143_v25 = vadd.f32 %v4251_v41, %v3142_v0  ;;  %vm2488_vm13 = vcmp.eq.s32.totalorder %v8434_v29, %v4778_v8  ;;  %vm2459_vm14 = vcmp.eq.s32.totalorder %v8435_v54, %v4769_v24  ;;  %v8438_v41 = vld [vmem:[#allocation13_spill] sm:$0xff] }
 0x18e   : > { %v3150_v60 = vadd.f32 %v4252_v63, %v3149_v58  ;;  %v4193_v57 = vsel %vm2399_vm10, 1.0, %v8322_v4  ;;  %v4194_v15 = vsel %vm2400_vm11, 1.0, %v8322_v4  ;;  %vm2460_vm15 = vcmp.eq.s32.totalorder %v8435_v54, %v4778_v8 }
 0x18f   : > { %2258 = vbcast.lane.b32.xlu1 %v4746_v27, 312  ;;  %2195 = vbcast.lane.b32.xlu0 %v4709_v31, 320  ;;  %v6037_v59 = vadd.f32 %v4223_v42, %v3169_v52  ;;  %v6039_v0 = vadd.f32 %v4224_v43, %v3176_v3  ;;  %v4281_v9 = vsel %vm2487_vm12, 1.0, %v8322_v4  ;;  %vm912_vm0 = vcmp.eq.s32.totalorder %v8438_v41, %v4769_v24  ;;  %v8439_v52 = vld [vmem:[#allocation14_spill] sm:$0xff] }
 0x190   : > { %v4282_v58 = vsel %vm2488_vm13, 1.0, %v8322_v4  ;;  %v4253_v63 = vsel %vm2459_vm14, 1.0, %v8322_v4  ;;  %vm913_vm1 = vcmp.eq.s32.totalorder %v8438_v41, %v4778_v8  ;;  %vm2489_vm2 = vcmp.eq.s32.totalorder %v8439_v52, %v4769_v24 }
 0x191   : > { %v6029_v45 = vpop.permute.xlu1 %2238  ;;  %v6031_v35 = vpop.permute.xlu0 %2175  ;;  %v3183_v3 = vadd.f32 %v4193_v57, %v4161_v5  ;;  %v3190_v42 = vadd.f32 %v4194_v15, %v4162_v30  ;;  %v4254_v43 = vsel %vm2460_vm15, 1.0, %v8322_v4  ;;  %vm2490_vm4 = vcmp.eq.s32.totalorder %v8439_v52, %v4778_v8 }
 0x192   : > { %8436 = vst [vmem:[#allocation58_spill] sm:$0xff] %v6029_v45  ;;  %8437 = vst [vmem:[#allocation60_spill] sm:$0xff] %v6031_v35  ;;  %v6059_v35 = vadd.f32 %v4281_v9, %v3129_v23  ;;  %v4057_v45 = vsel %vm912_vm0, 1.0, %v8322_v4  ;;  %vm914_vm5 = vcmp.eq.s32.totalorder %v5524_v14, %v4769_v24  ;;  %vm915_vm6 = vcmp.eq.s32.totalorder %v5524_v14, %v4778_v8 }
 0x193   : > { %592 = vbcast.lane.b32.xlu1 %v4682_v13, 328  ;;  %2321 = vbcast.lane.b32.xlu0 %v4876_v16, 304  ;;  %v6066_v5 = vadd.f32 %v4282_v58, %v3136_v50  ;;  %v3157_v30 = vadd.f32 %v4253_v63, %v3156_v11  ;;  %v4058_v57 = vsel %vm913_vm1, 1.0, %v8322_v4  ;;  %v4283_v15 = vsel %vm2489_vm2, 1.0, %v8322_v4 }
 0x194   : > { %v3164_v23 = vadd.f32 %v4254_v43, %v3163_v33  ;;  %v4284_v9 = vsel %vm2490_vm4, 1.0, %v8322_v4  ;;  %vm2431_vm7 = vcmp.eq.s32.totalorder %v5554_v7, %v4769_v24  ;;  %vm2432_vm3 = vcmp.eq.s32.totalorder %v5554_v7, %v4778_v8  ;;  %v8442_v7 = vld [vmem:[#allocation19_spill] sm:$0xff]  ;;  %v8443_v43 = vld [vmem:[#allocation20_spill] sm:$0xff] }
 0x195   : > { %v6055_v29 = vpop.permute.xlu1 %2301  ;;  %v6057_v54 = vpop.permute.xlu0 %2297  ;;  %v6078_v14 = vadd.f32 %v4057_v45, %v5756_v46  ;;  %vm2369_vm8 = vcmp.eq.s32.totalorder %v5522_v19, %v4769_v24  ;;  %v4059_v50 = vsel %vm914_vm5, 1.0, %v8322_v4  ;;  %v4060_v11 = vsel %vm915_vm6, 1.0, %v8322_v4 }
 0x196   : > { %v6089_v58 = vadd.f32 %v4058_v57, %v5759_v53  ;;  %v3144_v63 = vadd.f32 %v4283_v15, %v3143_v25  ;;  %vm2401_vm9 = vcmp.eq.s32.totalorder %v8442_v7, %v4769_v24  ;;  %vm2402_vm10 = vcmp.eq.s32.totalorder %v8442_v7, %v4778_v8 }
 0x197   : > { %718 = vbcast.lane.b32.xlu1 %v4762_v34, 312  ;;  %655 = vbcast.lane.b32.xlu0 %v8340_v40, 320  ;;  %v3151_v46 = vadd.f32 %v4284_v9, %v3150_v60  ;;  %v4225_v45 = vsel %vm2431_vm7, 1.0, %v8322_v4  ;;  %v4226_v52 = vsel %vm2432_vm3, 1.0, %v8322_v4  ;;  %vm2491_vm11 = vcmp.eq.s32.totalorder %v8443_v43, %v4769_v24  ;;  %v8444_v9 = vld [vmem:[#allocation21_spill] sm:$0xff] }
 0x198   : > { %vm2370_vm12 = vcmp.eq.s32.totalorder %v5522_v19, %v4778_v8  ;;  %v4163_v53 = vsel %vm2369_vm8, 1.0, %v8322_v4  ;;  %v6108_v25 = vadd.f32 %v4059_v50, %v5742_v12  ;;  %v6111_v60 = vadd.f32 %v4060_v11, %v5745_v18  ;;  %v8447_v11 = vld [vmem:[#allocation22_spill] sm:$0xff] }
 0x199   : > { %v6084_v41 = vpop.permute.xlu1 %635  ;;  %v6086_v33 = vpop.permute.xlu0 %572  ;;  %v4195_v57 = vsel %vm2401_vm9, 1.0, %v8322_v4  ;;  %v4196_v15 = vsel %vm2402_vm10, 1.0, %v8322_v4  ;;  %vm2492_vm13 = vcmp.eq.s32.totalorder %v8443_v43, %v4778_v8  ;;  %vm2461_vm14 = vcmp.eq.s32.totalorder %v8444_v9, %v4769_v24 }
 0x19a   : > { %8440 = vst [vmem:[#allocation61_spill] sm:$0xff] %v6084_v41  ;;  %8441 = vst [vmem:[#allocation62_spill] sm:$0xff] %v6086_v33  ;;  %v6123_v33 = vadd.f32 %v4225_v45, %v3183_v3  ;;  %v6125_v12 = vadd.f32 %v4226_v52, %v3190_v42  ;;  %v4285_v18 = vsel %vm2491_vm11, 1.0, %v8322_v4  ;;  %vm2462_vm15 = vcmp.eq.s32.totalorder %v8444_v9, %v4778_v8 }
 0x19b   : > { %1947 = vbcast.lane.b32.xlu1 %v4615_v51, 360  ;;  %1880 = vbcast.lane.b32.xlu0 %v4605_v48, 360  ;;  %v4164_v50 = vsel %vm2370_vm12, 1.0, %v8322_v4  ;;  %vm2521_vm0 = vcmp.eq.s32.totalorder %v8447_v11, %v4769_v24  ;;  %vm2522_vm1 = vcmp.eq.s32.totalorder %v8447_v11, %v4778_v8  ;;  %v6139_v3 = vadd.f32 %v4195_v57, %v4163_v53 }
 0x19c   : > { %v6141_v42 = vadd.f32 %v4196_v15, %v4164_v50  ;;  %v4286_v45 = vsel %vm2492_vm13, 1.0, %v8322_v4  ;;  %v4255_v52 = vsel %vm2461_vm14, 1.0, %v8322_v4  ;;  %v6151_v11 = vadd.f32 %v4285_v18, %v3157_v30 }
 0x19d   : > { %v6119_v7 = vpop.permute.xlu1 %1860  ;;  %v6121_v19 = vpop.permute.xlu0 %698  ;;  %vm944_vm5 = vcmp.eq.s32.totalorder %v5668_v21, %v4769_v24  ;;  %v4315_v43 = vsel %vm2521_vm0, 1.0, %v8322_v4  ;;  %v4316_v15 = vsel %vm2522_vm1, 1.0, %v8322_v4  ;;  %vm945_vm6 = vcmp.eq.s32.totalorder %v5668_v21, %v4778_v8 }
 0x19e   : > { %8445 = vst [vmem:[#allocation49_spill] sm:$0xff] %v6119_v7  ;;  %8446 = vst [vmem:[#allocation50_spill] sm:$0xff] %v6121_v19  ;;  %v8448_v7 = vld [vmem:[#allocation23_spill] sm:$0xff]  ;;  %v4256_v19 = vsel %vm2462_vm15, 1.0, %v8322_v4  ;;  %v6167_v30 = vadd.f32 %v4286_v45, %v3164_v23  ;;  %vm916_vm7 = vcmp.eq.s32.totalorder %v5670_v26, %v4769_v24  ;;  %vm917_vm3 = vcmp.eq.s32.totalorder %v5670_v26, %v4778_v8 }
 0x19f   : > { %vm2519_vm2 = vcmp.eq.s32.totalorder %v8448_v7, %v4769_v24  ;;  %2073 = vbcast.lane.b32.xlu1 %v4649_v61, 344  ;;  %2010 = vbcast.lane.b32.xlu0 %v4632_v56, 352  ;;  %vm2520_vm4 = vcmp.eq.s32.totalorder %v8448_v7, %v4778_v8  ;;  %v3171_v7 = vadd.f32 %v4255_v52, %v6037_v59  ;;  %v4089_v21 = vsel %vm944_vm5, 1.0, %v8322_v4 }
 0x1a0   : > { %v4313_v9 = vsel %vm2519_vm2, 1.0, %v8322_v4  ;;  %v3178_v18 = vadd.f32 %v4256_v19, %v6039_v0  ;;  %v4314_v50 = vsel %vm2520_vm4, 1.0, %v8322_v4  ;;  %v6179_v23 = vadd.f32 %v4315_v43, %v3144_v63 }
 0x1a1   : > { %v6158_v53 = vpop.permute.xlu1 %1990  ;;  %v6160_v57 = vpop.permute.xlu0 %1927  ;;  %v6181_v45 = vadd.f32 %v4316_v15, %v3151_v46  ;;  %v4090_v26 = vsel %vm945_vm6, 1.0, %v8322_v4  ;;  %v4061_v59 = vsel %vm916_vm7, 1.0, %v8322_v4  ;;  %v4062_v0 = vsel %vm917_vm3, 1.0, %v8322_v4 }
 0x1a2   : > { %8449 = vst [vmem:[#allocation53_spill] sm:$0xff] %v6158_v53  ;;  %8450 = vst [vmem:[#allocation8_spill] sm:$0xff] %v6160_v57  ;;  %v6184_v57 = vadd.f32 %v4313_v9, %v6059_v35  ;;  %vm2371_vm8 = vcmp.eq.s32.totalorder %v5711_v36, %v4769_v24  ;;  %vm946_vm9 = vcmp.eq.s32.totalorder %v5713_v28, %v4769_v24 }
 0x1a3   : > { %2199 = vbcast.lane.b32.xlu1 %v4709_v31, 328  ;;  %2136 = vbcast.lane.b32.xlu0 %v4672_v6, 336  ;;  %v6198_v63 = vadd.f32 %v4314_v50, %v6066_v5  ;;  %v6201_v35 = vadd.f32 %v4089_v21, %v6078_v14  ;;  %vm947_vm10 = vcmp.eq.s32.totalorder %v5713_v28, %v4778_v8  ;;  %v4165_v14 = vsel %vm2371_vm8, 1.0, %v8322_v4 }
 0x1a4   : > { %v6208_v46 = vadd.f32 %v4090_v26, %v6089_v58  ;;  %vm2372_vm11 = vcmp.eq.s32.totalorder %v5711_v36, %v4778_v8  ;;  %vm2433_vm12 = vcmp.eq.s32.totalorder %v5751_v10, %v4769_v24  ;;  %vm2434_vm13 = vcmp.eq.s32.totalorder %v5751_v10, %v4778_v8 }
 0x1a5   : > { %v6187_v53 = vpop.permute.xlu1 %2116  ;;  %v6189_v41 = vpop.permute.xlu0 %2053  ;;  %v6217_v5 = vadd.f32 %v4061_v59, %v5772_v62  ;;  %v6220_v28 = vadd.f32 %v4062_v0, %v5775_v38  ;;  %v4091_v58 = vsel %vm946_vm9, 1.0, %v8322_v4  ;;  %v4092_v36 = vsel %vm947_vm10, 1.0, %v8322_v4 }
 0x1a6   : > { %vm2403_vm14 = vcmp.eq.s32.totalorder %v5753_v49, %v4769_v24  ;;  %vm2404_vm15 = vcmp.eq.s32.totalorder %v5753_v49, %v4778_v8  ;;  %vm2493_vm0 = vcmp.eq.s32.totalorder %v5795_v47, %v4769_v24  ;;  %v4166_v10 = vsel %vm2372_vm11, 1.0, %v8322_v4 }
 0x1a7   : > { %2325 = vbcast.lane.b32.xlu1 %v4876_v16, 312  ;;  %2262 = vbcast.lane.b32.xlu0 %v4746_v27, 320  ;;  %v4227_v62 = vsel %vm2433_vm12, 1.0, %v8322_v4  ;;  %v4228_v38 = vsel %vm2434_vm13, 1.0, %v8322_v4  ;;  %vm2494_vm1 = vcmp.eq.s32.totalorder %v5795_v47, %v4778_v8  ;;  %v6243_v43 = vadd.f32 %v4091_v58, %v6108_v25 }
 0x1a8   : > { %vm2463_vm2 = vcmp.eq.s32.totalorder %v5797_v39, %v4769_v24  ;;  %vm2464_vm4 = vcmp.eq.s32.totalorder %v5797_v39, %v4778_v8  ;;  %vm2551_vm5 = vcmp.eq.s32.totalorder %v5835_v55, %v4769_v24  ;;  %v1546_v49 = vadd.f32 %v4092_v36, %v6111_v60 }
 0x1a9   : > { %v6224_v19 = vpop.permute.xlu1 %2242  ;;  %v6226_v52 = vpop.permute.xlu0 %2179  ;;  %v4197_v47 = vsel %vm2403_vm14, 1.0, %v8322_v4  ;;  %v4198_v15 = vsel %vm2404_vm15, 1.0, %v8322_v4  ;;  %v4287_v9 = vsel %vm2493_vm0, 1.0, %v8322_v4  ;;  %v6260_v21 = vadd.f32 %v4227_v62, %v6139_v3 }
 0x1aa   : > { %v6263_v39 = vadd.f32 %v4228_v38, %v6141_v42  ;;  %v4288_v26 = vsel %vm2494_vm1, 1.0, %v8322_v4  ;;  %vm2552_vm6 = vcmp.eq.s32.totalorder %v5835_v55, %v4778_v8  ;;  %v4257_v60 = vsel %vm2463_vm2, 1.0, %v8322_v4 }
 0x1ab   : > { %659 = vbcast.lane.b32.xlu1 %v8340_v40, 328  ;;  %596 = vbcast.lane.b32.xlu0 %v4682_v13, 336  ;;  %v4258_v59 = vsel %vm2464_vm4, 1.0, %v8322_v4  ;;  %v4345_v0 = vsel %vm2551_vm5, 1.0, %v8322_v4  ;;  %vm2523_vm7 = vcmp.eq.s32.totalorder %v5837_v2, %v4769_v24  ;;  %v6275_v3 = vadd.f32 %v4197_v47, %v4165_v14  ;;  %v8452_v47 = vld [vmem:[#allocation51_spill] sm:$0xff] }
 0x1ac   : > { %v6277_v42 = vadd.f32 %v4198_v15, %v4166_v10  ;;  %v6279_v58 = vadd.f32 %v4287_v9, %v3171_v7  ;;  %vm2524_vm3 = vcmp.eq.s32.totalorder %v5837_v2, %v4778_v8  ;;  %v6283_v55 = vadd.f32 %v4288_v26, %v3178_v18  ;;  %v8453_v15 = vld [vmem:[#allocation52_spill] sm:$0xff] }
 0x1ad   : > { %v6255_v50 = vpop.permute.xlu1 %576  ;;  %v6257_v25 = vpop.permute.xlu0 %2305  ;;  %v4346_v36 = vsel %vm2552_vm6, 1.0, %v8322_v4  ;;  %vm918_vm8 = vcmp.eq.s32.totalorder %v5884_v37, %v4769_v24  ;;  %vm919_vm9 = vcmp.eq.s32.totalorder %v5884_v37, %v4778_v8  ;;  %v6295_v7 = vadd.f32 %v4257_v60, %v6123_v33 }
 0x1ae   : > { %v6298_v10 = vadd.f32 %v4258_v59, %v6125_v12  ;;  %v6301_v18 = vadd.f32 %v4345_v0, %v6184_v57  ;;  %v4317_v38 = vsel %vm2523_vm7, 1.0, %v8322_v4  ;;  %v4318_v37 = vsel %vm2524_vm3, 1.0, %v8322_v4  ;;  %v8456_v0 = vld [vmem:[#allocation31_spill] sm:$0xff] }
 0x1af   : > { %1884 = vbcast.lane.b32.xlu1 %v4605_v48, 368  ;;  %722 = vbcast.lane.b32.xlu0 %v4762_v34, 320  ;;  %vm2553_vm10 = vcmp.eq.s32.totalorder %v5886_v22, %v4769_v24  ;;  %vm978_vm11 = vcmp.eq.s32.totalorder %v5953_v32, %v4769_v24  ;;  %vm979_vm12 = vcmp.eq.s32.totalorder %v5953_v32, %v4778_v8  ;;  %v4063_v2 = vsel %vm918_vm8, 1.0, %v8322_v4 }
 0x1b0   : > { %v6317_v33 = vadd.f32 %v4346_v36, %v6198_v63  ;;  %v4064_v12 = vsel %vm919_vm9, 1.0, %v8322_v4  ;;  %vm2554_vm13 = vcmp.eq.s32.totalorder %v5886_v22, %v4778_v8  ;;  %v6324_v57 = vadd.f32 %v4317_v38, %v6151_v11 }
 0x1b1   : > { %v6290_v62 = vpop.permute.xlu1 %702  ;;  %v6292_v14 = vpop.permute.xlu0 %639  ;;  %vm976_vm14 = vcmp.eq.s32.totalorder %v8452_v47, %v4769_v24  ;;  %vm977_vm15 = vcmp.eq.s32.totalorder %v8452_v47, %v4778_v8  ;;  %vm948_vm0 = vcmp.eq.s32.totalorder %v8453_v15, %v4769_v24  ;;  %v6337_v26 = vadd.f32 %v4318_v37, %v6167_v30  ;;  %v8457_v30 = vld [vmem:[#allocation32_spill] sm:$0xff] }
 0x1b2   : > { %8451 = vst [vmem:[#allocation54_spill] sm:$0xff] %v6292_v14  ;;  %v4347_v11 = vsel %vm2553_vm10, 1.0, %v8322_v4  ;;  %v4123_v60 = vsel %vm978_vm11, 1.0, %v8322_v4  ;;  %v4124_v59 = vsel %vm979_vm12, 1.0, %v8322_v4  ;;  %v6352_v36 = vadd.f32 %v4063_v2, %v8456_v0  ;;  %v8458_v14 = vld [vmem:[#allocation59_spill] sm:$0xff] }
 0x1b3   : > { %2014 = vbcast.lane.b32.xlu1 %v4632_v56, 360  ;;  %1951 = vbcast.lane.b32.xlu0 %v4615_v51, 368  ;;  %v6355_v38 = vadd.f32 %v4064_v12, %v8457_v30  ;;  %v4348_v37 = vsel %vm2554_vm13, 1.0, %v8322_v4  ;;  %vm949_vm1 = vcmp.eq.s32.totalorder %v8453_v15, %v4778_v8  ;;  %v4121_v22 = vsel %vm976_vm14, 1.0, %v8322_v4 }
 0x1b4   : > { %v4122_v32 = vsel %vm977_vm15, 1.0, %v8322_v4  ;;  %v4093_v47 = vsel %vm948_vm0, 1.0, %v8322_v4  ;;  %vm2435_vm2 = vcmp.eq.s32.totalorder %v5979_v17, %v4769_v24  ;;  %v1540_v2 = vadd.f32 %v4123_v60, %v6243_v43 }
 0x1b5   : > { %v6332_v63 = vpop.permute.xlu1 %1931  ;;  %v6334_v9 = vpop.permute.xlu0 %1864  ;;  %v1547_v12 = vadd.f32 %v4124_v59, %v1546_v49  ;;  %vm2436_vm4 = vcmp.eq.s32.totalorder %v5979_v17, %v4778_v8  ;;  %vm2405_vm5 = vcmp.eq.s32.totalorder %v5981_v1, %v4769_v24  ;;  %v3146_v30 = vadd.f32 %v4347_v11, %v6179_v23 }
 0x1b6   : > { %8454 = vst [vmem:[#allocation9_spill] sm:$0xff] %v6332_v63  ;;  %8455 = vst [vmem:[#allocation11_spill] sm:$0xff] %v6334_v9  ;;  %v3153_v9 = vadd.f32 %v4348_v37, %v6181_v45  ;;  %v4094_v63 = vsel %vm949_vm1, 1.0, %v8322_v4  ;;  %vm2373_vm6 = vcmp.eq.s32.totalorder %v8458_v14, %v4769_v24  ;;  %v1526_v43 = vadd.f32 %v4121_v22, %v6201_v35 }
 0x1b7   : > { %2140 = vbcast.lane.b32.xlu1 %v4672_v6, 344  ;;  %2077 = vbcast.lane.b32.xlu0 %v4649_v61, 352  ;;  %v1533_v49 = vadd.f32 %v4122_v32, %v6208_v46  ;;  %v4229_v60 = vsel %vm2435_vm2, 1.0, %v8322_v4  ;;  %vm2406_vm7 = vcmp.eq.s32.totalorder %v5981_v1, %v4778_v8  ;;  %v6389_v23 = vadd.f32 %v4093_v47, %v6217_v5 }
 0x1b8   : > { %vm2374_vm3 = vcmp.eq.s32.totalorder %v8458_v14, %v4778_v8  ;;  %v4230_v45 = vsel %vm2436_vm4, 1.0, %v8322_v4  ;;  %v4199_v35 = vsel %vm2405_vm5, 1.0, %v8322_v4  ;;  %v6402_v46 = vadd.f32 %v4094_v63, %v6220_v28 }
 0x1b9   : > { %v6372_v15 = vpop.permute.xlu1 %2057  ;;  %v6374_v0 = vpop.permute.xlu0 %1994  ;;  %v4167_v11 = vsel %vm2373_vm6, 1.0, %v8322_v4  ;;  %v6405_v5 = vadd.f32 %v1540_v2, %v1526_v43  ;;  %v6407_v59 = vadd.f32 %v1547_v12, %v1533_v49  ;;  %v6414_v17 = vadd.f32 %v4229_v60, %v6275_v3  ;;  %v8462_v2 = vld [vmem:[#allocation60_spill] sm:$0xff] }
 0x1ba   : > { %v4200_v22 = vsel %vm2406_vm7, 1.0, %v8322_v4  ;;  %vm2495_vm8 = vcmp.eq.s32.totalorder %v6002_v44, %v4769_v24  ;;  %vm2496_vm9 = vcmp.eq.s32.totalorder %v6002_v44, %v4778_v8  ;;  %v4168_v1 = vsel %vm2374_vm3, 1.0, %v8322_v4 }
 0x1bb   : > { %2266 = vbcast.lane.b32.xlu1 %v4746_v27, 328  ;;  %2203 = vbcast.lane.b32.xlu0 %v4709_v31, 336  ;;  %v6423_v28 = vadd.f32 %v4230_v45, %v6277_v42  ;;  %v6425_v63 = vadd.f32 %v4199_v35, %v4167_v11  ;;  %vm2465_vm10 = vcmp.eq.s32.totalorder %v6004_v20, %v4769_v24  ;;  %v4289_v3 = vsel %vm2495_vm8, 1.0, %v8322_v4 }
 0x1bc   : > { %vm2466_vm11 = vcmp.eq.s32.totalorder %v6004_v20, %v4778_v8  ;;  %vm2585_vm12 = vcmp.eq.s32.totalorder %v6055_v29, %v4769_v24  ;;  %vm2586_vm13 = vcmp.eq.s32.totalorder %v6055_v29, %v4778_v8  ;;  %vm2583_vm14 = vcmp.eq.s32.totalorder %v6057_v54, %v4769_v24  ;;  %v8461_v29 = vld [vmem:[#allocation58_spill] sm:$0xff] }
 0x1bd   : > { %v6409_v14 = vpop.permute.xlu1 %2183  ;;  %v6411_v37 = vpop.permute.xlu0 %2120  ;;  %v6439_v44 = vadd.f32 %v4200_v22, %v4168_v1  ;;  %v4290_v42 = vsel %vm2496_vm9, 1.0, %v8322_v4  ;;  %vm2584_vm15 = vcmp.eq.s32.totalorder %v6057_v54, %v4778_v8  ;;  %v4259_v47 = vsel %vm2465_vm10, 1.0, %v8322_v4  ;;  %v8463_v54 = vld [vmem:[#allocation61_spill] sm:$0xff] }
 0x1be   : > { %vm2555_vm0 = vcmp.eq.s32.totalorder %v8461_v29, %v4769_v24  ;;  %vm2556_vm1 = vcmp.eq.s32.totalorder %v8461_v29, %v4778_v8  ;;  %vm2525_vm2 = vcmp.eq.s32.totalorder %v8462_v2, %v4769_v24  ;;  %v4260_v12 = vsel %vm2466_vm11, 1.0, %v8322_v4 }
 0x1bf   : > { %600 = vbcast.lane.b32.xlu1 %v4682_v13, 344  ;;  %2329 = vbcast.lane.b32.xlu0 %v4876_v16, 320  ;;  %v4379_v43 = vsel %vm2585_vm12, 1.0, %v8322_v4  ;;  %v4380_v49 = vsel %vm2586_vm13, 1.0, %v8322_v4  ;;  %v4377_v60 = vsel %vm2583_vm14, 1.0, %v8322_v4  ;;  %v6463_v45 = vadd.f32 %v4289_v3, %v6295_v7 }
 0x1c0   : > { %v6466_v35 = vadd.f32 %v4290_v42, %v6298_v10  ;;  %vm2526_vm4 = vcmp.eq.s32.totalorder %v8462_v2, %v4778_v8  ;;  %v4378_v11 = vsel %vm2584_vm15, 1.0, %v8322_v4  ;;  %v6475_v22 = vadd.f32 %v4259_v47, %v6260_v21 }
 0x1c1   : > { %v6445_v32 = vpop.permute.xlu1 %2309  ;;  %v6447_v20 = vpop.permute.xlu0 %2246  ;;  %v4349_v1 = vsel %vm2555_vm0, 1.0, %v8322_v4  ;;  %v4350_v29 = vsel %vm2556_vm1, 1.0, %v8322_v4  ;;  %v4319_v7 = vsel %vm2525_vm2, 1.0, %v8322_v4  ;;  %v3147_v42 = vadd.f32 %v4379_v43, %v3146_v30 }
 0x1c2   : > { %8459 = vst [vmem:[#allocation10_spill] sm:$0xff] %v6445_v32  ;;  %8460 = vst [vmem:[#allocation24_spill] sm:$0xff] %v6447_v20  ;;  %v3154_v2 = vadd.f32 %v4380_v49, %v3153_v9  ;;  %v3133_v20 = vadd.f32 %v4377_v60, %v6301_v18  ;;  %vm950_vm5 = vcmp.eq.s32.totalorder %v8463_v54, %v4769_v24  ;;  %v4320_v21 = vsel %vm2526_vm4, 1.0, %v8322_v4  ;;  %v8464_v32 = vld [vmem:[#allocation50_spill] sm:$0xff] }
 0x1c3   : > { %726 = vbcast.lane.b32.xlu1 %v4762_v34, 328  ;;  %663 = vbcast.lane.b32.xlu0 %v8340_v40, 336  ;;  %v3140_v47 = vadd.f32 %v4378_v11, %v6317_v33  ;;  %vm980_vm6 = vcmp.eq.s32.totalorder %v8464_v32, %v4769_v24  ;;  %vm981_vm7 = vcmp.eq.s32.totalorder %v8464_v32, %v4778_v8  ;;  %v8465_v18 = vld [vmem:[#allocation62_spill] sm:$0xff]  ;;  %v8468_v32 = vld [vmem:[#allocation53_spill] sm:$0xff] }
 0x1c4   : > { %v6496_v9 = vadd.f32 %v4260_v12, %v6263_v39  ;;  %vm951_vm3 = vcmp.eq.s32.totalorder %v8463_v54, %v4778_v8  ;;  %vm920_vm8 = vcmp.eq.s32.totalorder %v8465_v18, %v4769_v24  ;;  %vm921_vm9 = vcmp.eq.s32.totalorder %v8465_v18, %v4778_v8  ;;  %v8471_v18 = vld [vmem:[#allocation36_spill] sm:$0xff] }
 0x1c5   : > { %v6480_v3 = vpop.permute.xlu1 %643  ;;  %v6482_v10 = vpop.permute.xlu0 %580  ;;  %v6505_v33 = vadd.f32 %v4349_v1, %v6324_v57  ;;  %v6508_v30 = vadd.f32 %v4350_v29, %v6337_v26  ;;  %v6519_v43 = vadd.f32 %v4320_v21, %v6283_v55  ;;  %v6521_v49 = vadd.f32 %v3147_v42, %v3133_v20  ;;  %v8467_v1 = vld [vmem:[#allocation49_spill] sm:$0xff]  ;;  %v8469_v42 = vld [vmem:[#allocation8_spill] sm:$0xff]  ;;  %v8470_v21 = vld [vmem:[#allocation35_spill] sm:$0xff] }
 0x1c6   : > { %v4125_v57 = vsel %vm980_vm6, 1.0, %v8322_v4  ;;  %v6531_v26 = vadd.f32 %v3154_v2, %v3140_v47  ;;  %v4096_v60 = vsel %vm951_vm3, 1.0, %v8322_v4  ;;  %v4065_v11 = vsel %vm920_vm8, 1.0, %v8322_v4 }
 0x1c7   : > { %1955 = vbcast.lane.b32.xlu1 %v4615_v51, 376  ;;  %1888 = vbcast.lane.b32.xlu0 %v4605_v48, 376  ;;  %v6511_v48 = vadd.f32 %v4319_v7, %v6279_v58  ;;  %v4095_v51 = vsel %vm950_vm5, 1.0, %v8322_v4  ;;  %v4126_v58 = vsel %vm981_vm7, 1.0, %v8322_v4  ;;  %v4066_v55 = vsel %vm921_vm9, 1.0, %v8322_v4 }
 0x1c8   : > { %v6539_v20 = vadd.f32 %v4095_v51, %v6352_v36  ;;  %vm2375_vm10 = vcmp.eq.s32.totalorder %v8467_v1, %v4769_v24  ;;  %vm2437_vm11 = vcmp.eq.s32.totalorder %v8468_v32, %v4769_v24  ;;  %vm2438_vm12 = vcmp.eq.s32.totalorder %v8468_v32, %v4778_v8 }
 0x1c9   : > { %v6514_v39 = vpop.permute.xlu1 %1868  ;;  %v6516_v12 = vpop.permute.xlu0 %706  ;;  %v1554_v29 = vadd.f32 %v4125_v57, %v6389_v23  ;;  %v1561_v7 = vadd.f32 %v4126_v58, %v6402_v46  ;;  %vm2407_vm13 = vcmp.eq.s32.totalorder %v8469_v42, %v4769_v24  ;;  %vm2408_vm14 = vcmp.eq.s32.totalorder %v8469_v42, %v4778_v8 }
 0x1ca   : > { %8466 = vst [vmem:[#allocation12_spill] sm:$0xff] %v6514_v39  ;;  %v6558_v54 = vadd.f32 %v4096_v60, %v6355_v38  ;;  %v6561_v47 = vadd.f32 %v4065_v11, %v8470_v21  ;;  %v6564_v23 = vadd.f32 %v4066_v55, %v8471_v18  ;;  %vm2376_vm15 = vcmp.eq.s32.totalorder %v8467_v1, %v4778_v8 }
 0x1cb   : > { %2081 = vbcast.lane.b32.xlu1 %v4649_v61, 360  ;;  %2018 = vbcast.lane.b32.xlu0 %v4632_v56, 368  ;;  %v4169_v46 = vsel %vm2375_vm10, 1.0, %v8322_v4  ;;  %v4231_v51 = vsel %vm2437_vm11, 1.0, %v8322_v4  ;;  %v4232_v57 = vsel %vm2438_vm12, 1.0, %v8322_v4  ;;  %vm2497_vm0 = vcmp.eq.s32.totalorder %v6187_v53, %v4769_v24 }
 0x1cc   : > { %v4201_v38 = vsel %vm2407_vm13, 1.0, %v8322_v4  ;;  %v4202_v58 = vsel %vm2408_vm14, 1.0, %v8322_v4  ;;  %vm2498_vm1 = vcmp.eq.s32.totalorder %v6187_v53, %v4778_v8  ;;  %vm2467_vm2 = vcmp.eq.s32.totalorder %v6189_v41, %v4769_v24 }
 0x1cd   : > { %v6553_v36 = vpop.permute.xlu1 %1998  ;;  %v6555_v2 = vpop.permute.xlu0 %1935  ;;  %v4170_v60 = vsel %vm2376_vm15, 1.0, %v8322_v4  ;;  %v6583_v11 = vadd.f32 %v6405_v5, %v1554_v29  ;;  %v6586_v55 = vadd.f32 %v6407_v59, %v1561_v7  ;;  %vm2468_vm4 = vcmp.eq.s32.totalorder %v6189_v41, %v4778_v8 }
 0x1ce   : > { %v6595_v53 = vadd.f32 %v4231_v51, %v6425_v63  ;;  %v6598_v42 = vadd.f32 %v4232_v57, %v6439_v44  ;;  %v4291_v21 = vsel %vm2497_vm0, 1.0, %v8322_v4  ;;  %vm2587_vm5 = vcmp.eq.s32.totalorder %v6257_v25, %v4769_v24 }
 0x1cf   : > { %2207 = vbcast.lane.b32.xlu1 %v4709_v31, 344  ;;  %2144 = vbcast.lane.b32.xlu0 %v4672_v6, 352  ;;  %v6603_v5 = vadd.f32 %v4201_v38, %v4169_v46  ;;  %v6605_v59 = vadd.f32 %v4202_v58, %v4170_v60  ;;  %v4292_v41 = vsel %vm2498_vm1, 1.0, %v8322_v4  ;;  %v4261_v29 = vsel %vm2467_vm2, 1.0, %v8322_v4  ;;  %v8472_v60 = vld [vmem:[#allocation54_spill] sm:$0xff] }
 0x1d0   : > { %v4262_v63 = vsel %vm2468_vm4, 1.0, %v8322_v4  ;;  %vm2557_vm6 = vcmp.eq.s32.totalorder %v6224_v19, %v4769_v24  ;;  %vm2558_vm7 = vcmp.eq.s32.totalorder %v6224_v19, %v4778_v8  ;;  %vm2527_vm3 = vcmp.eq.s32.totalorder %v6226_v52, %v4769_v24 }
 0x1d1   : > { %v6590_v1 = vpop.permute.xlu1 %2124  ;;  %v6592_v32 = vpop.permute.xlu0 %2061  ;;  %v6619_v44 = vadd.f32 %v4291_v21, %v6475_v22  ;;  %vm2528_vm8 = vcmp.eq.s32.totalorder %v6226_v52, %v4778_v8  ;;  %vm2588_vm9 = vcmp.eq.s32.totalorder %v6257_v25, %v4778_v8  ;;  %v4381_v7 = vsel %vm2587_vm5, 1.0, %v8322_v4 }
 0x1d2   : > { %v6631_v19 = vadd.f32 %v4292_v41, %v6496_v9  ;;  %v6634_v51 = vadd.f32 %v4261_v29, %v6414_v17  ;;  %vm922_vm10 = vcmp.eq.s32.totalorder %v6255_v50, %v4769_v24  ;;  %vm923_vm11 = vcmp.eq.s32.totalorder %v6255_v50, %v4778_v8 }
 0x1d3   : > { %2333 = vbcast.lane.b32.xlu1 %v4876_v16, 328  ;;  %2270 = vbcast.lane.b32.xlu0 %v4746_v27, 336  ;;  %v4351_v52 = vsel %vm2557_vm6, 1.0, %v8322_v4  ;;  %v4352_v25 = vsel %vm2558_vm7, 1.0, %v8322_v4  ;;  %v4321_v22 = vsel %vm2527_vm3, 1.0, %v8322_v4  ;;  %vm982_vm12 = vcmp.eq.s32.totalorder %v6290_v62, %v4769_v24 }
 0x1d4   : > { %v4322_v17 = vsel %vm2528_vm8, 1.0, %v8322_v4  ;;  %v4382_v9 = vsel %vm2588_vm9, 1.0, %v8322_v4  ;;  %v3161_v57 = vadd.f32 %v4381_v7, %v6505_v33  ;;  %vm983_vm13 = vcmp.eq.s32.totalorder %v6290_v62, %v4778_v8 }
 0x1d5   : > { %v6626_v18 = vpop.permute.xlu1 %2250  ;;  %v6628_v46 = vpop.permute.xlu0 %2187  ;;  %v6653_v50 = vadd.f32 %v4262_v63, %v6423_v28  ;;  %v4067_v38 = vsel %vm922_vm10, 1.0, %v8322_v4  ;;  %v4068_v58 = vsel %vm923_vm11, 1.0, %v8322_v4  ;;  %vm952_vm14 = vcmp.eq.s32.totalorder %v8472_v60, %v4769_v24 }
 0x1d6   : > { %v6664_v29 = vadd.f32 %v4351_v52, %v6511_v48  ;;  %v6667_v33 = vadd.f32 %v4352_v25, %v6519_v43  ;;  %v4127_v62 = vsel %vm982_vm12, 1.0, %v8322_v4  ;;  %vm953_vm15 = vcmp.eq.s32.totalorder %v8472_v60, %v4778_v8  ;;  %v8473_v48 = vld [vmem:[#allocation33_spill] sm:$0xff]  ;;  %v8474_v52 = vld [vmem:[#allocation34_spill] sm:$0xff] }
 0x1d7   : > { %667 = vbcast.lane.b32.xlu1 %v8340_v40, 344  ;;  %604 = vbcast.lane.b32.xlu0 %v4682_v13, 352  ;;  %v6673_v28 = vadd.f32 %v4321_v22, %v6463_v45  ;;  %v6676_v63 = vadd.f32 %v4322_v17, %v6466_v35  ;;  %v3168_v7 = vadd.f32 %v4382_v9, %v6508_v30  ;;  %v4128_v39 = vsel %vm983_vm13, 1.0, %v8322_v4  ;;  %v8475_v22 = vld [vmem:[#allocation9_spill] sm:$0xff]  ;;  %v8476_v17 = vld [vmem:[#allocation11_spill] sm:$0xff] }
 0x1d8   : > { %v6683_v43 = vadd.f32 %v4067_v38, %v8473_v48  ;;  %v6686_v25 = vadd.f32 %v4068_v58, %v8474_v52  ;;  %v6689_v45 = vadd.f32 %v6521_v49, %v3161_v57  ;;  %v4097_v35 = vsel %vm952_vm14, 1.0, %v8322_v4 }
 0x1d9   : > { %v6659_v21 = vpop.permute.xlu1 %584  ;;  %v6661_v41 = vpop.permute.xlu0 %2313  ;;  %v1568_v30 = vadd.f32 %v4127_v62, %v6539_v20  ;;  %vm2409_vm0 = vcmp.eq.s32.totalorder %v8475_v22, %v4769_v24  ;;  %vm2377_vm1 = vcmp.eq.s32.totalorder %v8476_v17, %v4769_v24  ;;  %v1575_v49 = vadd.f32 %v4128_v39, %v6558_v54 }
 0x1da   : > { %vm2410_vm2 = vcmp.eq.s32.totalorder %v8475_v22, %v4778_v8  ;;  %vm2378_vm4 = vcmp.eq.s32.totalorder %v8476_v17, %v4778_v8  ;;  %vm2469_vm5 = vcmp.eq.s32.totalorder %v6372_v15, %v4769_v24  ;;  %v6713_v20 = vadd.f32 %v6531_v26, %v3168_v7 }
 0x1db   : > { %2022 = vbcast.lane.b32.xlu1 %v4632_v56, 376  ;;  %730 = vbcast.lane.b32.xlu0 %v4762_v34, 336  ;;  %v4098_v56 = vsel %vm953_vm15, 1.0, %v8322_v4  ;;  %v6716_v57 = vadd.f32 %v4097_v35, %v6561_v47  ;;  %vm2470_vm6 = vcmp.eq.s32.totalorder %v6372_v15, %v4778_v8  ;;  %v4203_v54 = vsel %vm2409_vm0, 1.0, %v8322_v4 }
 0x1dc   : > { %v6723_v39 = vadd.f32 %v4098_v56, %v6564_v23  ;;  %v4171_v58 = vsel %vm2377_vm1, 1.0, %v8322_v4  ;;  %vm2439_vm7 = vcmp.eq.s32.totalorder %v6374_v0, %v4769_v24  ;;  %v4204_v26 = vsel %vm2410_vm2, 1.0, %v8322_v4 }
 0x1dd   : > { %v6701_v9 = vpop.permute.xlu1 %710  ;;  %v6703_v38 = vpop.permute.xlu0 %647  ;;  %v4172_v47 = vsel %vm2378_vm4, 1.0, %v8322_v4  ;;  %v4263_v15 = vsel %vm2469_vm5, 1.0, %v8322_v4  ;;  %vm2440_vm3 = vcmp.eq.s32.totalorder %v6374_v0, %v4778_v8  ;;  %v6739_v62 = vadd.f32 %v6583_v11, %v1568_v30  ;;  %v8477_v30 = vld [vmem:[#allocation10_spill] sm:$0xff] }
 0x1de   : > { %v6742_v7 = vadd.f32 %v6586_v55, %v1575_v49  ;;  %v4264_v48 = vsel %vm2470_vm6, 1.0, %v8322_v4  ;;  %vm2529_vm8 = vcmp.eq.s32.totalorder %v6409_v14, %v4769_v24  ;;  %v6747_v52 = vadd.f32 %v4203_v54, %v4171_v58  ;;  %v8479_v54 = vld [vmem:[#allocation24_spill] sm:$0xff] }
 0x1df   : > { %2148 = vbcast.lane.b32.xlu1 %v4672_v6, 360  ;;  %2085 = vbcast.lane.b32.xlu0 %v4649_v61, 368  ;;  %v4233_v35 = vsel %vm2439_vm7, 1.0, %v8322_v4  ;;  %vm2530_vm9 = vcmp.eq.s32.totalorder %v6409_v14, %v4778_v8  ;;  %vm2499_vm10 = vcmp.eq.s32.totalorder %v6411_v37, %v4769_v24  ;;  %v6756_v0 = vadd.f32 %v4204_v26, %v4172_v47 }
 0x1e0   : > { %v6759_v11 = vadd.f32 %v4263_v15, %v6595_v53  ;;  %v4234_v55 = vsel %vm2440_vm3, 1.0, %v8322_v4  ;;  %vm2589_vm11 = vcmp.eq.s32.totalorder %v8477_v30, %v4769_v24  ;;  %v6765_v56 = vadd.f32 %v4264_v48, %v6598_v42 }
 0x1e1   : > { %v6734_v60 = vpop.permute.xlu1 %1939  ;;  %v6736_v23 = vpop.permute.xlu0 %1872  ;;  %v4323_v14 = vsel %vm2529_vm8, 1.0, %v8322_v4  ;;  %vm2500_vm12 = vcmp.eq.s32.totalorder %v6411_v37, %v4778_v8  ;;  %vm2590_vm13 = vcmp.eq.s32.totalorder %v8477_v30, %v4778_v8  ;;  %v6777_v17 = vadd.f32 %v4233_v35, %v6603_v5  ;;  %v8480_v5 = vld [vmem:[#allocation7_spill] sm:$0xff] }
 0x1e2   : > { %v4324_v49 = vsel %vm2530_vm9, 1.0, %v8322_v4  ;;  %v4293_v42 = vsel %vm2499_vm10, 1.0, %v8322_v4  ;;  %vm2559_vm14 = vcmp.eq.s32.totalorder %v8479_v54, %v4769_v24  ;;  %v6784_v58 = vadd.f32 %v4234_v55, %v6605_v59 }
 0x1e3   : > { %2274 = vbcast.lane.b32.xlu1 %v4746_v27, 344  ;;  %2211 = vbcast.lane.b32.xlu0 %v4709_v31, 352  ;;  %v4383_v37 = vsel %vm2589_vm11, 1.0, %v8322_v4  ;;  %vm984_vm15 = vcmp.eq.s32.totalorder %v6516_v12, %v4769_v24  ;;  %vm985_vm0 = vcmp.eq.s32.totalorder %v6516_v12, %v4778_v8  ;;  %v6794_v26 = vadd.f32 %v4323_v14, %v6619_v44 }
 0x1e4   : > { %v4294_v47 = vsel %vm2500_vm12, 1.0, %v8322_v4  ;;  %v4384_v59 = vsel %vm2590_vm13, 1.0, %v8322_v4  ;;  %vm2560_vm1 = vcmp.eq.s32.totalorder %v8479_v54, %v4778_v8  ;;  %v6801_v15 = vadd.f32 %v4324_v49, %v6631_v19 }
 0x1e5   : > { %v6772_v22 = vpop.permute.xlu1 %2065  ;;  %v6774_v53 = vpop.permute.xlu0 %2002  ;;  %v6804_v48 = vadd.f32 %v4293_v42, %v6634_v51  ;;  %v4353_v35 = vsel %vm2559_vm14, 1.0, %v8322_v4  ;;  %vm954_vm2 = vcmp.eq.s32.totalorder %v6480_v3, %v4769_v24  ;;  %v3175_v30 = vadd.f32 %v4383_v37, %v6664_v29 }
 0x1e6   : > { %8478 = vst [vmem:[#allocation13_spill] sm:$0xff] %v6774_v53  ;;  %vm955_vm4 = vcmp.eq.s32.totalorder %v6480_v3, %v4778_v8  ;;  %v4129_v19 = vsel %vm984_vm15, 1.0, %v8322_v4  ;;  %v4130_v51 = vsel %vm985_vm0, 1.0, %v8322_v4  ;;  %v3182_v14 = vadd.f32 %v4384_v59, %v6667_v33 }
 0x1e7   : > { %545 = vbcast.lane.b32.xlu1 %v8480_v5, 368  ;;  %2337 = vbcast.lane.b32.xlu0 %v4876_v16, 336  ;;  %v4354_v49 = vsel %vm2560_vm1, 1.0, %v8322_v4  ;;  %vm924_vm5 = vcmp.eq.s32.totalorder %v6482_v10, %v4769_v24  ;;  %vm925_vm6 = vcmp.eq.s32.totalorder %v6482_v10, %v4778_v8  ;;  %v6833_v3 = vadd.f32 %v4294_v47, %v6653_v50  ;;  %v8481_v10 = vld [vmem:[#allocation41_spill] sm:$0xff] }
 0x1e8   : > { %v4099_v12 = vsel %vm954_vm2, 1.0, %v8322_v4  ;;  %vm2441_vm7 = vcmp.eq.s32.totalorder %v6553_v36, %v4769_v24  ;;  %vm2442_vm3 = vcmp.eq.s32.totalorder %v6553_v36, %v4778_v8  ;;  %v3188_v29 = vadd.f32 %v4353_v35, %v6673_v28 }
 0x1e9   : > { %v6809_v44 = vpop.permute.xlu1 %2191  ;;  %v6811_v55 = vpop.permute.xlu0 %2128  ;;  %v4100_v33 = vsel %vm955_vm4, 1.0, %v8322_v4  ;;  %v1582_v42 = vadd.f32 %v4129_v19, %v6716_v57  ;;  %v1589_v54 = vadd.f32 %v4130_v51, %v6723_v39  ;;  %v6849_v47 = vadd.f32 %v6689_v45, %v3175_v30 }
 0x1ea   : > { %v3195_v59 = vadd.f32 %v4354_v49, %v6676_v63  ;;  %v4069_v36 = vsel %vm924_vm5, 1.0, %v8322_v4  ;;  %v4070_v28 = vsel %vm925_vm6, 1.0, %v8322_v4  ;;  %v6861_v57 = vadd.f32 %v6713_v20, %v3182_v14  ;;  %v8482_v20 = vld [vmem:[#allocation42_spill] sm:$0xff] }
 0x1eb   : > { %671 = vbcast.lane.b32.xlu1 %v8340_v40, 352  ;;  %608 = vbcast.lane.b32.xlu0 %v4682_v13, 360  ;;  %v6864_v39 = vadd.f32 %v4099_v12, %v6683_v43  ;;  %v4235_v45 = vsel %vm2441_vm7, 1.0, %v8322_v4  ;;  %v4236_v63 = vsel %vm2442_vm3, 1.0, %v8322_v4  ;;  %v6871_v35 = vadd.f32 %v4100_v33, %v6686_v25 }
 0x1ec   : > { %vm2501_vm8 = vcmp.eq.s32.totalorder %v6590_v1, %v4769_v24  ;;  %vm2502_vm9 = vcmp.eq.s32.totalorder %v6590_v1, %v4778_v8  ;;  %vm2471_vm10 = vcmp.eq.s32.totalorder %v6592_v32, %v4769_v24  ;;  %v6880_v43 = vadd.f32 %v4069_v36, %v8481_v10 }
 0x1ed   : > { %v6844_v37 = vpop.permute.xlu1 %2317  ;;  %v6846_v50 = vpop.permute.xlu0 %2254  ;;  %v6883_v30 = vadd.f32 %v4070_v28, %v8482_v20  ;;  %v6889_v25 = vadd.f32 %v6742_v7, %v1589_v54  ;;  %v6896_v1 = vadd.f32 %v4235_v45, %v6747_v52  ;;  %v6899_v14 = vadd.f32 %v4236_v63, %v6756_v0  ;;  %v8483_v52 = vld [vmem:[#allocation39_spill] sm:$0xff] }
 0x1ee   : > { %vm2472_vm11 = vcmp.eq.s32.totalorder %v6592_v32, %v4778_v8  ;;  %vm2591_vm12 = vcmp.eq.s32.totalorder %v6661_v41, %v4769_v24  ;;  %v4296_v7 = vsel %vm2502_vm9, 1.0, %v8322_v4  ;;  %v4265_v49 = vsel %vm2471_vm10, 1.0, %v8322_v4 }
 0x1ef   : > { %2089 = vbcast.lane.b32.xlu1 %v4649_v61, 376  ;;  %734 = vbcast.lane.b32.xlu0 %v4762_v34, 344  ;;  %v6886_v61 = vadd.f32 %v6739_v62, %v1582_v42  ;;  %v4295_v62 = vsel %vm2501_vm8, 1.0, %v8322_v4  ;;  %vm2592_vm13 = vcmp.eq.s32.totalorder %v6661_v41, %v4778_v8  ;;  %vm878_vm14 = vcmp.eq.s32.totalorder %v8483_v52, %v4769_v24 }
 0x1f0   : > { %vm2561_vm15 = vcmp.eq.s32.totalorder %v6626_v18, %v4769_v24  ;;  %vm2562_vm0 = vcmp.eq.s32.totalorder %v6626_v18, %v4778_v8  ;;  %vm2531_vm1 = vcmp.eq.s32.totalorder %v6628_v46, %v4769_v24  ;;  %vm2532_vm2 = vcmp.eq.s32.totalorder %v6628_v46, %v4778_v8 }
 0x1f1   : > { %v6891_v19 = vpop.permute.xlu1 %651  ;;  %v6893_v51 = vpop.permute.xlu0 %588  ;;  %v4266_v32 = vsel %vm2472_vm11, 1.0, %v8322_v4  ;;  %vm926_vm4 = vcmp.eq.s32.totalorder %v6659_v21, %v4769_v24  ;;  %vm927_vm5 = vcmp.eq.s32.totalorder %v6659_v21, %v4778_v8  ;;  %v4385_v0 = vsel %vm2591_vm12, 1.0, %v8322_v4 }
 0x1f2   : > { %v6933_v18 = vadd.f32 %v4295_v62, %v6759_v11  ;;  %v6936_v42 = vadd.f32 %v4296_v7, %v6765_v56  ;;  %v4386_v46 = vsel %vm2592_vm13, 1.0, %v8322_v4  ;;  %vm986_vm6 = vcmp.eq.s32.totalorder %v6701_v9, %v4769_v24 }
 0x1f3   : > { %2215 = vbcast.lane.b32.xlu1 %v4709_v31, 360  ;;  %2152 = vbcast.lane.b32.xlu0 %v4672_v6, 368  ;;  %v4355_v21 = vsel %vm2561_vm15, 1.0, %v8322_v4  ;;  %v4356_v54 = vsel %vm2562_vm0, 1.0, %v8322_v4  ;;  %v4325_v36 = vsel %vm2531_vm1, 1.0, %v8322_v4  ;;  %v4326_v11 = vsel %vm2532_vm2, 1.0, %v8322_v4 }
 0x1f4   : > { %v4071_v56 = vsel %vm926_vm4, 1.0, %v8322_v4  ;;  %v4072_v41 = vsel %vm927_vm5, 1.0, %v8322_v4  ;;  %v3189_v28 = vadd.f32 %v4385_v0, %v3188_v29  ;;  %vm987_vm7 = vcmp.eq.s32.totalorder %v6701_v9, %v4778_v8 }
 0x1f5   : > { %v6928_v12 = vpop.permute.xlu1 %1876  ;;  %v6930_v33 = vpop.permute.xlu0 %714  ;;  %v3196_v45 = vadd.f32 %v4386_v46, %v3195_v59  ;;  %v4131_v63 = vsel %vm986_vm6, 1.0, %v8322_v4  ;;  %vm956_vm3 = vcmp.eq.s32.totalorder %v6703_v38, %v4769_v24  ;;  %vm957_vm8 = vcmp.eq.s32.totalorder %v6703_v38, %v4778_v8  ;;  %v8484_v46 = vld [vmem:[#allocation37_spill] sm:$0xff] }
 0x1f6   : > { %v6964_v62 = vadd.f32 %v4265_v49, %v6777_v17  ;;  %v6967_v29 = vadd.f32 %v4266_v32, %v6784_v58  ;;  %v6970_v9 = vadd.f32 %v4355_v21, %v6794_v26  ;;  %v6973_v59 = vadd.f32 %v4356_v54, %v6801_v15  ;;  %v8485_v58 = vld [vmem:[#allocation38_spill] sm:$0xff] }
 0x1f7   : > { %2341 = vbcast.lane.b32.xlu1 %v4876_v16, 344  ;;  %2278 = vbcast.lane.b32.xlu0 %v4746_v27, 352  ;;  %v6976_v7 = vadd.f32 %v4325_v36, %v6804_v48  ;;  %v6979_v0 = vadd.f32 %v4326_v11, %v6833_v3  ;;  %v6982_v53 = vadd.f32 %v4071_v56, %v8484_v46  ;;  %v4132_v17 = vsel %vm987_vm7, 1.0, %v8322_v4 }
 0x1f8   : > { %v6988_v26 = vadd.f32 %v4072_v41, %v8485_v58  ;;  %v1596_v15 = vadd.f32 %v4131_v63, %v6864_v39  ;;  %v4101_v48 = vsel %vm956_vm3, 1.0, %v8322_v4  ;;  %v4102_v3 = vsel %vm957_vm8, 1.0, %v8322_v4 }
 0x1f9   : > { %v6959_v10 = vpop.permute.xlu1 %2006  ;;  %v6961_v20 = vpop.permute.xlu0 %1943  ;;  %v7000_v49 = vadd.f32 %v6849_v47, %v3189_v28  ;;  %vm2413_vm9 = vcmp.eq.s32.totalorder %v6734_v60, %v4769_v24  ;;  %vm2381_vm10 = vcmp.eq.s32.totalorder %v6736_v23, %v4769_v24  ;;  %v1603_v21 = vadd.f32 %v4132_v17, %v6871_v35 }
 0x1fa   : > { %vm2414_vm11 = vcmp.eq.s32.totalorder %v6734_v60, %v4778_v8  ;;  %vm2382_vm12 = vcmp.eq.s32.totalorder %v6736_v23, %v4778_v8  ;;  %vm2473_vm13 = vcmp.eq.s32.totalorder %v6772_v22, %v4769_v24  ;;  %v7024_v38 = vsel %vm878_vm14, 1.0, %v8322_v4 }
 0x1fb   : > { %612 = vbcast.lane.b32.xlu1 %v4682_v13, 368  ;;  %549 = vbcast.lane.b32.xlu0 %v8480_v5, 376  ;;  %v7003_v5 = vadd.f32 %v6861_v57, %v3196_v45  ;;  %v7027_v47 = vadd.f32 %v4101_v48, %v6880_v43  ;;  %v7030_v57 = vadd.f32 %v4102_v3, %v6883_v30  ;;  %v4207_v23 = vsel %vm2413_vm9, 1.0, %v8322_v4 }
 0x1fc   : > { %vm2474_vm15 = vcmp.eq.s32.totalorder %v6772_v22, %v4778_v8  ;;  %v7037_v60 = vadd.f32 %v6886_v61, %v1596_v15  ;;  %v4175_v35 = vsel %vm2381_vm10, 1.0, %v8322_v4  ;;  %vm2533_vm14 = vcmp.eq.s32.totalorder %v6809_v44, %v4769_v24 }
 0x1fd   : > { %v7009_v39 = vpop.permute.xlu1 %2132  ;;  %v7011_v32 = vpop.permute.xlu0 %2069  ;;  %v4208_v43 = vsel %vm2414_vm11, 1.0, %v8322_v4  ;;  %v4176_v30 = vsel %vm2382_vm12, 1.0, %v8322_v4  ;;  %v4267_v22 = vsel %vm2473_vm13, 1.0, %v8322_v4  ;;  %vm2534_vm0 = vcmp.eq.s32.totalorder %v6809_v44, %v4778_v8 }
 0x1fe   : > { %v4268_v36 = vsel %vm2474_vm15, 1.0, %v8322_v4  ;;  %vm2503_vm1 = vcmp.eq.s32.totalorder %v6811_v55, %v4769_v24  ;;  %vm2504_vm2 = vcmp.eq.s32.totalorder %v6811_v55, %v4778_v8  ;;  %vm2593_vm4 = vcmp.eq.s32.totalorder %v6844_v37, %v4769_v24 }
 0x1ff   : > { %738 = vbcast.lane.b32.xlu1 %v4762_v34, 352  ;;  %675 = vbcast.lane.b32.xlu0 %v8340_v40, 360  ;;  %v7060_v11 = vadd.f32 %v6889_v25, %v1603_v21  ;;  %v7062_v56 = vadd.f32 %v4207_v23, %v4175_v35  ;;  %v4327_v44 = vsel %vm2533_vm14, 1.0, %v8322_v4  ;;  %vm2594_vm5 = vcmp.eq.s32.totalorder %v6844_v37, %v4778_v8 }
 0x200   : > { %v7069_v41 = vadd.f32 %v4208_v43, %v4176_v30  ;;  %v7072_v55 = vadd.f32 %v4267_v22, %v6896_v1  ;;  %v4328_v28 = vsel %vm2534_vm0, 1.0, %v8322_v4  ;;  %vm2563_vm6 = vcmp.eq.s32.totalorder %v6846_v50, %v4769_v24 }
 0x201   : > { %v7048_v54 = vpop.permute.xlu1 %2258  ;;  %v7050_v61 = vpop.permute.xlu0 %2195  ;;  %v7078_v25 = vadd.f32 %v4268_v36, %v6899_v14  ;;  %v4297_v45 = vsel %vm2503_vm1, 1.0, %v8322_v4  ;;  %v4298_v37 = vsel %vm2504_vm2, 1.0, %v8322_v4  ;;  %v4387_v63 = vsel %vm2593_vm4, 1.0, %v8322_v4  ;;  %v8487_v36 = vld [vmem:[#allocation46_spill] sm:$0xff] }
 0x202   : > { %v7088_v1 = vadd.f32 %v4327_v44, %v6933_v18  ;;  %v4388_v17 = vsel %vm2594_vm5, 1.0, %v8322_v4  ;;  %vm988_vm7 = vcmp.eq.s32.totalorder %v6930_v33, %v4769_v24  ;;  %vm989_vm3 = vcmp.eq.s32.totalorder %v6930_v33, %v4778_v8 }
 0x203   : > { %2219 = vbcast.lane.b32.xlu1 %v4709_v31, 368  ;;  %2156 = vbcast.lane.b32.xlu0 %v4672_v6, 376  ;;  %v7096_v14 = vadd.f32 %v4328_v28, %v6936_v42  ;;  %vm2564_vm8 = vcmp.eq.s32.totalorder %v6846_v50, %v4778_v8  ;;  %v4357_v58 = vsel %vm2563_vm6, 1.0, %v8322_v4  ;;  %vm958_vm9 = vcmp.eq.s32.totalorder %v6891_v19, %v4769_v24 }
 0x204   : > { %v7106_v18 = vadd.f32 %v4297_v45, %v6964_v62  ;;  %v3203_v33 = vadd.f32 %v4387_v63, %v6970_v9  ;;  %vm959_vm10 = vcmp.eq.s32.totalorder %v6891_v19, %v4778_v8  ;;  %vm928_vm11 = vcmp.eq.s32.totalorder %v6893_v51, %v4769_v24 }
 0x205   : > { %v7083_v6 = vpop.permute.xlu1 %592  ;;  %v7085_v46 = vpop.permute.xlu0 %2321  ;;  %v3210_v42 = vadd.f32 %v4388_v17, %v6973_v59  ;;  %vm929_vm12 = vcmp.eq.s32.totalorder %v6893_v51, %v4778_v8  ;;  %v4133_v15 = vsel %vm988_vm7, 1.0, %v8322_v4  ;;  %v4134_v48 = vsel %vm989_vm3, 1.0, %v8322_v4 }
 0x206   : > { %v7123_v9 = vadd.f32 %v4298_v37, %v6967_v29  ;;  %v4358_v21 = vsel %vm2564_vm8, 1.0, %v8322_v4  ;;  %v7130_v59 = vadd.f32 %v4357_v58, %v6976_v7  ;;  %v4103_v51 = vsel %vm958_vm9, 1.0, %v8322_v4 }
 0x207   : > { %2345 = vbcast.lane.b32.xlu1 %v4876_v16, 352  ;;  %2282 = vbcast.lane.b32.xlu0 %v4746_v27, 360  ;;  %v4104_v23 = vsel %vm959_vm10, 1.0, %v8322_v4  ;;  %v4073_v35 = vsel %vm928_vm11, 1.0, %v8322_v4  ;;  %vm2445_vm13 = vcmp.eq.s32.totalorder %v6959_v10, %v4769_v24  ;;  %vm2446_vm15 = vcmp.eq.s32.totalorder %v6959_v10, %v4778_v8 }
 0x208   : > { %v4074_v50 = vsel %vm929_vm12, 1.0, %v8322_v4  ;;  %v1610_v29 = vadd.f32 %v4133_v15, %v7027_v47  ;;  %v1617_v19 = vadd.f32 %v4134_v48, %v7030_v57  ;;  %vm2415_vm14 = vcmp.eq.s32.totalorder %v6961_v20, %v4769_v24 }
 0x209   : > { %v7118_v3 = vpop.permute.xlu1 %718  ;;  %v7120_v62 = vpop.permute.xlu0 %655  ;;  %v7150_v7 = vadd.f32 %v7000_v49, %v3203_v33  ;;  %v7153_v43 = vadd.f32 %v7003_v5, %v3210_v42  ;;  %v3223_v10 = vadd.f32 %v4358_v21, %v6979_v0  ;;  %vm2383_vm0 = vcmp.eq.s32.totalorder %v6928_v12, %v4769_v24  ;;  %v8486_v0 = vld [vmem:[#allocation45_spill] sm:$0xff] }
 0x20a   : > { %v7163_v47 = vadd.f32 %v4103_v51, %v6982_v53  ;;  %v4239_v57 = vsel %vm2445_vm13, 1.0, %v8322_v4  ;;  %v4240_v49 = vsel %vm2446_vm15, 1.0, %v8322_v4  ;;  %vm2416_vm1 = vcmp.eq.s32.totalorder %v6961_v20, %v4778_v8 }
 0x20b   : > { %679 = vbcast.lane.b32.xlu1 %v8340_v40, 368  ;;  %616 = vbcast.lane.b32.xlu0 %v4682_v13, 376  ;;  %v7170_v5 = vadd.f32 %v4104_v23, %v6988_v26  ;;  %v7173_v22 = vadd.f32 %v4073_v35, %v8486_v0  ;;  %v7176_v44 = vadd.f32 %v4074_v50, %v8487_v36  ;;  %v4209_v28 = vsel %vm2415_vm14, 1.0, %v8322_v4 }
 0x20c   : > { %vm879_vm2 = vcmp.eq.s32.totalorder %v8483_v52, %v4778_v8  ;;  %vm2384_vm4 = vcmp.eq.s32.totalorder %v6928_v12, %v4778_v8  ;;  %v4177_v53 = vsel %vm2383_vm0, 1.0, %v8322_v4  ;;  %v7187_v20 = vadd.f32 %v7037_v60, %v1610_v29 }
 0x20d   : > { %v7158_v13 = vpop.permute.xlu1 %1947  ;;  %v7160_v30 = vpop.permute.xlu0 %1880  ;;  %v7190_v26 = vadd.f32 %v7060_v11, %v1617_v19  ;;  %v7193_v45 = vadd.f32 %v4239_v57, %v7062_v56  ;;  %v4210_v37 = vsel %vm2416_vm1, 1.0, %v8322_v4  ;;  %vm2505_vm5 = vcmp.eq.s32.totalorder %v7009_v39, %v4769_v24 }
 0x20e   : > { %v7205_v60 = vadd.f32 %v4209_v28, %v4177_v53  ;;  %vm2506_vm6 = vcmp.eq.s32.totalorder %v7009_v39, %v4778_v8  ;;  %vm2595_vm7 = vcmp.eq.s32.totalorder %v7085_v46, %v4769_v24  ;;  %vm2596_vm3 = vcmp.eq.s32.totalorder %v7085_v46, %v4778_v8 }
 0x20f   : > { %2223 = vbcast.lane.b32.xlu1 %v4709_v31, 376  ;;  %742 = vbcast.lane.b32.xlu0 %v4762_v34, 360  ;;  %v7196_v31 = vadd.f32 %v4240_v49, %v7069_v41  ;;  %v4178_v11 = vsel %vm2384_vm4, 1.0, %v8322_v4  ;;  %vm2565_vm8 = vcmp.eq.s32.totalorder %v7048_v54, %v4769_v24  ;;  %vm2566_vm9 = vcmp.eq.s32.totalorder %v7048_v54, %v4778_v8 }
 0x210   : > { %vm2535_vm10 = vcmp.eq.s32.totalorder %v7050_v61, %v4769_v24  ;;  %v7222_v56 = vadd.f32 %v4210_v37, %v4178_v11  ;;  %v4299_v41 = vsel %vm2505_vm5, 1.0, %v8322_v4  ;;  %vm2536_vm11 = vcmp.eq.s32.totalorder %v7050_v61, %v4778_v8 }
 0x211   : > { %v7201_v12 = vpop.permute.xlu1 %2073  ;;  %v7203_v63 = vpop.permute.xlu0 %2010  ;;  %vm930_vm12 = vcmp.eq.s32.totalorder %v7083_v6, %v4769_v24  ;;  %vm931_vm13 = vcmp.eq.s32.totalorder %v7083_v6, %v4778_v8  ;;  %v4389_v46 = vsel %vm2595_vm7, 1.0, %v8322_v4  ;;  %v4390_v17 = vsel %vm2596_vm3, 1.0, %v8322_v4 }
 0x212   : > { %v8488_v42 = vlaneseq  ;;  %v4300_v48 = vsel %vm2506_vm6, 1.0, %v8322_v4  ;;  %v4359_v21 = vsel %vm2565_vm8, 1.0, %v8322_v4  ;;  %v4360_v51 = vsel %vm2566_vm9, 1.0, %v8322_v4 }
 0x213   : > { %2349 = vbcast.lane.b32.xlu1 %v4876_v16, 360  ;;  %2286 = vbcast.lane.b32.xlu0 %v4746_v27, 368  ;;  %v4329_v23 = vsel %vm2535_vm10, 1.0, %v8322_v4  ;;  %v4330_v39 = vsel %vm2536_vm11, 1.0, %v8322_v4  ;;  %v4075_v35 = vsel %vm930_vm12, 1.0, %v8322_v4  ;;  %vm990_vm14 = vcmp.eq.s32.totalorder %v7118_v3, %v4769_v24 }
 0x214   : > { %vm7238_vm15 = vcmp.lt.s32.totalorder %v8488_v42, 256  ;;  %vm991_vm0 = vcmp.eq.s32.totalorder %v7118_v3, %v4778_v8  ;;  %v7273_v54 = vadd.f32 %v4299_v41, %v7072_v55  ;;  %v4076_v61 = vsel %vm931_vm13, 1.0, %v8322_v4 }
 0x215   : > { %v7233_v58 = vpop.permute.xlu1 %2199  ;;  %v7235_v33 = vpop.permute.xlu0 %2136  ;;  %199 = vst.msk [vmem:[#allocation3] sm:$0x3] %vm7238_vm15, %v8322_v4  ;;  %198 = vst.msk [vmem:[#allocation2] sm:$0x3] %vm7238_vm15, %v8322_v4  ;;  %v3217_v50 = vadd.f32 %v4389_v46, %v7130_v59  ;;  %v3224_v29 = vadd.f32 %v4390_v17, %v3223_v10  ;;  %v7281_v19 = vadd.f32 %v4300_v48, %v7078_v25  ;;  %v8491_v59 = vld [vmem:[#allocation43_spill] sm:$0xff]  ;;  %v4135_v25 = vsel %vm990_vm14, 1.0, %v8322_v4 }
 0x216   : > { %v7284_v57 = vadd.f32 %v4359_v21, %v7088_v1  ;;  %v7287_v49 = vadd.f32 %v4360_v51, %v7096_v14  ;;  %v7297_v6 = vadd.f32 %v4330_v39, %v7123_v9  ;;  %v7300_v10 = vadd.f32 %v4075_v35, %v8491_v59 }
 0x217   : > { %746 = vbcast.lane.b32.xlu1 %v4762_v34, 368  ;;  %683 = vbcast.lane.b32.xlu0 %v8340_v40, 376  ;;  %v7290_v40 = vadd.f32 %v4329_v23, %v7106_v18  ;;  %v4136_v1 = vsel %vm991_vm0, 1.0, %v8322_v4  ;;  %v7314_v14 = vsel %vm879_vm2, 1.0, %v8322_v4  ;;  %v8492_v18 = vld [vmem:[#allocation44_spill] sm:$0xff]  ;;  %vm960_vm1 = vcmp.eq.s32.totalorder %v7120_v62, %v4769_v24 }
 0x218   : > { %v7317_v9 = vadd.f32 %v4076_v61, %v8492_v18  ;;  %vm961_vm4 = vcmp.eq.s32.totalorder %v7120_v62, %v4778_v8  ;;  %v7326_v3 = vadd.f32 %v7150_v7, %v3217_v50  ;;  %v7329_v52 = vadd.f32 %v7153_v43, %v3224_v29 }
 0x219   : > { %v7292_v55 = vpop.permute.xlu1 %2325  ;;  %v7294_v0 = vpop.permute.xlu0 %2262  ;;  %vm2417_vm2 = vcmp.eq.s32.totalorder %v7158_v13, %v4769_v24  ;;  %vm2418_vm5 = vcmp.eq.s32.totalorder %v7158_v13, %v4778_v8  ;;  %v1624_v36 = vadd.f32 %v4135_v25, %v7163_v47  ;;  %v1631_v62 = vadd.f32 %v4136_v1, %v7170_v5 }
 0x21a   : > { %vm2385_vm6 = vcmp.eq.s32.totalorder %v7160_v30, %v4769_v24  ;;  %vm2386_vm7 = vcmp.eq.s32.totalorder %v7160_v30, %v4778_v8  ;;  %v4105_v43 = vsel %vm960_vm1, 1.0, %v8322_v4  ;;  %v4106_v28 = vsel %vm961_vm4, 1.0, %v8322_v4 }
 0x21b   : > { %2353 = vbcast.lane.b32.xlu1 %v4876_v16, 368  ;;  %2290 = vbcast.lane.b32.xlu0 %v4746_v27, 376  ;;  %vm2477_vm3 = vcmp.eq.s32.totalorder %v7201_v12, %v4769_v24  ;;  %vm2478_vm8 = vcmp.eq.s32.totalorder %v7201_v12, %v4778_v8  ;;  %v4211_v13 = vsel %vm2417_vm2, 1.0, %v8322_v4  ;;  %v4212_v47 = vsel %vm2418_vm5, 1.0, %v8322_v4 }
 0x21c   : > { %vm2447_vm9 = vcmp.eq.s32.totalorder %v7203_v63, %v4769_v24  ;;  %vm2448_vm10 = vcmp.eq.s32.totalorder %v7203_v63, %v4778_v8  ;;  %v4179_v30 = vsel %vm2385_vm6, 1.0, %v8322_v4  ;;  %v4180_v5 = vsel %vm2386_vm7, 1.0, %v8322_v4 }
 0x21d   : > { %v7341_v27 = vpop.permute.xlu1 %659  ;;  %v7343_v7 = vpop.permute.xlu0 %596  ;;  %vm2537_vm11 = vcmp.eq.s32.totalorder %v7233_v58, %v4769_v24  ;;  %vm2538_vm12 = vcmp.eq.s32.totalorder %v7233_v58, %v4778_v8  ;;  %v7366_v53 = vadd.f32 %v4105_v43, %v7173_v22  ;;  %v7369_v37 = vadd.f32 %v4106_v28, %v7176_v44 }
 0x21e   : > { %v7374_v41 = vadd.f32 %v7187_v20, %v1624_v36  ;;  %v7377_v46 = vadd.f32 %v7190_v26, %v1631_v62  ;;  %v4241_v22 = vsel %vm2447_vm9, 1.0, %v8322_v4  ;;  %v4242_v44 = vsel %vm2448_vm10, 1.0, %v8322_v4 }
 0x21f   : > { %2357 = vbcast.lane.b32.xlu1 %v4876_v16, 376  ;;  %750 = vbcast.lane.b32.xlu0 %v4762_v34, 376  ;;  %v4271_v16 = vsel %vm2477_vm3, 1.0, %v8322_v4  ;;  %v4272_v34 = vsel %vm2478_vm8, 1.0, %v8322_v4  ;;  %v7387_v17 = vadd.f32 %v4211_v13, %v4179_v30  ;;  %v7389_v58 = vadd.f32 %v4212_v47, %v4180_v5 }
 0x220   : > { %v4331_v20 = vsel %vm2537_vm11, 1.0, %v8322_v4  ;;  %v4332_v42 = vsel %vm2538_vm12, 1.0, %v8322_v4  ;;  %v3283_v26 = vadd.f32 %v4271_v16, %v7193_v45  ;;  %v3290_v48 = vadd.f32 %v4272_v34, %v7196_v31 }
 0x221   : > { %v1885_v12 = vpop.permute.xlu1 %1884  ;;  %v723_v11 = vpop.permute.xlu0 %722  ;;  %vm2597_vm13 = vcmp.eq.s32.totalorder %v7292_v55, %v4769_v24  ;;  %vm2598_vm14 = vcmp.eq.s32.totalorder %v7292_v55, %v4778_v8  ;;  %v7400_v63 = vadd.f32 %v4241_v22, %v7205_v60  ;;  %v7403_v21 = vadd.f32 %v4242_v44, %v7222_v56 }
 0x222   : > { %vm2387_vm0 = vcmp.eq.s32.totalorder %v1885_v12, %v4769_v24  ;;  %vm2388_vm1 = vcmp.eq.s32.totalorder %v1885_v12, %v4778_v8  ;;  %v3257_v31 = vadd.f32 %v4331_v20, %v7273_v54  ;;  %v3264_v23 = vadd.f32 %v4332_v42, %v7281_v19 }
 0x223   : > { %vm2567_vm4 = vcmp.eq.s32.totalorder %v7294_v0, %v4769_v24  ;;  %vm2568_vm2 = vcmp.eq.s32.totalorder %v7294_v0, %v4778_v8  ;;  %v4391_v60 = vsel %vm2597_vm13, 1.0, %v8322_v4  ;;  %v4392_v56 = vsel %vm2598_vm14, 1.0, %v8322_v4 }
 0x224   : > { %v4181_v39 = vsel %vm2387_vm0, 1.0, %v8322_v4  ;;  %v4182_v35 = vsel %vm2388_vm1, 1.0, %v8322_v4  ;;  %v4361_v50 = vsel %vm2567_vm4, 1.0, %v8322_v4  ;;  %v4362_v29 = vsel %vm2568_vm2, 1.0, %v8322_v4 }
 0x225   : > { %v7407_v51 = vpop.permute.xlu1 %2014  ;;  %v1952_v45 = vpop.permute.xlu0 %1951  ;;  %v3231_v25 = vadd.f32 %v4391_v60, %v7284_v57  ;;  %v3238_v1 = vadd.f32 %v4392_v56, %v7287_v49  ;;  %vm992_vm8 = vcmp.eq.s32.totalorder %v723_v11, %v4769_v24  ;;  %vm993_vm9 = vcmp.eq.s32.totalorder %v723_v11, %v4778_v8 }
 0x226   : > { %vm2419_vm5 = vcmp.eq.s32.totalorder %v1952_v45, %v4769_v24  ;;  %vm2420_vm6 = vcmp.eq.s32.totalorder %v1952_v45, %v4778_v8  ;;  %v3244_v62 = vadd.f32 %v4361_v50, %v7290_v40  ;;  %v3251_v43 = vadd.f32 %v4362_v29, %v7297_v6 }
 0x227   : > { %v4213_v54 = vsel %vm2419_vm5, 1.0, %v8322_v4  ;;  %v4214_v61 = vsel %vm2420_vm6, 1.0, %v8322_v4  ;;  %vm962_vm10 = vcmp.eq.s32.totalorder %v7341_v27, %v4769_v24  ;;  %vm963_vm11 = vcmp.eq.s32.totalorder %v7341_v27, %v4778_v8 }
 0x228   : > { %v7425_v19 = vadd.f32 %v4213_v54, %v4181_v39  ;;  %v7427_v55 = vadd.f32 %v4214_v61, %v4182_v35  ;;  %vm932_vm12 = vcmp.eq.s32.totalorder %v7343_v7, %v4769_v24  ;;  %vm933_vm13 = vcmp.eq.s32.totalorder %v7343_v7, %v4778_v8 }
 0x229   : > { %v2141_v0 = vpop.permute.xlu1 %2140  ;;  %v7429_v59 = vpop.permute.xlu0 %2077  ;;  %v4137_v6 = vsel %vm992_vm8, 1.0, %v8322_v4  ;;  %v4138_v13 = vsel %vm993_vm9, 1.0, %v8322_v4  ;;  %v3357_v47 = vadd.f32 %v7326_v3, %v3231_v25  ;;  %v3378_v27 = vadd.f32 %v7329_v52, %v3238_v1 }
 0x22a   : > { %vm2509_vm7 = vcmp.eq.s32.totalorder %v2141_v0, %v4769_v24  ;;  %vm2510_vm3 = vcmp.eq.s32.totalorder %v2141_v0, %v4778_v8  ;;  %v4107_v16 = vsel %vm962_vm10, 1.0, %v8322_v4  ;;  %v4108_v34 = vsel %vm963_vm11, 1.0, %v8322_v4 }
 0x22b   : > { %v4303_v18 = vsel %vm2509_vm7, 1.0, %v8322_v4  ;;  %v4304_v36 = vsel %vm2510_vm3, 1.0, %v8322_v4  ;;  %v4077_v22 = vsel %vm932_vm12, 1.0, %v8322_v4  ;;  %v4078_v3 = vsel %vm933_vm13, 1.0, %v8322_v4 }
 0x22c   : > { %v7441_v28 = vadd.f32 %v4303_v18, %v3283_v26  ;;  %v7443_v57 = vadd.f32 %v4304_v36, %v3290_v48  ;;  %v1638_v52 = vadd.f32 %v4137_v6, %v7366_v53  ;;  %v1645_v44 = vadd.f32 %v4138_v13, %v7369_v37  ;;  %v8493_v48 = vld [vmem:[#allocation47_spill] sm:$0xff] }
 0x22d   : > { %v2267_v49 = vpop.permute.xlu1 %2266  ;;  %v7453_v40 = vpop.permute.xlu0 %2203  ;;  %vm2449_vm1 = vcmp.eq.s32.totalorder %v7407_v51, %v4769_v24  ;;  %vm2450_vm4 = vcmp.eq.s32.totalorder %v7407_v51, %v4778_v8  ;;  %v1651_v7 = vadd.f32 %v4107_v16, %v7300_v10  ;;  %v1658_v26 = vadd.f32 %v4108_v34, %v7317_v9 }
 0x22e   : > { %vm2569_vm14 = vcmp.eq.s32.totalorder %v2267_v49, %v4769_v24  ;;  %vm2570_vm0 = vcmp.eq.s32.totalorder %v2267_v49, %v4778_v8  ;;  %v1664_v45 = vadd.f32 %v4077_v22, %v8493_v48  ;;  %v1751_v51 = vadd.f32 %v7374_v41, %v1638_v52  ;;  %v8495_v49 = vld [vmem:[#allocation40_spill] sm:$0xff] }
 0x22f   : > { %v4363_v30 = vsel %vm2569_vm14, 1.0, %v8322_v4  ;;  %v4364_v5 = vsel %vm2570_vm0, 1.0, %v8322_v4  ;;  %v1772_v39 = vadd.f32 %v7377_v46, %v1645_v44  ;;  %v4243_v35 = vsel %vm2449_vm1, 1.0, %v8322_v4 }
 0x230   : > { %v7465_v12 = vadd.f32 %v4363_v30, %v3257_v31  ;;  %v7467_v11 = vadd.f32 %v4364_v5, %v3264_v23  ;;  %v8494_v31 = vld [vmem:[#allocation48_spill] sm:$0xff]  ;;  %v4244_v10 = vsel %vm2450_vm4, 1.0, %v8322_v4  ;;  %vm2479_vm9 = vcmp.eq.s32.totalorder %v7429_v59, %v4769_v24 }
 0x231   : > { %v7479_v20 = vpop.permute.xlu1 %600  ;;  %v2330_v42 = vpop.permute.xlu0 %2329  ;;  %v1671_v23 = vadd.f32 %v4078_v3, %v8494_v31  ;;  %vm2480_vm10 = vcmp.eq.s32.totalorder %v7429_v59, %v4778_v8  ;;  %vm876_vm11 = vcmp.eq.s32.totalorder %v8495_v49, %v4769_v24  ;;  %vm877_vm12 = vcmp.eq.s32.totalorder %v8495_v49, %v4778_v8  ;;  %v8496_v31 = vld [vmem:[#allocation55_spill] sm:$0xff] }
 0x232   : > { %vm2599_vm2 = vcmp.eq.s32.totalorder %v2330_v42, %v4769_v24  ;;  %vm2600_vm5 = vcmp.eq.s32.totalorder %v2330_v42, %v4778_v8  ;;  %v3310_v30 = vadd.f32 %v4243_v35, %v7387_v17  ;;  %v3317_v5 = vadd.f32 %v4244_v10, %v7389_v58 }
 0x233   : > { %v4393_v53 = vsel %vm2599_vm2, 1.0, %v8322_v4  ;;  %v4394_v37 = vsel %vm2600_vm5, 1.0, %v8322_v4  ;;  %v4273_v22 = vsel %vm2479_vm9, 1.0, %v8322_v4  ;;  %v4274_v3 = vsel %vm2480_vm10, 1.0, %v8322_v4 }
 0x234   : > { %v3245_v60 = vadd.f32 %v4393_v53, %v3244_v62  ;;  %v3252_v56 = vadd.f32 %v4394_v37, %v3251_v43 }
 0x235   : > { %v727_v54 = vpop.permute.xlu1 %726  ;;  %v664_v9 = vpop.permute.xlu0 %663 }
 0x236   : > { %v7497_v61 = vadd.f32 %v3357_v47, %v3245_v60  ;;  %v7499_v50 = vadd.f32 %v3378_v27, %v3252_v56  ;;  %vm994_vm6 = vcmp.eq.s32.totalorder %v727_v54, %v4769_v24  ;;  %vm995_vm7 = vcmp.eq.s32.totalorder %v727_v54, %v4778_v8 }
 0x237   : > { %v4139_v29 = vsel %vm994_vm6, 1.0, %v8322_v4  ;;  %v4140_v41 = vsel %vm995_vm7, 1.0, %v8322_v4  ;;  %vm964_vm3 = vcmp.eq.s32.totalorder %v664_v9, %v4769_v24  ;;  %vm965_vm8 = vcmp.eq.s32.totalorder %v664_v9, %v4778_v8  ;;  %v8497_v9 = vld [vmem:[#allocation15_spill] sm:$0xff] }
 0x238   : > { %v1652_v46 = vadd.f32 %v4139_v29, %v1651_v7  ;;  %v1659_v0 = vadd.f32 %v4140_v41, %v1658_v26  ;;  %v4109_v25 = vsel %vm964_vm3, 1.0, %v8322_v4  ;;  %v4110_v1 = vsel %vm965_vm8, 1.0, %v8322_v4  ;;  %v8498_v41 = vld [vmem:[#allocation16_spill] sm:$0xff] }
 0x239   : > { %v7513_v18 = vadd.f32 %v4109_v25, %v1664_v45  ;;  %v7515_v36 = vadd.f32 %v4110_v1, %v1671_v23  ;;  %v1956_v62 = vpop.permute.xlu1 %1955  ;;  %v1889_v43 = vpop.permute.xlu0 %1888  ;;  %vm902_vm7 = vcmp.eq.s32.totalorder %v8496_v31, %v4769_v24  ;;  %vm903_vm3 = vcmp.eq.s32.totalorder %v8496_v31, %v4778_v8  ;;  %v8506_v31 = vld [vmem:[#allocation57_spill] sm:$0xff] }
 0x23a   : > { %v7521_v6 = vadd.f32 %v1751_v51, %v1652_v46  ;;  %v7523_v13 = vadd.f32 %v1772_v39, %v1659_v0  ;;  %vm2421_vm13 = vcmp.eq.s32.totalorder %v1956_v62, %v4769_v24  ;;  %vm2422_vm14 = vcmp.eq.s32.totalorder %v1956_v62, %v4778_v8 }
 0x23b   : > { %v4215_v47 = vsel %vm2421_vm13, 1.0, %v8322_v4  ;;  %v4216_v27 = vsel %vm2422_vm14, 1.0, %v8322_v4  ;;  %vm2389_vm0 = vcmp.eq.s32.totalorder %v1889_v43, %v4769_v24  ;;  %vm2390_vm1 = vcmp.eq.s32.totalorder %v1889_v43, %v4778_v8  ;;  %v8499_v43 = vld [vmem:[#allocation17_spill] sm:$0xff] }
 0x23c   : > { %v4183_v16 = vsel %vm2389_vm0, 1.0, %v8322_v4  ;;  %v4184_v34 = vsel %vm2390_vm1, 1.0, %v8322_v4  ;;  %v3297_v23 = vadd.f32 %v4273_v22, %v7400_v63  ;;  %v3304_v60 = vadd.f32 %v4274_v3, %v7403_v21  ;;  %v8502_v22 = vld [vmem:[#allocation26_spill] sm:$0xff] }
 0x23d   : > { %v7543_v52 = vadd.f32 %v4215_v47, %v4183_v16  ;;  %v7545_v44 = vadd.f32 %v4216_v27, %v4184_v34  ;;  %v2082_v17 = vpop.permute.xlu1 %2081  ;;  %v2019_v58 = vpop.permute.xlu0 %2018  ;;  %v7591_v29 = vadd.f32 %v7024_v38, %v8497_v9  ;;  %v7595_v46 = vadd.f32 %v7314_v14, %v8498_v41  ;;  %v8500_v47 = vld [vmem:[#allocation18_spill] sm:$0xff]  ;;  %v8501_v16 = vld [vmem:[#allocation25_spill] sm:$0xff] }
 0x23e   : > { %vm2481_vm4 = vcmp.eq.s32.totalorder %v2082_v17, %v4769_v24  ;;  %vm2482_vm2 = vcmp.eq.s32.totalorder %v2082_v17, %v4778_v8  ;;  %vm2451_vm5 = vcmp.eq.s32.totalorder %v2019_v58, %v4769_v24  ;;  %vm2452_vm6 = vcmp.eq.s32.totalorder %v2019_v58, %v4778_v8 }
 0x23f   : > { %v4275_v42 = vsel %vm2481_vm4, 1.0, %v8322_v4  ;;  %v4276_v7 = vsel %vm2482_vm2, 1.0, %v8322_v4  ;;  %v4245_v59 = vsel %vm2451_vm5, 1.0, %v8322_v4  ;;  %v4246_v26 = vsel %vm2452_vm6, 1.0, %v8322_v4 }
 0x240   : > { %v7555_v53 = vadd.f32 %v4275_v42, %v3310_v30  ;;  %v7557_v37 = vadd.f32 %v4276_v7, %v3317_v5  ;;  %v7560_v48 = vadd.f32 %v4245_v59, %v7425_v19  ;;  %v7563_v45 = vadd.f32 %v4246_v26, %v7427_v55  ;;  %v8504_v59 = vld [vmem:[#allocation56_spill] sm:$0xff]  ;;  %v8505_v26 = vld [vmem:[#allocation13_spill] sm:$0xff] }
 0x241   : > { %v2208_v56 = vpop.permute.xlu1 %2207  ;;  %v2145_v51 = vpop.permute.xlu0 %2144  ;;  %v4047_v38 = vsel %vm902_vm7, 1.0, %v8322_v4  ;;  %v4048_v14 = vsel %vm903_vm3, 1.0, %v8322_v4  ;;  %vm2412_vm0 = vcmp.eq.s32.totalorder %v6555_v2, %v4778_v8  ;;  %vm906_vm2 = vcmp.eq.s32.totalorder %v8504_v59, %v4769_v24 }
 0x242   : > { %vm2541_vm8 = vcmp.eq.s32.totalorder %v2208_v56, %v4769_v24  ;;  %vm2542_vm9 = vcmp.eq.s32.totalorder %v2208_v56, %v4778_v8  ;;  %vm2511_vm10 = vcmp.eq.s32.totalorder %v2145_v51, %v4769_v24  ;;  %vm2512_vm13 = vcmp.eq.s32.totalorder %v2145_v51, %v4778_v8 }
 0x243   : > { %v4335_v19 = vsel %vm2541_vm8, 1.0, %v8322_v4  ;;  %v4336_v55 = vsel %vm2542_vm9, 1.0, %v8322_v4  ;;  %v4305_v39 = vsel %vm2511_vm10, 1.0, %v8322_v4  ;;  %v4306_v63 = vsel %vm2512_vm13, 1.0, %v8322_v4 }
 0x244   : > { %v7580_v21 = vadd.f32 %v4335_v19, %v7441_v28  ;;  %v7583_v35 = vadd.f32 %v4336_v55, %v7443_v57  ;;  %v7585_v10 = vadd.f32 %v4305_v39, %v3297_v23  ;;  %v7587_v54 = vadd.f32 %v4306_v63, %v3304_v60 }
 0x245   : > { %v4021_v28 = vsel %vm876_vm11, 1.0, %v8322_v4  ;;  %v4022_v57 = vsel %vm877_vm12, 1.0, %v8322_v4  ;;  %v2334_v0 = vpop.permute.xlu1 %2333  ;;  %v7605_v25 = vpop.permute.xlu0 %2270  ;;  %vm2411_vm12 = vcmp.eq.s32.totalorder %v6555_v2, %v4769_v24  ;;  %v7632_v34 = vadd.f32 %v4047_v38, %v8501_v16  ;;  %v8503_v2 = vld [vmem:[#allocation12_spill] sm:$0xff] }
 0x246   : > { %vm2601_vm11 = vcmp.eq.s32.totalorder %v2334_v0, %v4769_v24  ;;  %vm2602_vm14 = vcmp.eq.s32.totalorder %v2334_v0, %v4778_v8  ;;  %v7624_v49 = vadd.f32 %v4021_v28, %v8499_v43  ;;  %v7627_v27 = vadd.f32 %v4022_v57, %v8500_v47 }
 0x247   : > { %v4395_v1 = vsel %vm2601_vm11, 1.0, %v8322_v4  ;;  %v4396_v62 = vsel %vm2602_vm14, 1.0, %v8322_v4  ;;  %v7635_v3 = vadd.f32 %v4048_v14, %v8502_v22  ;;  %vm2379_vm1 = vcmp.eq.s32.totalorder %v8503_v2, %v4769_v24 }
 0x248   : > { %v3259_v30 = vadd.f32 %v4395_v1, %v7465_v12  ;;  %v3266_v5 = vadd.f32 %v4396_v62, %v7467_v11  ;;  %vm2380_vm4 = vcmp.eq.s32.totalorder %v8503_v2, %v4778_v8  ;;  %v4205_v12 = vsel %vm2411_vm12, 1.0, %v8322_v4 }
 0x249   : > { %v7641_v17 = vpop.permute.xlu1 %667  ;;  %v7643_v58 = vpop.permute.xlu0 %604  ;;  %v4206_v11 = vsel %vm2412_vm0, 1.0, %v8322_v4  ;;  %vm907_vm5 = vcmp.eq.s32.totalorder %v8504_v59, %v4778_v8  ;;  %vm2443_vm6 = vcmp.eq.s32.totalorder %v8505_v26, %v4769_v24  ;;  %vm2444_vm7 = vcmp.eq.s32.totalorder %v8505_v26, %v4778_v8  ;;  %v8507_v26 = vld [vmem:[#allocation29_spill] sm:$0xff] }
 0x24a   : > { %v7648_v42 = vadd.f32 %v7497_v61, %v3259_v30  ;;  %v7651_v7 = vadd.f32 %v7499_v50, %v3266_v5  ;;  %vm904_vm3 = vcmp.eq.s32.totalorder %v8506_v31, %v4769_v24  ;;  %vm905_vm8 = vcmp.eq.s32.totalorder %v8506_v31, %v4778_v8  ;;  %v8508_v31 = vld [vmem:[#allocation30_spill] sm:$0xff] }
 0x24b   : > { %v4173_v61 = vsel %vm2379_vm1, 1.0, %v8322_v4  ;;  %v4174_v50 = vsel %vm2380_vm4, 1.0, %v8322_v4  ;;  %vm2475_vm9 = vcmp.eq.s32.totalorder %v7011_v32, %v4769_v24  ;;  %vm2476_vm10 = vcmp.eq.s32.totalorder %v7011_v32, %v4778_v8 }
 0x24c   : > { %v3267_v23 = vadd.f32 %v4205_v12, %v4173_v61  ;;  %v3274_v60 = vadd.f32 %v4206_v11, %v4174_v50  ;;  %v4237_v19 = vsel %vm2443_vm6, 1.0, %v8322_v4  ;;  %v4238_v55 = vsel %vm2444_vm7, 1.0, %v8322_v4 }
 0x24d   : > { %v7671_v56 = vpop.permute.xlu1 %2022  ;;  %v731_v51 = vpop.permute.xlu0 %730  ;;  %vm2507_vm14 = vcmp.eq.s32.totalorder %v7235_v33, %v4769_v24  ;;  %vm2508_vm12 = vcmp.eq.s32.totalorder %v7235_v33, %v4778_v8  ;;  %v4269_v63 = vsel %vm2475_vm9, 1.0, %v8322_v4  ;;  %v4270_v9 = vsel %vm2476_vm10, 1.0, %v8322_v4 }
 0x24e   : > { %vm996_vm13 = vcmp.eq.s32.totalorder %v731_v51, %v4769_v24  ;;  %vm997_vm11 = vcmp.eq.s32.totalorder %v731_v51, %v4778_v8  ;;  %v3268_v57 = vadd.f32 %v4237_v19, %v3267_v23  ;;  %v3275_v0 = vadd.f32 %v4238_v55, %v3274_v60 }
 0x24f   : > { %v4141_v39 = vsel %vm996_vm13, 1.0, %v8322_v4  ;;  %v4142_v32 = vsel %vm997_vm11, 1.0, %v8322_v4  ;;  %vm2539_vm0 = vcmp.eq.s32.totalorder %v7453_v40, %v4769_v24  ;;  %vm2540_vm1 = vcmp.eq.s32.totalorder %v7453_v40, %v4778_v8 }
 0x250   : > { %v1666_v41 = vadd.f32 %v4141_v39, %v7513_v18  ;;  %v1673_v28 = vadd.f32 %v4142_v32, %v7515_v36  ;;  %v4301_v14 = vsel %vm2507_vm14, 1.0, %v8322_v4  ;;  %v4302_v1 = vsel %vm2508_vm12, 1.0, %v8322_v4 }
 0x251   : > { %v7691_v33 = vpop.permute.xlu1 %2148  ;;  %v7693_v38 = vpop.permute.xlu0 %2085  ;;  %v3269_v62 = vadd.f32 %v4269_v63, %v3268_v57  ;;  %v3276_v43 = vadd.f32 %v4270_v9, %v3275_v0  ;;  %vm2571_vm4 = vcmp.eq.s32.totalorder %v7605_v25, %v4769_v24  ;;  %vm2572_vm6 = vcmp.eq.s32.totalorder %v7605_v25, %v4778_v8 }
 0x252   : > { %v7698_v18 = vadd.f32 %v7521_v6, %v1666_v41  ;;  %v7701_v36 = vadd.f32 %v7523_v13, %v1673_v28  ;;  %v4049_v40 = vsel %vm904_vm3, 1.0, %v8322_v4  ;;  %v4050_v6 = vsel %vm905_vm8, 1.0, %v8322_v4 }
 0x253   : > { %v4333_v13 = vsel %vm2539_vm0, 1.0, %v8322_v4  ;;  %v4334_v47 = vsel %vm2540_vm1, 1.0, %v8322_v4  ;;  %v3270_v30 = vadd.f32 %v4301_v14, %v3269_v62  ;;  %v3277_v5 = vadd.f32 %v4302_v1, %v3276_v43 }
 0x254   : > { %vm934_vm7 = vcmp.eq.s32.totalorder %v7479_v20, %v4769_v24  ;;  %vm935_vm9 = vcmp.eq.s32.totalorder %v7479_v20, %v4778_v8  ;;  %v4051_v22 = vsel %vm906_vm2, 1.0, %v8322_v4  ;;  %v4052_v2 = vsel %vm907_vm5, 1.0, %v8322_v4 }
 0x255   : > { %v7721_v25 = vpop.permute.xlu1 %2274  ;;  %v7723_v16 = vpop.permute.xlu0 %2211  ;;  %v4365_v12 = vsel %vm2571_vm4, 1.0, %v8322_v4  ;;  %v4366_v11 = vsel %vm2572_vm6, 1.0, %v8322_v4  ;;  %v1691_v20 = vadd.f32 %v4049_v40, %v8507_v26  ;;  %v1698_v61 = vadd.f32 %v4050_v6, %v8508_v31  ;;  %v8509_v40 = vld [vmem:[#allocation27_spill] sm:$0xff] }
 0x256   : > { %v3271_v50 = vadd.f32 %v4333_v13, %v3270_v30  ;;  %v3278_v23 = vadd.f32 %v4334_v47, %v3277_v5  ;;  %v4079_v60 = vsel %vm934_vm7, 1.0, %v8322_v4  ;;  %v4080_v51 = vsel %vm935_vm9, 1.0, %v8322_v4  ;;  %v8510_v13 = vld [vmem:[#allocation28_spill] sm:$0xff] }
 0x257   : > { %vm966_vm2 = vcmp.eq.s32.totalorder %v7641_v17, %v4769_v24  ;;  %vm967_vm5 = vcmp.eq.s32.totalorder %v7641_v17, %v4778_v8  ;;  %vm936_vm3 = vcmp.eq.s32.totalorder %v7643_v58, %v4769_v24  ;;  %vm937_vm8 = vcmp.eq.s32.totalorder %v7643_v58, %v4778_v8 }
 0x258   : > { %v3272_v59 = vadd.f32 %v4365_v12, %v3271_v50  ;;  %v3279_v19 = vadd.f32 %v4366_v11, %v3278_v23  ;;  %vm2453_vm10 = vcmp.eq.s32.totalorder %v7671_v56, %v4769_v24  ;;  %vm2454_vm13 = vcmp.eq.s32.totalorder %v7671_v56, %v4778_v8 }
 0x259   : > { %v7747_v55 = vpop.permute.xlu1 %545  ;;  %v2338_v39 = vpop.permute.xlu0 %2337  ;;  %v4111_v17 = vsel %vm966_vm2, 1.0, %v8322_v4  ;;  %v4112_v32 = vsel %vm967_vm5, 1.0, %v8322_v4  ;;  %v4081_v9 = vsel %vm936_vm3, 1.0, %v8322_v4  ;;  %v4082_v41 = vsel %vm937_vm8, 1.0, %v8322_v4 }
 0x25a   : > { %vm2603_vm11 = vcmp.eq.s32.totalorder %v2338_v39, %v4769_v24  ;;  %vm2604_vm14 = vcmp.eq.s32.totalorder %v2338_v39, %v4778_v8  ;;  %v1678_v56 = vadd.f32 %v4079_v60, %v7632_v34  ;;  %v1685_v0 = vadd.f32 %v4080_v51, %v7635_v3 }
 0x25b   : > { %v4397_v63 = vsel %vm2603_vm11, 1.0, %v8322_v4  ;;  %v4398_v58 = vsel %vm2604_vm14, 1.0, %v8322_v4  ;;  %v4247_v14 = vsel %vm2453_vm10, 1.0, %v8322_v4  ;;  %v4248_v1 = vsel %vm2454_vm13, 1.0, %v8322_v4 }
 0x25c   : > { %v3273_v28 = vadd.f32 %v4397_v63, %v3272_v59  ;;  %v3280_v57 = vadd.f32 %v4398_v58, %v3279_v19  ;;  %v7770_v6 = vadd.f32 %v4051_v22, %v8509_v40  ;;  %v7773_v47 = vadd.f32 %v4052_v2, %v8510_v13 }
 0x25d   : > { %v7765_v62 = vpop.permute.xlu1 %671  ;;  %v7767_v43 = vpop.permute.xlu0 %608  ;;  %v1679_v3 = vadd.f32 %v4111_v17, %v1678_v56  ;;  %v1686_v5 = vadd.f32 %v4112_v32, %v1685_v0  ;;  %v7781_v12 = vadd.f32 %v4081_v9, %v1691_v20  ;;  %v7783_v11 = vadd.f32 %v4082_v41, %v1698_v61 }
 0x25e   : > { %v7776_v30 = vadd.f32 %v7648_v42, %v3273_v28  ;;  %v7779_v34 = vadd.f32 %v7651_v7, %v3280_v57  ;;  %v7786_v26 = vadd.f32 %v4247_v14, %v7543_v52  ;;  %v7789_v22 = vadd.f32 %v4248_v1, %v7545_v44 }
 0x25f   : > { %vm2513_vm12 = vcmp.eq.s32.totalorder %v7691_v33, %v4769_v24  ;;  %vm2514_vm0 = vcmp.eq.s32.totalorder %v7691_v33, %v4778_v8  ;;  %vm2483_vm1 = vcmp.eq.s32.totalorder %v7693_v38, %v4769_v24  ;;  %vm2484_vm4 = vcmp.eq.s32.totalorder %v7693_v38, %v4778_v8 }
 0x260   : > { %vm2573_vm6 = vcmp.eq.s32.totalorder %v7721_v25, %v4769_v24  ;;  %vm2574_vm7 = vcmp.eq.s32.totalorder %v7721_v25, %v4778_v8  ;;  %vm2543_vm9 = vcmp.eq.s32.totalorder %v7723_v16, %v4769_v24  ;;  %vm2544_vm2 = vcmp.eq.s32.totalorder %v7723_v16, %v4778_v8 }
 0x261   : > { %v2090_v52 = vpop.permute.xlu1 %2089  ;;  %v735_v44 = vpop.permute.xlu0 %734  ;;  %v4307_v42 = vsel %vm2513_vm12, 1.0, %v8322_v4  ;;  %v4308_v7 = vsel %vm2514_vm0, 1.0, %v8322_v4  ;;  %v4277_v2 = vsel %vm2483_vm1, 1.0, %v8322_v4  ;;  %v4278_v20 = vsel %vm2484_vm4, 1.0, %v8322_v4 }
 0x262   : > { %vm998_vm5 = vcmp.eq.s32.totalorder %v735_v44, %v4769_v24  ;;  %vm999_vm3 = vcmp.eq.s32.totalorder %v735_v44, %v4778_v8  ;;  %v4367_v16 = vsel %vm2573_vm6, 1.0, %v8322_v4  ;;  %v4368_v50 = vsel %vm2574_vm7, 1.0, %v8322_v4 }
 0x263   : > { %v4143_v33 = vsel %vm998_vm5, 1.0, %v8322_v4  ;;  %v4144_v38 = vsel %vm999_vm3, 1.0, %v8322_v4  ;;  %v4337_v23 = vsel %vm2543_vm9, 1.0, %v8322_v4  ;;  %v4338_v60 = vsel %vm2544_vm2, 1.0, %v8322_v4 }
 0x264   : > { %v1680_v31 = vadd.f32 %v4143_v33, %v1679_v3  ;;  %v1687_v61 = vadd.f32 %v4144_v38, %v1686_v5  ;;  %vm908_vm8 = vcmp.eq.s32.totalorder %v7747_v55, %v4769_v24  ;;  %vm909_vm10 = vcmp.eq.s32.totalorder %v7747_v55, %v4778_v8 }
 0x265   : > { %v2216_v51 = vpop.permute.xlu1 %2215  ;;  %v7825_v59 = vpop.permute.xlu0 %2152  ;;  %v3312_v25 = vadd.f32 %v4307_v42, %v7555_v53  ;;  %v3319_v17 = vadd.f32 %v4308_v7, %v7557_v37  ;;  %v7840_v32 = vadd.f32 %v4277_v2, %v7560_v48  ;;  %v7843_v63 = vadd.f32 %v4278_v20, %v7563_v45 }
 0x266   : > { %v7832_v19 = vadd.f32 %v7698_v18, %v1680_v31  ;;  %v7835_v39 = vadd.f32 %v7701_v36, %v1687_v61  ;;  %v3286_v58 = vadd.f32 %v4367_v16, %v7580_v21  ;;  %v3293_v55 = vadd.f32 %v4368_v50, %v7583_v35 }
 0x267   : > { %v7848_v18 = vadd.f32 %v4337_v23, %v7585_v10  ;;  %v7851_v36 = vadd.f32 %v4338_v60, %v7587_v54  ;;  %v4053_v53 = vsel %vm908_vm8, 1.0, %v8322_v4  ;;  %v4054_v37 = vsel %vm909_vm10, 1.0, %v8322_v4 }
 0x268   : > { %vm968_vm13 = vcmp.eq.s32.totalorder %v7765_v62, %v4769_v24  ;;  %vm969_vm11 = vcmp.eq.s32.totalorder %v7765_v62, %v4778_v8  ;;  %vm938_vm14 = vcmp.eq.s32.totalorder %v7767_v43, %v4769_v24  ;;  %vm939_vm12 = vcmp.eq.s32.totalorder %v7767_v43, %v4778_v8 }
 0x269   : > { %v2342_v48 = vpop.permute.xlu1 %2341  ;;  %v2279_v45 = vpop.permute.xlu0 %2278  ;;  %vm2485_vm4 = vcmp.eq.s32.totalorder %v2090_v52, %v4769_v24  ;;  %vm2486_vm6 = vcmp.eq.s32.totalorder %v2090_v52, %v4778_v8  ;;  %vm2545_vm7 = vcmp.eq.s32.totalorder %v2216_v51, %v4769_v24  ;;  %vm2546_vm9 = vcmp.eq.s32.totalorder %v2216_v51, %v4778_v8 }
 0x26a   : > { %vm2605_vm0 = vcmp.eq.s32.totalorder %v2342_v48, %v4769_v24  ;;  %vm2606_vm1 = vcmp.eq.s32.totalorder %v2342_v48, %v4778_v8  ;;  %v4113_v9 = vsel %vm968_vm13, 1.0, %v8322_v4  ;;  %v4114_v41 = vsel %vm969_vm11, 1.0, %v8322_v4 }
 0x26b   : > { %v4399_v21 = vsel %vm2605_vm0, 1.0, %v8322_v4  ;;  %v4400_v35 = vsel %vm2606_vm1, 1.0, %v8322_v4  ;;  %v4083_v28 = vsel %vm938_vm14, 1.0, %v8322_v4  ;;  %v4084_v57 = vsel %vm939_vm12, 1.0, %v8322_v4 }
 0x26c   : > { %v3287_v10 = vadd.f32 %v4399_v21, %v3286_v58  ;;  %v3294_v54 = vadd.f32 %v4400_v35, %v3293_v55  ;;  %v4279_v14 = vsel %vm2485_vm4, 1.0, %v8322_v4  ;;  %v4280_v1 = vsel %vm2486_vm6, 1.0, %v8322_v4 }
 0x26d   : > { %v613_v56 = vpop.permute.xlu1 %612  ;;  %v550_v0 = vpop.permute.xlu0 %549  ;;  %v1719_v13 = vadd.f32 %v4053_v53, %v7624_v49  ;;  %v1726_v62 = vadd.f32 %v4054_v37, %v7627_v27  ;;  %v4339_v3 = vsel %vm2545_vm7, 1.0, %v8322_v4  ;;  %v4340_v5 = vsel %vm2546_vm9, 1.0, %v8322_v4 }
 0x26e   : > { %v7884_v43 = vadd.f32 %v7776_v30, %v3287_v10  ;;  %v7887_v40 = vadd.f32 %v7779_v34, %v3294_v54  ;;  %v1693_v52 = vadd.f32 %v4113_v9, %v7781_v12  ;;  %v1700_v30 = vadd.f32 %v4114_v41, %v7783_v11 }
 0x26f   : > { %v1706_v44 = vadd.f32 %v4083_v28, %v7770_v6  ;;  %v1713_v34 = vadd.f32 %v4084_v57, %v7773_v47  ;;  %v7902_v49 = vadd.f32 %v4279_v14, %v7786_v26  ;;  %v7905_v27 = vadd.f32 %v4280_v1, %v7789_v22 }
 0x270   : > { %vm2515_vm2 = vcmp.eq.s32.totalorder %v7825_v59, %v4769_v24  ;;  %vm2516_vm5 = vcmp.eq.s32.totalorder %v7825_v59, %v4778_v8  ;;  %v7911_v7 = vadd.f32 %v4339_v3, %v3312_v25  ;;  %v7913_v11 = vadd.f32 %v4340_v5, %v3319_v17 }
 0x271   : > { %v739_v42 = vpop.permute.xlu1 %738  ;;  %v676_v12 = vpop.permute.xlu0 %675  ;;  %vm2575_vm3 = vcmp.eq.s32.totalorder %v2279_v45, %v4769_v24  ;;  %vm2576_vm8 = vcmp.eq.s32.totalorder %v2279_v45, %v4778_v8  ;;  %vm940_vm10 = vcmp.eq.s32.totalorder %v613_v56, %v4769_v24  ;;  %vm941_vm13 = vcmp.eq.s32.totalorder %v613_v56, %v4778_v8 }
 0x272   : > { %vm910_vm11 = vcmp.eq.s32.totalorder %v550_v0, %v4769_v24  ;;  %vm911_vm14 = vcmp.eq.s32.totalorder %v550_v0, %v4778_v8  ;;  %v4309_v6 = vsel %vm2515_vm2, 1.0, %v8322_v4  ;;  %v4310_v47 = vsel %vm2516_vm5, 1.0, %v8322_v4 }
 0x273   : > { %vm1000_vm12 = vcmp.eq.s32.totalorder %v739_v42, %v4769_v24  ;;  %vm1001_vm0 = vcmp.eq.s32.totalorder %v739_v42, %v4778_v8  ;;  %v4369_v26 = vsel %vm2575_vm3, 1.0, %v8322_v4  ;;  %v4370_v22 = vsel %vm2576_vm8, 1.0, %v8322_v4 }
 0x274   : > { %vm970_vm1 = vcmp.eq.s32.totalorder %v676_v12, %v4769_v24  ;;  %vm971_vm4 = vcmp.eq.s32.totalorder %v676_v12, %v4778_v8  ;;  %v4085_v2 = vsel %vm940_vm10, 1.0, %v8322_v4  ;;  %v4086_v20 = vsel %vm941_vm13, 1.0, %v8322_v4 }
 0x275   : > { %v2220_v33 = vpop.permute.xlu1 %2219  ;;  %v2157_v38 = vpop.permute.xlu0 %2156  ;;  %v4055_v31 = vsel %vm910_vm11, 1.0, %v8322_v4  ;;  %v4056_v61 = vsel %vm911_vm14, 1.0, %v8322_v4  ;;  %v3326_v16 = vadd.f32 %v4309_v6, %v7840_v32  ;;  %v3333_v50 = vadd.f32 %v4310_v47, %v7843_v63 }
 0x276   : > { %v4145_v23 = vsel %vm1000_vm12, 1.0, %v8322_v4  ;;  %v4146_v60 = vsel %vm1001_vm0, 1.0, %v8322_v4  ;;  %v3300_v51 = vadd.f32 %v4369_v26, %v7848_v18  ;;  %v3307_v59 = vadd.f32 %v4370_v22, %v7851_v36 }
 0x277   : > { %v4115_v25 = vsel %vm970_vm1, 1.0, %v8322_v4  ;;  %v4116_v17 = vsel %vm971_vm4, 1.0, %v8322_v4  ;;  %v1720_v58 = vadd.f32 %v4085_v2, %v1719_v13  ;;  %v1727_v55 = vadd.f32 %v4086_v20, %v1726_v62 }
 0x278   : > { %v1733_v53 = vadd.f32 %v4055_v31, %v7591_v29  ;;  %v1740_v32 = vadd.f32 %v4056_v61, %v7595_v46  ;;  %v1694_v48 = vadd.f32 %v4145_v23, %v1693_v52  ;;  %v1701_v45 = vadd.f32 %v4146_v60, %v1700_v30 }
 0x279   : > { %v2346_v37 = vpop.permute.xlu1 %2345  ;;  %v2283_v63 = vpop.permute.xlu0 %2282  ;;  %v1707_v18 = vadd.f32 %v4115_v25, %v1706_v44  ;;  %v1714_v36 = vadd.f32 %v4116_v17, %v1713_v34  ;;  %vm2547_vm9 = vcmp.eq.s32.totalorder %v2220_v33, %v4769_v24  ;;  %vm2548_vm2 = vcmp.eq.s32.totalorder %v2220_v33, %v4778_v8 }
 0x27a   : > { %vm2607_vm6 = vcmp.eq.s32.totalorder %v2346_v37, %v4769_v24  ;;  %vm2608_vm7 = vcmp.eq.s32.totalorder %v2346_v37, %v4778_v8  ;;  %vm2517_vm5 = vcmp.eq.s32.totalorder %v2157_v38, %v4769_v24  ;;  %vm2518_vm3 = vcmp.eq.s32.totalorder %v2157_v38, %v4778_v8 }
 0x27b   : > { %v4401_v21 = vsel %vm2607_vm6, 1.0, %v8322_v4  ;;  %v4402_v35 = vsel %vm2608_vm7, 1.0, %v8322_v4  ;;  %vm2577_vm8 = vcmp.eq.s32.totalorder %v2283_v63, %v4769_v24  ;;  %vm2578_vm10 = vcmp.eq.s32.totalorder %v2283_v63, %v4778_v8 }
 0x27c   : > { %v3301_v29 = vadd.f32 %v4401_v21, %v3300_v51  ;;  %v3308_v46 = vadd.f32 %v4402_v35, %v3307_v59  ;;  %v1755_v28 = vadd.f32 %v7832_v19, %v1694_v48  ;;  %v1776_v57 = vadd.f32 %v7835_v39, %v1701_v45 }
 0x27d   : > { %v680_v10 = vpop.permute.xlu1 %679  ;;  %v617_v54 = vpop.permute.xlu0 %616  ;;  %v4341_v56 = vsel %vm2547_vm9, 1.0, %v8322_v4  ;;  %v4342_v0 = vsel %vm2548_vm2, 1.0, %v8322_v4  ;;  %v4311_v14 = vsel %vm2517_vm5, 1.0, %v8322_v4  ;;  %v4312_v19 = vsel %vm2518_vm3, 1.0, %v8322_v4 }
 0x27e   : > { %v3362_v9 = vadd.f32 %v7884_v43, %v3301_v29  ;;  %v3383_v41 = vadd.f32 %v7887_v40, %v3308_v46  ;;  %vm972_vm13 = vcmp.eq.s32.totalorder %v680_v10, %v4769_v24  ;;  %vm973_vm11 = vcmp.eq.s32.totalorder %v680_v10, %v4778_v8 }
 0x27f   : > { %vm942_vm14 = vcmp.eq.s32.totalorder %v617_v54, %v4769_v24  ;;  %vm943_vm12 = vcmp.eq.s32.totalorder %v617_v54, %v4778_v8  ;;  %v4371_v39 = vsel %vm2577_vm8, 1.0, %v8322_v4  ;;  %v4372_v1 = vsel %vm2578_vm10, 1.0, %v8322_v4 }
 0x280   : > { %v4117_v43 = vsel %vm972_vm13, 1.0, %v8322_v4  ;;  %v4118_v40 = vsel %vm973_vm11, 1.0, %v8322_v4  ;;  %v4087_v3 = vsel %vm942_vm14, 1.0, %v8322_v4  ;;  %v4088_v5 = vsel %vm943_vm12, 1.0, %v8322_v4 }
 0x281   : > { %v2224_v13 = vpop.permute.xlu1 %2223  ;;  %v743_v62 = vpop.permute.xlu0 %742  ;;  %v3327_v52 = vadd.f32 %v4341_v56, %v3326_v16  ;;  %v3334_v30 = vadd.f32 %v4342_v0, %v3333_v50  ;;  %v3340_v44 = vadd.f32 %v4311_v14, %v7902_v49  ;;  %v3347_v34 = vadd.f32 %v4312_v19, %v7905_v27 }
 0x282   : > { %vm1002_vm0 = vcmp.eq.s32.totalorder %v743_v62, %v4769_v24  ;;  %vm1003_vm1 = vcmp.eq.s32.totalorder %v743_v62, %v4778_v8  ;;  %v3314_v42 = vadd.f32 %v4371_v39, %v7911_v7  ;;  %v3321_v12 = vadd.f32 %v4372_v1, %v7913_v11 }
 0x283   : > { %v1721_v6 = vadd.f32 %v4117_v43, %v1720_v58  ;;  %v1728_v47 = vadd.f32 %v4118_v40, %v1727_v55  ;;  %v1734_v26 = vadd.f32 %v4087_v3, %v1733_v53  ;;  %v1741_v22 = vadd.f32 %v4088_v5, %v1740_v32 }
 0x284   : > { %v4147_v33 = vsel %vm1002_vm0, 1.0, %v8322_v4  ;;  %v4148_v38 = vsel %vm1003_vm1, 1.0, %v8322_v4  ;;  %vm2549_vm4 = vcmp.eq.s32.totalorder %v2224_v13, %v4769_v24  ;;  %vm2550_vm6 = vcmp.eq.s32.totalorder %v2224_v13, %v4778_v8 }
 0x285   : > { %v2350_v2 = vpop.permute.xlu1 %2349  ;;  %v2287_v20 = vpop.permute.xlu0 %2286  ;;  %v1708_v7 = vadd.f32 %v4147_v33, %v1707_v18  ;;  %v1715_v11 = vadd.f32 %v4148_v38, %v1714_v36  ;;  %v4343_v16 = vsel %vm2549_vm4, 1.0, %v8322_v4  ;;  %v4344_v50 = vsel %vm2550_vm6, 1.0, %v8322_v4 }
 0x286   : > { %vm2609_vm7 = vcmp.eq.s32.totalorder %v2350_v2, %v4769_v24  ;;  %vm2610_vm9 = vcmp.eq.s32.totalorder %v2350_v2, %v4778_v8  ;;  %vm2579_vm2 = vcmp.eq.s32.totalorder %v2287_v20, %v4769_v24  ;;  %vm2580_vm5 = vcmp.eq.s32.totalorder %v2287_v20, %v4778_v8 }
 0x287   : > { %v4403_v49 = vsel %vm2609_vm7, 1.0, %v8322_v4  ;;  %v4404_v27 = vsel %vm2610_vm9, 1.0, %v8322_v4  ;;  %v4373_v23 = vsel %vm2579_vm2, 1.0, %v8322_v4  ;;  %v4374_v60 = vsel %vm2580_vm5, 1.0, %v8322_v4 }
 0x288   : > { %v3315_v31 = vadd.f32 %v4403_v49, %v3314_v42  ;;  %v3322_v61 = vadd.f32 %v4404_v27, %v3321_v12  ;;  %v3341_v53 = vadd.f32 %v4343_v16, %v3340_v44  ;;  %v3348_v32 = vadd.f32 %v4344_v50, %v3347_v34 }
 0x289   : > { %v747_v51 = vpop.permute.xlu1 %746  ;;  %v684_v59 = vpop.permute.xlu0 %683  ;;  %v1756_v37 = vadd.f32 %v1755_v28, %v1708_v7  ;;  %v1777_v63 = vadd.f32 %v1776_v57, %v1715_v11  ;;  %v3328_v48 = vadd.f32 %v4373_v23, %v3327_v52  ;;  %v3335_v45 = vadd.f32 %v4374_v60, %v3334_v30 }
 0x28a   : > { %v3363_v25 = vadd.f32 %v3362_v9, %v3315_v31  ;;  %v3384_v17 = vadd.f32 %v3383_v41, %v3322_v61  ;;  %vm1004_vm3 = vcmp.eq.s32.totalorder %v747_v51, %v4769_v24  ;;  %vm1005_vm8 = vcmp.eq.s32.totalorder %v747_v51, %v4778_v8 }
 0x28b   : > { %v4149_v58 = vsel %vm1004_vm3, 1.0, %v8322_v4  ;;  %v4150_v55 = vsel %vm1005_vm8, 1.0, %v8322_v4  ;;  %vm974_vm10 = vcmp.eq.s32.totalorder %v684_v59, %v4769_v24  ;;  %vm975_vm13 = vcmp.eq.s32.totalorder %v684_v59, %v4778_v8 }
 0x28c   : > { %v1722_v18 = vadd.f32 %v4149_v58, %v1721_v6  ;;  %v1729_v36 = vadd.f32 %v4150_v55, %v1728_v47  ;;  %v4119_v29 = vsel %vm974_vm10, 1.0, %v8322_v4  ;;  %v4120_v46 = vsel %vm975_vm13, 1.0, %v8322_v4 }
 0x28d   : > { %v2354_v21 = vpop.permute.xlu1 %2353  ;;  %v2291_v35 = vpop.permute.xlu0 %2290  ;;  %v1735_v56 = vadd.f32 %v4119_v29, %v1734_v26  ;;  %v1742_v0 = vadd.f32 %v4120_v46, %v1741_v22  ;;  %v4474_v49 = vmov 1966171168   ;;  %v1810_v46 = vld [vmem:[#allocation3] sm:$0x3]  ;;  %vm3429_vm9 = vcmask 1040384  }
 0x28e   : > { %vm2611_vm11 = vcmp.eq.s32.totalorder %v2354_v21, %v4769_v24  ;;  %vm2612_vm14 = vcmp.eq.s32.totalorder %v2354_v21, %v4778_v8  ;;  %vm2581_vm12 = vcmp.eq.s32.totalorder %v2291_v35, %v4769_v24  ;;  %vm2582_vm0 = vcmp.eq.s32.totalorder %v2291_v35, %v4778_v8 }
 0x28f   : > { %v4405_v10 = vsel %vm2611_vm11, 1.0, %v8322_v4  ;;  %v4406_v54 = vsel %vm2612_vm14, 1.0, %v8322_v4  ;;  %v4375_v28 = vsel %vm2581_vm12, 1.0, %v8322_v4  ;;  %v4376_v57 = vsel %vm2582_vm0, 1.0, %v8322_v4 }
 0x290   : > { %v3329_v9 = vadd.f32 %v4405_v10, %v3328_v48  ;;  %v3336_v41 = vadd.f32 %v4406_v54, %v3335_v45  ;;  %v3342_v14 = vadd.f32 %v4375_v28, %v3341_v53  ;;  %v3349_v19 = vadd.f32 %v4376_v57, %v3348_v32 }
 0x291   : > { %v2358_v39 = vpop.permute.xlu1 %2357  ;;  %v751_v1 = vpop.permute.xlu0 %750  ;;  %v1757_v44 = vadd.f32 %v1756_v37, %v1722_v18  ;;  %v1778_v34 = vadd.f32 %v1777_v63, %v1729_v36  ;;  %v1790_v27 = vunpack.c.l.s4 %v4474_v49  ;;  %v8511_v37 = vld [vmem:[#allocation4_spill] sm:$0xff] }
 0x292   : > { %v3364_v43 = vadd.f32 %v3363_v25, %v3329_v9  ;;  %v3385_v40 = vadd.f32 %v3384_v17, %v3336_v41  ;;  %vm2613_vm1 = vcmp.eq.s32.totalorder %v2358_v39, %v4769_v24  ;;  %vm2614_vm4 = vcmp.eq.s32.totalorder %v2358_v39, %v4778_v8  ;;  %v200_v9 = vld [vmem:[#allocation2] sm:$0x3] }
 0x293   : > { %v4407_v13 = vsel %vm2613_vm1, 1.0, %v8322_v4  ;;  %v4408_v62 = vsel %vm2614_vm4, 1.0, %v8322_v4  ;;  %vm1006_vm6 = vcmp.eq.s32.totalorder %v751_v1, %v4769_v24  ;;  %vm1007_vm7 = vcmp.eq.s32.totalorder %v751_v1, %v4778_v8 }
 0x294   : > { %v3343_v3 = vadd.f32 %v4407_v13, %v3342_v14  ;;  %v3350_v5 = vadd.f32 %v4408_v62, %v3349_v19  ;;  %v4151_v52 = vsel %vm1006_vm6, 1.0, %v8322_v4  ;;  %v4152_v30 = vsel %vm1007_vm7, 1.0, %v8322_v4  ;;  %v8513_v19 = vld [vmem:[#allocation6_spill] sm:$0xff] }
 0x295   : > { %v1736_v42 = vadd.f32 %v4151_v52, %v1735_v56  ;;  %v1743_v12 = vadd.f32 %v4152_v30, %v1742_v0  ;;  %v1791_v60 = vunpack.c.0.s8 %v1790_v27  ;;  %v8512_v0 = vld [vmem:[#allocation5_spill] sm:$0xff]  ;;  %vm3505_vm2 = vcmp.le.s32.totalorder %v4769_v24, %v8511_v37 }
 0x296   : > { %v3365_v6 = vadd.f32 %v3364_v43, %v3343_v3  ;;  %v3386_v47 = vadd.f32 %v3385_v40, %v3350_v5 }
 0x297   : > { %v1758_v26 = vadd.f32 %v1757_v44, %v1736_v42  ;;  %v1779_v22 = vadd.f32 %v1778_v34, %v1743_v12  ;;  %v1794_v63 = vsub.s32 %v1791_v60, %v8511_v37  ;;  %v3474_v60 = vadd.s32 8, %v8511_v37 }
 0x298   : > { %v3366_v33 = vrot.slane %v3365_v6, 4  ;;  %v3387_v38 = vrot.slane %v3386_v47, 4 }
 0x299   : > { %v1759_v2 = vrot.slane %v1758_v26, 4  ;;  %v1780_v20 = vrot.slane %v1779_v22, 4  ;;  %vm3507_vm3 = vcmp.le.s32.totalorder %v4769_v24, %v3474_v60  ;;  %v3500_v60 = vadd.s32 216, %v8511_v37 }
 0x29a   : > { %v3367_v7 = vadd.f32 %v3366_v33, %v3365_v6  ;;  %v3388_v11 = vadd.f32 %v3387_v38, %v3386_v47 }
 0x29b   : > { %v1760_v31 = vadd.f32 %v1759_v2, %v1758_v26  ;;  %v1781_v61 = vadd.f32 %v1780_v20, %v1779_v22 }
 0x29c   : > { %v3368_v16 = vrot.slane %v3367_v7, 2  ;;  %v3389_v4 = vrot.slane %v3388_v11, 2 }
 0x29d   : > { %v1761_v50 = vrot.slane %v1760_v31, 2  ;;  %v1782_v23 = vrot.slane %v1781_v61, 2 }
 0x29e   : > { %v3369_v51 = vadd.f32 %v3368_v16, %v3367_v7  ;;  %v3390_v59 = vadd.f32 %v3389_v4, %v3388_v11  ;;  %v3475_v16 = vadd.s32 16, %v8511_v37 }
 0x29f   : > { %v1762_v25 = vadd.f32 %v1761_v50, %v1760_v31  ;;  %v1783_v17 = vadd.f32 %v1782_v23, %v1781_v61  ;;  %v3477_v23 = vadd.s32 32, %v8511_v37 }
 0x2a0   : > { %v3370_v58 = vrot.slane %v3369_v51, 1  ;;  %v3391_v55 = vrot.slane %v3390_v59, 1 }
 0x2a1   : > { %v1763_v53 = vrot.slane %v1762_v25, 1  ;;  %v1784_v32 = vrot.slane %v1783_v17, 1  ;;  %vm3513_vm5 = vcmp.le.s32.totalorder %v4769_v24, %v3477_v23  ;;  %v3503_v23 = vadd.s32 240, %v8511_v37 }
 0x2a2   : > { %v3371_v48 = vadd.f32 %v3370_v58, %v3369_v51  ;;  %v3392_v45 = vadd.f32 %v3391_v55, %v3390_v59  ;;  %v3476_v58 = vadd.s32 24, %v8511_v37 }
 0x2a3   : > { %v1764_v18 = vadd.f32 %v1763_v53, %v1762_v25  ;;  %v1785_v36 = vadd.f32 %v1784_v32, %v1783_v17  ;;  %v3479_v17 = vadd.s32 48, %v8511_v37  ;;  %v3481_v32 = vadd.s32 64, %v8511_v37 }
 0x2a4   : > { %v3395_v21 = vcombine.low %v3371_v48, %v3392_v45  ;;  %vm3511_vm10 = vcmp.le.s32.totalorder %v4769_v24, %v3476_v58 }
 0x2a5   : > { %v1788_v35 = vcombine.low %v1764_v18, %v1785_v36  ;;  %vm3517_vm8 = vcmp.le.s32.totalorder %v4769_v24, %v3479_v17  ;;  %vm3521_vm13 = vcmp.le.s32.totalorder %v4769_v24, %v3481_v32  ;;  %v3483_v18 = vadd.s32 80, %v8511_v37 }
 0x2a6   : > { %v3402_v29 = vrot.slane %v3395_v21, %v1794_v63  ;;  %v3480_v36 = vadd.s32 56, %v8511_v37 }
 0x2a7   : > { %v1795_v10 = vrot.slane %v1788_v35, %v1794_v63  ;;  %vm3525_vm14 = vcmp.le.s32.totalorder %v4769_v24, %v3483_v18 }
 0x2a8   : > { %v3409_v54 = vrot.slane %v3402_v29, %v1794_v63  ;;  %vm3519_vm12 = vcmp.le.s32.totalorder %v4769_v24, %v3480_v36  ;;  %v3485_v29 = vadd.s32 96, %v8511_v37 }
 0x2a9   : > { %v1802_v41 = vrot.slane %v1795_v10, %v1794_v63  ;;  %v3478_v63 = vadd.s32 40, %v8511_v37 }
 0x2aa   : > { %v3411_v28 = vadd.f32 %v3409_v54, %v1810_v46  ;;  %v3482_v46 = vadd.s32 72, %v8511_v37  ;;  %vm3529_vm0 = vcmp.le.s32.totalorder %v4769_v24, %v3485_v29 }
 0x2ab   : > { %v1804_v57 = vadd.f32 %v1802_v41, %v200_v9  ;;  %vm3515_vm11 = vcmp.le.s32.totalorder %v4769_v24, %v3478_v63  ;;  %v3487_v9 = vadd.s32 112, %v8511_v37  ;;  %v3484_v41 = vadd.s32 88, %v8511_v37 }
 0x2ac   : > { %3412 = vst.msk [vmem:[#allocation3] sm:$0x3] %vm7238_vm15, %v3411_v28  ;;  %vm3523_vm1 = vcmp.le.s32.totalorder %v4769_v24, %v3482_v46  ;;  %v3489_v28 = vadd.s32 128, %v8511_v37 }
 0x2ad   : > { %1809 = vst.msk [vmem:[#allocation2] sm:$0x3] %vm7238_vm15, %v1804_v57  ;;  %vm3509_vm15 = vcmp.le.s32.totalorder %v4769_v24, %v3475_v16  ;;  %vm3533_vm4 = vcmp.le.s32.totalorder %v4769_v24, %v3487_v9  ;;  %vm3527_vm6 = vcmp.le.s32.totalorder %v4769_v24, %v3484_v41 }
 0x2ae   : > { %vm3538_vm7 = vcmp.le.s32.totalorder %v4778_v8, %v3489_v28 }
 0x2b3   : > { %v3417_v56 = vld [vmem:[#allocation3] sm:$0x3] }
 0x2b4   : > { %v3449_v14 = vrot.slane %v3417_v56, %v8512_v0  ;;  %v3453_v39 = vrot.slane %v3417_v56, %v8513_v19  ;;  %v3416_v1 = vld [vmem:[#allocation2] sm:$0x3] }
 0x2b5   : > { %v3422_v43 = vrot.slane %v3416_v1, %v8512_v0  ;;  %v3426_v40 = vrot.slane %v3416_v1, %v8513_v19 }
 0x2b6   : > { %v3456_v13 = vsel %vm3429_vm9, %v3449_v14, 0.0  ;;  %v3457_v62 = vsel %vm3429_vm9, %v3453_v39, 0.0  ;;  %v3486_v14 = vadd.s32 104, %v8511_v37  ;;  %v3491_v39 = vadd.s32 144, %v8511_v37 }
 0x2b7   : > { %v3458_v3 = vadd.f32 %v3457_v62, %v3456_v13  ;;  %v3430_v5 = vsel %vm3429_vm9, %v3422_v43, 0.0  ;;  %v3431_v52 = vsel %vm3429_vm9, %v3426_v40, 0.0  ;;  %v3488_v40 = vadd.s32 120, %v8511_v37 }
 0x2b8   : > { %v3432_v30 = vadd.f32 %v3431_v52, %v3430_v5  ;;  %vm3531_vm9 = vcmp.le.s32.totalorder %v4769_v24, %v3486_v14  ;;  %v3493_v13 = vadd.s32 160, %v8511_v37  ;;  %v3490_v62 = vadd.s32 136, %v8511_v37 }
 0x2b9   : > { %3459 = vadd.xlane.f32.xlu1 %v3458_v3 }
 0x2ba   : > { %3433 = vadd.xlane.f32.xlu0 %v3432_v30  ;;  %v3495_v30 = vadd.s32 176, %v8511_v37 }
 0x346   : > { %v3460_v15 = vpop.xlane.xlu1 %3459 }
 0x347   : > { %v3461_v44 = vrot.slane %v3460_v15, 4  ;;  %v3434_v34 = vpop.xlane.xlu0 %3433 }
 0x348   : > { %v3435_v42 = vrot.slane %v3434_v34, 4 }
 0x349   : > { %v3462_v12 = vadd.f32 %v3461_v44, %v3460_v15  ;;  %v3492_v15 = vadd.s32 152, %v8511_v37 }
 0x34a   : > { %v3436_v6 = vadd.f32 %v3435_v42, %v3434_v34 }
 0x34b   : > { %v3463_v47 = vrot.slane %v3462_v12, 2 }
 0x34c   : > { %v3437_v26 = vrot.slane %v3436_v6, 2 }
 0x34d   : > { %v3464_v22 = vadd.f32 %v3463_v47, %v3462_v12 }
 0x34e   : > { %v3438_v33 = vadd.f32 %v3437_v26, %v3436_v6  ;;  %v3494_v6 = vadd.s32 168, %v8511_v37 }
 0x34f   : > { %v3465_v38 = vrot.slane %v3464_v22, 1 }
 0x350   : > { %v3439_v2 = vrot.slane %v3438_v33, 1 }
 0x351   : > { %v3466_v20 = vadd.f32 %v3465_v38, %v3464_v22  ;;  %v3499_v38 = vadd.s32 208, %v8511_v37 }
 0x352   : > { %v3440_v49 = vadd.f32 %v3439_v2, %v3438_v33  ;;  %v3496_v2 = vadd.s32 184, %v8511_v37 }
 0x354   : > { %4415 = vpush %v3440_v49 }
 0x355   : > { %4417 = vpush %v3466_v20 }
 0x385   : > { %s4416_s20 = spop %4415 }
 0x386   : > { %v3442_v27 = vstv %s4416_s20  ;;  %s4418_s21 = spop %4417 }
 0x387   : > { %4445 = vrcp.f32 %v3442_v27  ;;  %v3468_v7 = vstv %s4418_s21 }
 0x388   : > { %4447 = vrcp.f32 %v3468_v7 }
 0x391   : > { %v4446_v11 = vpop.eup %4445 }
 0x392   : > { %v4448_v31 = vpop.eup %4447  ;;  %v3444_v61 = vmul.f32 %v4446_v11, %v3416_v1  ;;  %v3501_v11 = vadd.s32 224, %v8511_v37 }
 0x393   : > { %v3470_v4 = vmul.f32 %v4448_v31, %v3417_v56  ;;  %v3498_v31 = vadd.s32 200, %v8511_v37 }
 0x395   : > { %v3471_v50 = vsub.f32 %v3444_v61, %v3470_v4 }
 0x397   : > { %v8043_v51 = vrot.slane %v3471_v50, %v8512_v0  ;;  %v8077_v57 = vrot.slane %v3471_v50, %v8513_v19 }
 0x399   : > { %v3584_v59 = vsel %vm3509_vm15, %v8043_v51, 0.0  ;;  %v3580_v25 = vsel %vm3505_vm2, %v8043_v51, 0.0  ;;  %v3588_v55 = vsel %vm3513_vm5, %v8043_v51, 0.0  ;;  %v3582_v53 = vsel %vm3507_vm3, %v8043_v51, 0.0 }
 0x39a   : > { %3651 = vadd.xlane.f32.xlu1 %v3584_v59  ;;  %3645 = vadd.xlane.f32.xlu0 %v3580_v25  ;;  %v3592_v48 = vsel %vm3517_vm8, %v8043_v51, 0.0  ;;  %v3586_v45 = vsel %vm3511_vm10, %v8043_v51, 0.0  ;;  %v3596_v21 = vsel %vm3521_vm13, %v8043_v51, 0.0  ;;  %v3590_v35 = vsel %vm3515_vm11, %v8043_v51, 0.0 }
 0x39b   : > { %v3600_v10 = vsel %vm3525_vm14, %v8043_v51, 0.0  ;;  %v3594_v54 = vsel %vm3519_vm12, %v8043_v51, 0.0  ;;  %v3604_v56 = vsel %vm3529_vm0, %v8043_v51, 0.0  ;;  %v3598_v0 = vsel %vm3523_vm1, %v8043_v51, 0.0 }
 0x39c   : > { %v3608_v1 = vsel %vm3533_vm4, %v8043_v51, 0.0  ;;  %v3602_v19 = vsel %vm3527_vm6, %v8043_v51, 0.0  ;;  %v3613_v43 = vsel %vm3538_vm7, %v8077_v57, 0.0  ;;  %vm3542_vm15 = vcmp.le.s32.totalorder %v4778_v8, %v3491_v39 }
 0x39d   : > { %v3692_v3 = vadd.f32 %v3613_v43, %v8043_v51  ;;  %v3606_v5 = vsel %vm3531_vm9, %v8043_v51, 0.0  ;;  %v3617_v52 = vsel %vm3542_vm15, %v8077_v57, 0.0  ;;  %vm3535_vm2 = vcmp.le.s32.totalorder %v4769_v24, %v3488_v40 }
 0x39e   : > { %3657 = vadd.xlane.f32.xlu1 %v3588_v55  ;;  %3648 = vadd.xlane.f32.xlu0 %v3582_v53  ;;  %vm3546_vm5 = vcmp.le.s32.totalorder %v4778_v8, %v3493_v13  ;;  %vm3540_vm3 = vcmp.le.s32.totalorder %v4778_v8, %v3490_v62  ;;  %v3698_v44 = vadd.f32 %v3617_v52, %v8043_v51  ;;  %v3610_v34 = vsel %vm3535_vm2, %v8043_v51, 0.0 }
 0x39f   : > { %v3621_v42 = vsel %vm3546_vm5, %v8077_v57, 0.0  ;;  %v3615_v12 = vsel %vm3540_vm3, %v8077_v57, 0.0  ;;  %vm3550_vm8 = vcmp.le.s32.totalorder %v4778_v8, %v3495_v30  ;;  %vm3544_vm10 = vcmp.le.s32.totalorder %v4778_v8, %v3492_v15 }
 0x3a0   : > { %v3497_v24 = vadd.s32 192, %v8511_v37  ;;  %v3704_v47 = vadd.f32 %v3621_v42, %v8043_v51  ;;  %v3695_v26 = vadd.f32 %v3615_v12, %v8043_v51  ;;  %v3625_v22 = vsel %vm3550_vm8, %v8077_v57, 0.0 }
 0x3a1   : > { %v3619_v33 = vsel %vm3544_vm10, %v8077_v57, 0.0  ;;  %vm3548_vm11 = vcmp.le.s32.totalorder %v4778_v8, %v3494_v6  ;;  %v3710_v20 = vadd.f32 %v3625_v22, %v8043_v51  ;;  %vm3558_vm14 = vcmp.le.s32.totalorder %v4778_v8, %v3499_v38 }
 0x3a2   : > { %3663 = vadd.xlane.f32.xlu1 %v3592_v48  ;;  %3654 = vadd.xlane.f32.xlu0 %v3586_v45  ;;  %vm3554_vm13 = vcmp.le.s32.totalorder %v4778_v8, %v3497_v24  ;;  %v3701_v49 = vadd.f32 %v3619_v33, %v8043_v51  ;;  %v3623_v7 = vsel %vm3548_vm11, %v8077_v57, 0.0  ;;  %vm3552_vm12 = vcmp.le.s32.totalorder %v4778_v8, %v3496_v2 }
 0x3a3   : > { %v3629_v27 = vsel %vm3554_vm13, %v8077_v57, 0.0  ;;  %v3707_v16 = vadd.f32 %v3623_v7, %v8043_v51  ;;  %v3633_v4 = vsel %vm3558_vm14, %v8077_v57, 0.0  ;;  %v3627_v50 = vsel %vm3552_vm12, %v8077_v57, 0.0 }
 0x3a4   : > { %v3716_v61 = vadd.f32 %v3629_v27, %v8043_v51  ;;  %vm3562_vm0 = vcmp.le.s32.totalorder %v4778_v8, %v3501_v11  ;;  %vm3556_vm1 = vcmp.le.s32.totalorder %v4778_v8, %v3498_v31  ;;  %v3722_v59 = vadd.f32 %v3633_v4, %v8043_v51 }
 0x3a5   : > { %v3713_v25 = vadd.f32 %v3627_v50, %v8043_v51  ;;  %v3637_v17 = vsel %vm3562_vm0, %v8077_v57, 0.0  ;;  %v3631_v58 = vsel %vm3556_vm1, %v8077_v57, 0.0  ;;  %vm3566_vm4 = vcmp.le.s32.totalorder %v4778_v8, %v3503_v23 }
 0x3a6   : > { %3669 = vadd.xlane.f32.xlu1 %v3596_v21  ;;  %3660 = vadd.xlane.f32.xlu0 %v3590_v35  ;;  %vm3560_vm6 = vcmp.le.s32.totalorder %v4778_v8, %v3500_v60  ;;  %v3502_v55 = vadd.s32 232, %v8511_v37  ;;  %v3728_v53 = vadd.f32 %v3637_v17, %v8043_v51  ;;  %v3719_v32 = vadd.f32 %v3631_v58, %v8043_v51 }
 0x3a7   : > { %v3641_v63 = vsel %vm3566_vm4, %v8077_v57, 0.0  ;;  %v3635_v48 = vsel %vm3560_vm6, %v8077_v57, 0.0  ;;  %v3504_v45 = vadd.s32 248, %v8511_v37 }
 0x3a8   : > { %vm3564_vm7 = vcmp.le.s32.totalorder %v4778_v8, %v3502_v55  ;;  %v3734_v18 = vadd.f32 %v3641_v63, %v8043_v51  ;;  %v3725_v36 = vadd.f32 %v3635_v48, %v8043_v51 }
 0x3a9   : > { %v3639_v21 = vsel %vm3564_vm7, %v8077_v57, 0.0  ;;  %vm3568_vm9 = vcmp.le.s32.totalorder %v4778_v8, %v3504_v45 }
 0x3aa   : > { %3675 = vadd.xlane.f32.xlu1 %v3600_v10  ;;  %3666 = vadd.xlane.f32.xlu0 %v3594_v54  ;;  %v3731_v35 = vadd.f32 %v3639_v21, %v8043_v51  ;;  %v3643_v29 = vsel %vm3568_vm9, %v8077_v57, 0.0 }
 0x3ab   : > { %v3737_v46 = vadd.f32 %v3643_v29, %v8043_v51 }
 0x3ae   : > { %3681 = vadd.xlane.f32.xlu1 %v3604_v56  ;;  %3672 = vadd.xlane.f32.xlu0 %v3598_v0 }
 0x3b2   : > { %3687 = vadd.xlane.f32.xlu1 %v3608_v1  ;;  %3678 = vadd.xlane.f32.xlu0 %v3602_v19 }
 0x3b6   : > { %3693 = vadd.xlane.f32.xlu1 %v3692_v3  ;;  %3684 = vadd.xlane.f32.xlu0 %v3606_v5 }
 0x3ba   : > { %3699 = vadd.xlane.f32.xlu1 %v3698_v44  ;;  %3690 = vadd.xlane.f32.xlu0 %v3610_v34 }
 0x3be   : > { %3705 = vadd.xlane.f32.xlu1 %v3704_v47  ;;  %3696 = vadd.xlane.f32.xlu0 %v3695_v26 }
 0x3c2   : > { %3711 = vadd.xlane.f32.xlu1 %v3710_v20  ;;  %3702 = vadd.xlane.f32.xlu0 %v3701_v49 }
 0x3c6   : > { %3717 = vadd.xlane.f32.xlu1 %v3716_v61  ;;  %3708 = vadd.xlane.f32.xlu0 %v3707_v16 }
 0x3ca   : > { %3723 = vadd.xlane.f32.xlu1 %v3722_v59  ;;  %3714 = vadd.xlane.f32.xlu0 %v3713_v25 }
 0x3ce   : > { %3729 = vadd.xlane.f32.xlu1 %v3728_v53  ;;  %3720 = vadd.xlane.f32.xlu0 %v3719_v32 }
 0x3d2   : > { %3735 = vadd.xlane.f32.xlu1 %v3734_v18  ;;  %3726 = vadd.xlane.f32.xlu0 %v3725_v36 }
 0x3d6   : > { %3732 = vadd.xlane.f32.xlu0 %v3731_v35 }
 0x3da   : > { %3738 = vadd.xlane.f32.xlu0 %v3737_v46 }
 0x427   : > { %v3652_v10 = vpop.xlane.xlu1 %3651  ;;  %v3646_v37 = vpop.xlane.xlu0 %3645 }
 0x428   : > { %v3740_v41 = vand.u32 2147483647, %v3646_v37  ;;  %v3742_v56 = vand.u32 2147483647, %v3652_v10 }
 0x42b   : > { %v3658_v54 = vpop.xlane.xlu1 %3657  ;;  %v3649_v9 = vpop.xlane.xlu0 %3648 }
 0x42c   : > { %v3741_v28 = vand.u32 2147483647, %v3649_v9  ;;  %v3744_v19 = vand.u32 2147483647, %v3658_v54 }
 0x42e   : > { %v3772_v0 = vadd.f32 %v3741_v28, %v3740_v41 }
 0x42f   : > { %v3664_v14 = vpop.xlane.xlu1 %3663  ;;  %v3655_v39 = vpop.xlane.xlu0 %3654 }
 0x430   : > { %v3773_v1 = vadd.f32 %v3772_v0, %v3742_v56  ;;  %v3743_v8 = vand.u32 2147483647, %v3655_v39  ;;  %v3746_v51 = vand.u32 2147483647, %v3664_v14 }
 0x432   : > { %v3774_v43 = vadd.f32 %v3773_v1, %v3743_v8 }
 0x433   : > { %v3670_v40 = vpop.xlane.xlu1 %3669  ;;  %v3661_v57 = vpop.xlane.xlu0 %3660 }
 0x434   : > { %v3775_v13 = vadd.f32 %v3774_v43, %v3744_v19  ;;  %v3745_v62 = vand.u32 2147483647, %v3661_v57  ;;  %v3748_v44 = vand.u32 2147483647, %v3670_v40 }
 0x436   : > { %v3776_v3 = vadd.f32 %v3775_v13, %v3745_v62 }
 0x437   : > { %v3676_v5 = vpop.xlane.xlu1 %3675  ;;  %v3667_v52 = vpop.xlane.xlu0 %3666 }
 0x438   : > { %v3777_v30 = vadd.f32 %v3776_v3, %v3746_v51  ;;  %v3747_v15 = vand.u32 2147483647, %v3667_v52  ;;  %v3750_v47 = vand.u32 2147483647, %v3676_v5 }
 0x43a   : > { %v3778_v34 = vadd.f32 %v3777_v30, %v3747_v15 }
 0x43b   : > { %v3682_v42 = vpop.xlane.xlu1 %3681  ;;  %v3673_v12 = vpop.xlane.xlu0 %3672 }
 0x43c   : > { %v3779_v24 = vadd.f32 %v3778_v34, %v3748_v44  ;;  %v3749_v6 = vand.u32 2147483647, %v3673_v12  ;;  %v3752_v20 = vand.u32 2147483647, %v3682_v42 }
 0x43e   : > { %v3780_v26 = vadd.f32 %v3779_v24, %v3749_v6 }
 0x43f   : > { %v3688_v22 = vpop.xlane.xlu1 %3687  ;;  %v3679_v33 = vpop.xlane.xlu0 %3678 }
 0x440   : > { %v3781_v38 = vadd.f32 %v3780_v26, %v3750_v47  ;;  %v3751_v2 = vand.u32 2147483647, %v3679_v33  ;;  %v3754_v61 = vand.u32 2147483647, %v3688_v22 }
 0x442   : > { %v3782_v49 = vadd.f32 %v3781_v38, %v3751_v2 }
 0x443   : > { %v3694_v27 = vpop.xlane.xlu1 %3693  ;;  %v3685_v7 = vpop.xlane.xlu0 %3684 }
 0x444   : > { %v3783_v11 = vadd.f32 %v3782_v49, %v3752_v20  ;;  %v3753_v31 = vand.u32 2147483647, %v3685_v7  ;;  %v3756_v59 = vand.u32 2147483647, %v3694_v27 }
 0x446   : > { %v3784_v16 = vadd.f32 %v3783_v11, %v3753_v31 }
 0x447   : > { %v3700_v4 = vpop.xlane.xlu1 %3699  ;;  %v3691_v50 = vpop.xlane.xlu0 %3690 }
 0x448   : > { %v3785_v23 = vadd.f32 %v3784_v16, %v3754_v61  ;;  %v3755_v60 = vand.u32 2147483647, %v3691_v50  ;;  %v3758_v32 = vand.u32 2147483647, %v3700_v4 }
 0x44a   : > { %v3786_v25 = vadd.f32 %v3785_v23, %v3755_v60 }
 0x44b   : > { %v3706_v17 = vpop.xlane.xlu1 %3705  ;;  %v3697_v58 = vpop.xlane.xlu0 %3696 }
 0x44c   : > { %v3787_v55 = vadd.f32 %v3786_v25, %v3756_v59  ;;  %v3757_v53 = vand.u32 2147483647, %v3697_v58  ;;  %v3760_v21 = vand.u32 2147483647, %v3706_v17 }
 0x44e   : > { %v3788_v63 = vadd.f32 %v3787_v55, %v3757_v53 }
 0x44f   : > { %v3712_v48 = vpop.xlane.xlu1 %3711  ;;  %v3703_v45 = vpop.xlane.xlu0 %3702 }
 0x450   : > { %v3789_v18 = vadd.f32 %v3788_v63, %v3758_v32  ;;  %v3759_v36 = vand.u32 2147483647, %v3703_v45  ;;  %v3762_v54 = vand.u32 2147483647, %v3712_v48 }
 0x452   : > { %v3790_v35 = vadd.f32 %v3789_v18, %v3759_v36 }
 0x453   : > { %v3718_v29 = vpop.xlane.xlu1 %3717  ;;  %v3709_v46 = vpop.xlane.xlu0 %3708 }
 0x454   : > { %v3791_v10 = vadd.f32 %v3790_v35, %v3760_v21  ;;  %v3761_v37 = vand.u32 2147483647, %v3709_v46  ;;  %v3764_v14 = vand.u32 2147483647, %v3718_v29 }
 0x456   : > { %v3792_v9 = vadd.f32 %v3791_v10, %v3761_v37 }
 0x457   : > { %v3724_v41 = vpop.xlane.xlu1 %3723  ;;  %v3715_v28 = vpop.xlane.xlu0 %3714 }
 0x458   : > { %v3793_v56 = vadd.f32 %v3792_v9, %v3762_v54  ;;  %v3763_v0 = vand.u32 2147483647, %v3715_v28  ;;  %v3766_v40 = vand.u32 2147483647, %v3724_v41 }
 0x45a   : > { %v3794_v39 = vadd.f32 %v3793_v56, %v3763_v0 }
 0x45b   : > { %v3721_v1 = vpop.xlane.xlu0 %3720  ;;  %v3730_v43 = vpop.xlane.xlu1 %3729 }
 0x45c   : > { %v3795_v8 = vadd.f32 %v3794_v39, %v3764_v14  ;;  %v3765_v19 = vand.u32 2147483647, %v3721_v1  ;;  %v3768_v3 = vand.u32 2147483647, %v3730_v43 }
 0x45e   : > { %v3796_v57 = vadd.f32 %v3795_v8, %v3765_v19 }
 0x45f   : > { %v3727_v13 = vpop.xlane.xlu0 %3726  ;;  %v3736_v52 = vpop.xlane.xlu1 %3735 }
 0x460   : > { %v3797_v62 = vadd.f32 %v3796_v57, %v3766_v40  ;;  %v3767_v51 = vand.u32 2147483647, %v3727_v13  ;;  %v3770_v34 = vand.u32 2147483647, %v3736_v52 }
 0x462   : > { %v3798_v5 = vadd.f32 %v3797_v62, %v3767_v51 }
 0x463   : > { %v3733_v30 = vpop.xlane.xlu0 %3732 }
 0x464   : > { %v3799_v15 = vadd.f32 %v3798_v5, %v3768_v3  ;;  %v3769_v44 = vand.u32 2147483647, %v3733_v30 }
 0x466   : > { %v3800_v42 = vadd.f32 %v3799_v15, %v3769_v44 }
 0x467   : > { %v3739_v12 = vpop.xlane.xlu0 %3738 }
 0x468   : > { %v3801_v24 = vadd.f32 %v3800_v42, %v3770_v34  ;;  %v3771_v6 = vand.u32 2147483647, %v3739_v12 }
 0x46a   : > { %v3802_v47 = vadd.f32 %v3801_v24, %v3771_v6 }
 0x46c   : > { %v3803_v26 = vrot.slane %v3802_v47, 4 }
 0x46e   : > { %v3804_v22 = vadd.f32 %v3803_v26, %v3802_v47 }
 0x470   : > { %v3805_v33 = vrot.slane %v3804_v22, 2 }
 0x472   : > { %v3806_v38 = vadd.f32 %v3805_v33, %v3804_v22 }
 0x474   : > { %v3807_v2 = vrot.slane %v3806_v38, 1 }
 0x476   : > { %v3808_v20 = vadd.f32 %v3807_v2, %v3806_v38 }
 0x478   : > { %3809 = vst [vmem:[%s189_s24] sm:$0xff] %v3808_v20 }
 0x479 PF: > { %s12_s11 = sadd.s32 1, %s4471_s11   ;;  %s8514_s9 = smov %s4467_s10 }
 0x47a   : > { %p9_p5 = scmp.ge.s32.totalorder %s12_s11, 5   ;;  %s8515_s10 = smov %s8517_s12 }
 0x47c   :  { %11 = sbr.rel (!%p9_p5) target bundleno = 2 (0x2), region = 69 }

</bundles_post_ra>
